<compile_context>
chip_gen: v5e
topology: v5e:2x2
jax: 0.10.0
libtpu: 0.0.40
codegen_flags: <defaults>
</compile_context>

<pallas_src>
import functools

import numpy as np
import jax
import jax.numpy as jnp
from jax.experimental import pallas as pl
from jax.experimental.pallas import tpu as pltpu

NEG_SLOPE = 0.01   # F.leaky_relu default negative_slope
LANE = 128


def _leaky(v):
    return jnp.where(v >= 0, v, NEG_SLOPE * v)


def _resnet_up_kernel(x_ref, w1s_ref, w1m_ref, sc1_ref, sh1_ref,
                      w2p_ref, w2s_ref, sc2_ref, sh2_ref, mask_ref,
                      out_ref, xpad, tpad, ppad, *, rs):
    """One grid step: a strip of zero-halo samples, channels on sublanes."""
    Cin = x_ref.shape[1]
    Cm = sc1_ref.shape[0]
    Cout = sc2_ref.shape[0]
    L = x_ref.shape[2]
    PAD = rs                       # lane padding on each side of the line buffers
    bf = jnp.bfloat16

    # One-time zeroing: the never-rewritten border lanes of the line buffers provide
    # the out-of-strip zero padding and keep every masked lane finite.  Interiors are
    # fully rewritten every step, so this only needs to run on the first step.
    @pl.when(pl.program_id(0) == 0)
    def _init():
        xpad[...] = jnp.zeros_like(xpad)
        tpad[...] = jnp.zeros_like(tpad)
        ppad[...] = jnp.zeros_like(ppad)

    x = x_ref[0]                                   # (Cin, L) bf16
    masks = mask_ref[...]                          # (5, L) f32
    m_up, m_dn = masks[0:1], masks[1:2]            # (h-1 valid), (h+1 valid)
    m_lf, m_rt = masks[2:3], masks[3:4]            # (w-1 valid), (w+1 valid)
    m_int = masks[4:5]                             # 1 at real pixels, 0 on halo/pad
    sc1, sh1 = sc1_ref[...], sh1_ref[...]
    sc2, sh2 = sc2_ref[...], sh2_ref[...]

    # ------------- conv1 (3x3) + fused 1x1 skip -> bn1 (eval) -> leaky_relu ----------
    # xpad block d (= ky) holds x shifted vertically by dy = d-1, so one window load at
    # lane offset PAD+dx yields all three ky taps stacked on sublanes: 3 matmuls of
    # K = 3*Cin.  The dx=0 weight has the 1x1 skip stacked as extra output rows.
    for d in range(3):
        off = PAD - (d - 1) * rs
        xpad[d * Cin:(d + 1) * Cin, off:off + L] = x

    part_m = jnp.dot(w1s_ref[0], xpad[0:3 * Cin, PAD - 1:PAD - 1 + L],
                     preferred_element_type=jnp.float32)
    part_0 = jnp.dot(w1m_ref[...], xpad[0:3 * Cin, PAD:PAD + L],
                     preferred_element_type=jnp.float32)
    part_p = jnp.dot(w1s_ref[1], xpad[0:3 * Cin, PAD + 1:PAD + 1 + L],
                     preferred_element_type=jnp.float32)
    # m_int zeroes the halo lanes so they stay exact zero padding for conv2.
    h = _leaky((part_m + part_0[0:Cm] + part_p) * sc1 + sh1) * m_int   # (Cm, L)
    s0 = part_0[Cm:Cm + Cout]                       # low-res skip (bias folded in sh2)

    # ------------- x2 bilinear upsample (align_corners=False), polyphase -------------
    # Separable 2-tap clamp-lerp in f32:  base + 0.25*m*(shift(base) - base).
    def vblend(z, rows):
        tpad[0:rows, PAD:PAD + L] = z
        up = tpad[0:rows, PAD - rs:PAD - rs + L]
        dn = tpad[0:rows, PAD + rs:PAD + rs + L]
        return (z + 0.25 * m_up * (up - z),         # even output rows
                z + 0.25 * m_dn * (dn - z))         # odd output rows

    def hblend(a, rows):
        tpad[0:rows, PAD:PAD + L] = a
        lf = tpad[0:rows, PAD - 1:PAD - 1 + L]
        rt = tpad[0:rows, PAD + 1:PAD + 1 + L]
        return (a + 0.25 * m_lf * (lf - a),         # even output cols
                a + 0.25 * m_rt * (rt - a))         # odd output cols

    a0, a1 = vblend(h, Cm)
    p00, p01 = hblend(a0, Cm)                       # P[row parity][col parity]
    p10, p11 = hblend(a1, Cm)

    # ------------- conv2 phase line buffers (bf16, cast once per phase) --------------
    # Buffer for column parity tpar stacks, by rows of Cm:
    #   [ P(1,tpar) shifted dh=-1 ; P(0,tpar) ; P(1,tpar) ; P(0,tpar) shifted dh=+1 ]
    # so the r=0 operand is rows [0:3Cm] and the r=1 operand is rows [Cm:4Cm], both
    # K-ordered (ky=-1, 0, +1) to match the packed conv2 weights.
    for tpar, (pe, po) in enumerate(((p00, p10), (p01, p11))):
        base = tpar * 4 * Cm
        pe_b, po_b = pe.astype(bf), po.astype(bf)
        ppad[base + 0 * Cm:base + 1 * Cm, PAD + rs:PAD + rs + L] = po_b
        ppad[base + 1 * Cm:base + 2 * Cm, PAD:PAD + L] = pe_b
        ppad[base + 2 * Cm:base + 3 * Cm, PAD:PAD + L] = po_b
        ppad[base + 3 * Cm:base + 4 * Cm, PAD - rs:PAD - rs + L] = pe_b

    sa0, sa1 = vblend(s0, Cout)                     # skip row-blend; col-blend per r

    # ------------- conv2 (3x3, zero padded) on the upsampled image, phase space ------
    # Per output-row-parity r there are only 4 distinct (col parity, dw) operands;
    # weights that hit a shared operand are pre-stacked (M = 2*Cout) -> 4 matmuls per r.
    for r, sa in enumerate((sa0, sa1)):
        lo = 0 if r == 0 else Cm
        opB = ppad[lo:lo + 3 * Cm, PAD:PAD + L]                             # t=0,dw=0
        opD = ppad[lo:lo + 3 * Cm, PAD + 1:PAD + 1 + L]                     # t=0,dw=+1
        opC = ppad[4 * Cm + lo:4 * Cm + lo + 3 * Cm, PAD:PAD + L]           # t=1,dw=0
        opA = ppad[4 * Cm + lo:4 * Cm + lo + 3 * Cm, PAD - 1:PAD - 1 + L]   # t=1,dw=-1

        yB = jnp.dot(w2p_ref[0], opB, preferred_element_type=jnp.float32)   # (2Cout, L)
        yC = jnp.dot(w2p_ref[1], opC, preferred_element_type=jnp.float32)   # (2Cout, L)
        yA = jnp.dot(w2s_ref[0], opA, preferred_element_type=jnp.float32)   # (Cout, L)
        yD = jnp.dot(w2s_ref[1], opD, preferred_element_type=jnp.float32)   # (Cout, L)

        sp_e, sp_o = hblend(sa, Cout)               # skip phases for this row parity
        y0 = yA + yB[0:Cout] + yC[0:Cout]           # col-even output
        y1 = yD + yB[Cout:2 * Cout] + yC[Cout:2 * Cout]   # col-odd output
        out_ref[0, 2 * r + 0] = _leaky(y0 * sc2 + sh2 + sp_e)
        out_ref[0, 2 * r + 1] = _leaky(y1 * sc2 + sh2 + sp_o)


# ---------------------------------------------------------------------------
# Host-side glue: halo layout, parameter packing, pallas_call, phase interleave
# ---------------------------------------------------------------------------

def _pack_conv_weights(w):
    # (O, I, 3, 3) -> (3 [kx], O, 3*I) with columns ordered [ky, in-channel]
    O, I = w.shape[0], w.shape[1]
    return jnp.transpose(w, (3, 0, 2, 1)).reshape(3, O, 3 * I)


def _build_masks(H, W, spb, L):
    """(5, L) f32 masks on the halo-lane layout: up/dn/lf/rt clamp + interior."""
    hh = np.repeat(np.arange(H + 2), W + 2)
    ww = np.tile(np.arange(W + 2), H + 2)
    real = (hh >= 1) & (hh <= H) & (ww >= 1) & (ww <= W)
    hr, wr = hh - 1, ww - 1
    m = np.stack([
        real & (hr >= 1),
        real & (hr <= H - 2),
        real & (wr >= 1),
        real & (wr <= W - 2),
        real,
    ]).astype(np.float32)                                   # (5, (H+2)*(W+2))
    m = np.tile(m, (1, spb))
    out = np.zeros((5, L), np.float32)
    out[:, :m.shape[1]] = m
    return out


def init_params(key, in_features, out_features, batchnorm_epsilon=0.01):
    mid = out_features // 2
    ks = jax.random.split(key, 14)
    n = jax.random.normal
    return dict(
        w1=0.3 * n(ks[0], (mid, in_features, 3, 3), jnp.float32),
        b1=0.1 * n(ks[1], (mid,), jnp.float32),
        g1=1.0 + 0.1 * n(ks[2], (mid,), jnp.float32),
        be1=0.1 * n(ks[3], (mid,), jnp.float32),
        rm1=0.1 * n(ks[4], (mid,), jnp.float32),
        rv1=1.0 + 0.1 * jax.random.uniform(ks[5], (mid,), jnp.float32),
        w2=0.3 * n(ks[6], (out_features, mid, 3, 3), jnp.float32),
        b2=0.1 * n(ks[7], (out_features,), jnp.float32),
        g2=1.0 + 0.1 * n(ks[8], (out_features,), jnp.float32),
        be2=0.1 * n(ks[9], (out_features,), jnp.float32),
        rm2=0.1 * n(ks[10], (out_features,), jnp.float32),
        rv2=1.0 + 0.1 * jax.random.uniform(ks[11], (out_features,), jnp.float32),
        wp=0.3 * n(ks[12], (out_features, in_features, 1, 1), jnp.float32),
        bp=0.1 * n(ks[13], (out_features,), jnp.float32),
        eps=batchnorm_epsilon,
    )


def resnet_up_pallas(x, p, scale=2, samples_per_step=None):
    assert scale == 2, "kernel implements 3x3 convs + x2 bilinear upsample"
    B, Cin, H, W = x.shape
    Cm = p["w1"].shape[0]
    Cout = p["w2"].shape[0]

    # Fold the whole batch into the lane axis by default (lane-dense matmuls, one step).
    spb = B if samples_per_step is None else samples_per_step
    assert B % spb == 0
    nb = B // spb

    rs = W + 2                                   # halo row stride
    HS = (H + 2) * rs                            # lanes per halo-padded sample
    L_raw = spb * HS
    L = ((L_raw + LANE - 1) // LANE) * LANE      # lane-dense (multiple of 128)
    PAD = rs
    WPAD = L + 2 * PAD

    # activations: per-sample 2-D zero halo ring, samples concatenated on lanes, bf16
    xh = jnp.pad(x, ((0, 0), (0, 0), (1, 1), (1, 1)))
    xh = xh.reshape(nb, spb, Cin, HS).transpose(0, 2, 1, 3).reshape(nb, Cin, L_raw)
    xh = jnp.pad(xh, ((0, 0), (0, 0), (0, L - L_raw))).astype(jnp.bfloat16)

    # conv weights: kx-grouped (K = 3*C_in), 1x1 skip fused into conv1's dx=0 matmul,
    # conv2 weights pre-stacked per shared operand
    bf = jnp.bfloat16
    w1k = _pack_conv_weights(p["w1"])
    wp = p["wp"][:, :, 0, 0]
    wp_mid = jnp.concatenate(
        [jnp.zeros((Cout, Cin), jnp.float32), wp, jnp.zeros((Cout, Cin), jnp.float32)],
        axis=1)
    w1_side = jnp.stack([w1k[0], w1k[2]]).astype(bf)                  # (2, Cm, 3Cin)
    w1_mid = jnp.concatenate([w1k[1], wp_mid], axis=0).astype(bf)     # (Cm+Cout, 3Cin)
    w2k = _pack_conv_weights(p["w2"])
    w2_pair = jnp.stack([jnp.concatenate([w2k[1], w2k[0]], axis=0),
                         jnp.concatenate([w2k[2], w2k[1]], axis=0)]).astype(bf)
    w2_single = jnp.stack([w2k[0], w2k[2]]).astype(bf)                # (2, Cout, 3Cm)

    # fuse conv biases + eval-mode BN into per-channel scale/shift; fold the
    # point-wise bias into the second shift (added to the same pre-activation)
    eps = p["eps"]
    inv1 = 1.0 / jnp.sqrt(p["rv1"] + eps)
    sc1 = (p["g1"] * inv1).reshape(Cm, 1)
    sh1 = ((p["b1"] - p["rm1"]) * p["g1"] * inv1 + p["be1"]).reshape(Cm, 1)
    inv2 = 1.0 / jnp.sqrt(p["rv2"] + eps)
    sc2 = (p["g2"] * inv2).reshape(Cout, 1)
    sh2 = ((p["b2"] - p["rm2"]) * p["g2"] * inv2 + p["be2"] + p["bp"]).reshape(Cout, 1)

    masks = jnp.asarray(_build_masks(H, W, spb, L))

    kernel = functools.partial(_resnet_up_kernel, rs=rs)
    out_ph = pl.pallas_call(
        kernel,
        out_shape=jax.ShapeDtypeStruct((nb, 4, Cout, L), jnp.float32),
        grid_spec=pltpu.PrefetchScalarGridSpec(
            num_scalar_prefetch=0,
            grid=(nb,),
            in_specs=[
                pl.BlockSpec((1, Cin, L), lambda g: (g, 0, 0)),            # x strip (bf16)
                pl.BlockSpec((2, Cm, 3 * Cin), lambda g: (0, 0, 0)),       # conv1 dx=+-1
                pl.BlockSpec((Cm + Cout, 3 * Cin), lambda g: (0, 0)),      # conv1 dx=0 + skip
                pl.BlockSpec((Cm, 1), lambda g: (0, 0)),                   # bn1 scale
                pl.BlockSpec((Cm, 1), lambda g: (0, 0)),                   # bn1 shift
                pl.BlockSpec((2, 2 * Cout, 3 * Cm), lambda g: (0, 0, 0)),  # conv2 stacked
                pl.BlockSpec((2, Cout, 3 * Cm), lambda g: (0, 0, 0)),      # conv2 singles
                pl.BlockSpec((Cout, 1), lambda g: (0, 0)),                 # bn2 scale
                pl.BlockSpec((Cout, 1), lambda g: (0, 0)),                 # bn2 shift (+bp)
                pl.BlockSpec((5, L), lambda g: (0, 0)),                    # upsample masks
            ],
            out_specs=pl.BlockSpec((1, 4, Cout, L), lambda g: (g, 0, 0, 0)),
            scratch_shapes=[
                pltpu.VMEM((3 * Cin, WPAD), jnp.bfloat16),       # conv1 line buffer
                pltpu.VMEM((max(Cm, Cout), WPAD), jnp.float32),  # upsample line buffer
                pltpu.VMEM((8 * Cm, WPAD), jnp.bfloat16),        # conv2 phase buffers
            ],
        ),
        compiler_params=pltpu.CompilerParams(
            # "arbitrary": the one-time border zeroing (program_id==0) requires the
            # (usually size-1) batch-block grid to run sequentially on one core.
            dimension_semantics=("arbitrary",),
        ),
    )(xh, w1_side, w1_mid, sc1, sh1, w2_pair, w2_single, sc2, sh2, masks)

    # strip the halo and interleave the 4 polyphase outputs (cheap XLA ops)
    t = out_ph[..., :L_raw].reshape(nb, 2, 2, Cout, spb, H + 2, W + 2)
    t = t[..., 1:H + 1, 1:W + 1]                 # (nb, r, t, Cout, spb, H, W)
    t = t.transpose(0, 4, 3, 5, 1, 6, 2)         # (nb, spb, Cout, H, r, W, t)
    return t.reshape(B, Cout, 2 * H, 2 * W)


# ---------------------------------------------------------------------------
# Plain numpy reference (same semantics) for validation
# ---------------------------------------------------------------------------

def _bilinear_matrix(n_in, scale):
    """1-D bilinear upsample matrix, PyTorch Upsample(align_corners=False)."""
    n_out = n_in * scale
    U = np.zeros((n_out, n_in), np.float32)
    for o in range(n_out):
        src = (o + 0.5) / scale - 0.5
        i0 = int(np.floor(src))
        frac = src - i0
        a = min(max(i0, 0), n_in - 1)
        b = min(max(i0 + 1, 0), n_in - 1)
        U[o, a] += 1.0 - frac
        U[o, b] += frac
    return U


def resnet_up_reference(x, p, scale=2):
    xn = np.asarray(x, np.float64)
    g = lambda k: np.asarray(p[k], np.float64)
    eps = p["eps"]
    B, Cin, H, W = xn.shape

    def conv2d(inp, w, b):
        O, _, kh, kw = w.shape
        pad = (kh - 1) // 2
        Bn, _, Hh, Ww = inp.shape
        xp = np.pad(inp, ((0, 0), (0, 0), (pad, pad), (pad, pad)))
        out = np.zeros((Bn, O, Hh, Ww), np.float64)
        for ky in range(kh):
            for kx in range(kw):
                patch = xp[:, :, ky:ky + Hh, kx:kx + Ww]
                out += np.einsum("oi,bihw->bohw", w[:, :, ky, kx], patch)
        return out + b[None, :, None, None]

    def bn(z, gamma, beta, rm, rv):
        return (gamma[None, :, None, None] * (z - rm[None, :, None, None])
                / np.sqrt(rv[None, :, None, None] + eps) + beta[None, :, None, None])

    Uh = _bilinear_matrix(H, scale).astype(np.float64)
    Uw = _bilinear_matrix(W, scale).astype(np.float64)

    def up(z):
        t = np.einsum("qw,bchw->bchq", Uw, z)
        return np.einsum("ph,bchq->bcpq", Uh, t)

    def leaky(z):
        return np.where(z >= 0, z, NEG_SLOPE * z)

    skip = conv2d(up(xn), g("wp"), g("bp"))
    h = leaky(bn(conv2d(xn, g("w1"), g("b1")), g("g1"), g("be1"), g("rm1"), g("rv1")))
    h = up(h)
    h = bn(conv2d(h, g("w2"), g("b2")), g("g2"), g("be2"), g("rm2"), g("rv2"))
    return leaky(h + skip).astype(np.float32)


if __name__ == "__main__":
    key = jax.random.PRNGKey(0)
    kx, kp = jax.random.split(key)

    B, Cin, H, W = 2, 4, 16, 16
    Cout = 8  # out_features (mid channels = 4)

    x = jax.random.normal(kx, (B, Cin, H, W), jnp.float32)
    params = init_params(kp, Cin, Cout, batchnorm_epsilon=0.01)

    out = jax.block_until_ready(resnet_up_pallas(x, params))

    assert out.shape == (B, Cout, 2 * H, 2 * W), out.shape
    out_np = np.asarray(out)
    if not np.isfinite(out_np).all():
        raise RuntimeError("non-finite values in kernel output")

    ref = resnet_up_reference(x, params)
    abs_err = np.abs(out_np - ref)
    max_err = float(abs_err.max())
    mean_err = float(abs_err.mean())
    # Matmul operands (conv + skip) are bf16 with f32 MXU accumulation, so the
    # tolerance is looser than a pure-f32 comparison would allow.
    if max_err > 1.5e-1 or mean_err > 3e-2:
        raise RuntimeError(f"mismatch vs reference: max {max_err}, mean {mean_err}")

    print("KERNEL_OK")
</pallas_src>

<mosaic_0001>
module attributes {stable_mosaic.version = 11 : i64} {
  func.func @_resnet_up_kernel(%arg0: i32, %arg1: memref<1x4x768xbf16, #tpu.memory_space<vmem>>, %arg2: memref<2x4x12xbf16, #tpu.memory_space<vmem>>, %arg3: memref<12x12xbf16, #tpu.memory_space<vmem>>, %arg4: memref<4x1xf32, #tpu.memory_space<vmem>>, %arg5: memref<4x1xf32, #tpu.memory_space<vmem>>, %arg6: memref<2x16x12xbf16, #tpu.memory_space<vmem>>, %arg7: memref<2x8x12xbf16, #tpu.memory_space<vmem>>, %arg8: memref<8x1xf32, #tpu.memory_space<vmem>>, %arg9: memref<8x1xf32, #tpu.memory_space<vmem>>, %arg10: memref<5x768xf32, #tpu.memory_space<vmem>>, %arg11: memref<1x4x8x768xf32, #tpu.memory_space<vmem>>, %arg12: memref<12x804xbf16, #tpu.memory_space<vmem>>, %arg13: memref<8x804xf32, #tpu.memory_space<vmem>>, %arg14: memref<32x804xbf16, #tpu.memory_space<vmem>>) attributes {dimension_semantics = [#tpu.dimension_semantics<arbitrary>], iteration_bounds = array<i64: 1>, scalar_prefetch = 0 : i64, scratch_operands = 3 : i64, tpu.core_type = #tpu.core_type<tc>, window_params = [{transform_indices = @transform_0, window_bounds = array<i64: 1, 4, 768>}, {pipeline_mode = #tpu.pipeline_mode<synchronous>, transform_indices = @transform_1, window_bounds = array<i64: 2, 4, 12>}, {pipeline_mode = #tpu.pipeline_mode<synchronous>, transform_indices = @transform_2, window_bounds = array<i64: 12, 12>}, {pipeline_mode = #tpu.pipeline_mode<synchronous>, transform_indices = @transform_3, window_bounds = array<i64: 4, 1>}, {pipeline_mode = #tpu.pipeline_mode<synchronous>, transform_indices = @transform_4, window_bounds = array<i64: 4, 1>}, {pipeline_mode = #tpu.pipeline_mode<synchronous>, transform_indices = @transform_5, window_bounds = array<i64: 2, 16, 12>}, {pipeline_mode = #tpu.pipeline_mode<synchronous>, transform_indices = @transform_6, window_bounds = array<i64: 2, 8, 12>}, {pipeline_mode = #tpu.pipeline_mode<synchronous>, transform_indices = @transform_7, window_bounds = array<i64: 8, 1>}, {pipeline_mode = #tpu.pipeline_mode<synchronous>, transform_indices = @transform_8, window_bounds = array<i64: 8, 1>}, {pipeline_mode = #tpu.pipeline_mode<synchronous>, transform_indices = @transform_9, window_bounds = array<i64: 5, 768>}, {transform_indices = @transform_10, window_bounds = array<i64: 1, 4, 8, 768>}]} {
    %c0_i32 = arith.constant 0 : i32
    %0 = arith.cmpi eq, %arg0, %c0_i32 : i32
    %1 = arith.extui %0 : i1 to i32
    %c0_i32_0 = arith.constant 0 : i32
    %2 = arith.cmpi ne, %1, %c0_i32_0 : i32
    scf.if %2 {
      %cst_159 = arith.constant 0.000000e+00 : bf16
      %246 = vector.broadcast %cst_159 : bf16 to vector<12x804xbf16>
      %c0_160 = arith.constant 0 : index
      %c0_161 = arith.constant 0 : index
      %247 = vector.load %arg12[%c0_160, %c0_161] : memref<12x804xbf16, #tpu.memory_space<vmem>>, vector<12x804xbf16>
      tpu.vector_store %arg12[%c0_160, %c0_161], %246 {strides = array<i32>} : memref<12x804xbf16, #tpu.memory_space<vmem>>, vector<12x804xbf16>,
      %cst_162 = arith.constant 0.000000e+00 : f32
      %248 = vector.broadcast %cst_162 : f32 to vector<8x804xf32>
      %c0_163 = arith.constant 0 : index
      %c0_164 = arith.constant 0 : index
      %249 = vector.load %arg13[%c0_163, %c0_164] : memref<8x804xf32, #tpu.memory_space<vmem>>, vector<8x804xf32>
      tpu.vector_store %arg13[%c0_163, %c0_164], %248 {strides = array<i32>} : memref<8x804xf32, #tpu.memory_space<vmem>>, vector<8x804xf32>,
      %cst_165 = arith.constant 0.000000e+00 : bf16
      %250 = vector.broadcast %cst_165 : bf16 to vector<32x804xbf16>
      %c0_166 = arith.constant 0 : index
      %c0_167 = arith.constant 0 : index
      %251 = vector.load %arg14[%c0_166, %c0_167] : memref<32x804xbf16, #tpu.memory_space<vmem>>, vector<32x804xbf16>
      tpu.vector_store %arg14[%c0_166, %c0_167], %250 {strides = array<i32>} : memref<32x804xbf16, #tpu.memory_space<vmem>>, vector<32x804xbf16>,
    } else {
    }
    %c0 = arith.constant 0 : index
    %c0_1 = arith.constant 0 : index
    %c0_2 = arith.constant 0 : index
    %3 = vector.load %arg1[%c0, %c0_1, %c0_2] : memref<1x4x768xbf16, #tpu.memory_space<vmem>>, vector<1x4x768xbf16>
    %4 = vector.shape_cast %3 : vector<1x4x768xbf16> to vector<4x768xbf16>
    %c0_3 = arith.constant 0 : index
    %c0_4 = arith.constant 0 : index
    %5 = vector.load %arg10[%c0_3, %c0_4] : memref<5x768xf32, #tpu.memory_space<vmem>>, vector<5x768xf32>
    %6 = vector.extract_strided_slice %5 {offsets = [0, 0], sizes = [1, 768], strides = [1, 1]} : vector<5x768xf32> to vector<1x768xf32>
    %7 = vector.extract_strided_slice %5 {offsets = [1, 0], sizes = [1, 768], strides = [1, 1]} : vector<5x768xf32> to vector<1x768xf32>
    %8 = vector.extract_strided_slice %5 {offsets = [2, 0], sizes = [1, 768], strides = [1, 1]} : vector<5x768xf32> to vector<1x768xf32>
    %9 = vector.extract_strided_slice %5 {offsets = [3, 0], sizes = [1, 768], strides = [1, 1]} : vector<5x768xf32> to vector<1x768xf32>
    %10 = vector.extract_strided_slice %5 {offsets = [4, 0], sizes = [1, 768], strides = [1, 1]} : vector<5x768xf32> to vector<1x768xf32>
    %c0_5 = arith.constant 0 : index
    %c0_6 = arith.constant 0 : index
    %11 = vector.load %arg4[%c0_5, %c0_6] : memref<4x1xf32, #tpu.memory_space<vmem>>, vector<4x1xf32>
    %c0_7 = arith.constant 0 : index
    %c0_8 = arith.constant 0 : index
    %12 = vector.load %arg5[%c0_7, %c0_8] : memref<4x1xf32, #tpu.memory_space<vmem>>, vector<4x1xf32>
    %c0_9 = arith.constant 0 : index
    %c0_10 = arith.constant 0 : index
    %13 = vector.load %arg8[%c0_9, %c0_10] : memref<8x1xf32, #tpu.memory_space<vmem>>, vector<8x1xf32>
    %c0_11 = arith.constant 0 : index
    %c0_12 = arith.constant 0 : index
    %14 = vector.load %arg9[%c0_11, %c0_12] : memref<8x1xf32, #tpu.memory_space<vmem>>, vector<8x1xf32>
    %c0_13 = arith.constant 0 : index
    %c36 = arith.constant 36 : index
    %15 = vector.load %arg12[%c0_13, %c36] : memref<12x804xbf16, #tpu.memory_space<vmem>>, vector<4x768xbf16>
    tpu.vector_store %arg12[%c0_13, %c36], %4 {strides = array<i32>} : memref<12x804xbf16, #tpu.memory_space<vmem>>, vector<4x768xbf16>,
    %c4 = arith.constant 4 : index
    %c18 = arith.constant 18 : index
    %16 = vector.load %arg12[%c4, %c18] : memref<12x804xbf16, #tpu.memory_space<vmem>>, vector<4x768xbf16>
    tpu.vector_store %arg12[%c4, %c18], %4 {strides = array<i32>} : memref<12x804xbf16, #tpu.memory_space<vmem>>, vector<4x768xbf16>,
    %c8 = arith.constant 8 : index
    %c0_14 = arith.constant 0 : index
    %17 = vector.load %arg12[%c8, %c0_14] : memref<12x804xbf16, #tpu.memory_space<vmem>>, vector<4x768xbf16>
    tpu.vector_store %arg12[%c8, %c0_14], %4 {strides = array<i32>} : memref<12x804xbf16, #tpu.memory_space<vmem>>, vector<4x768xbf16>,
    %c0_15 = arith.constant 0 : index
    %c0_16 = arith.constant 0 : index
    %c0_17 = arith.constant 0 : index
    %18 = vector.load %arg2[%c0_15, %c0_16, %c0_17] : memref<2x4x12xbf16, #tpu.memory_space<vmem>>, vector<1x4x12xbf16>
    %19 = vector.shape_cast %18 : vector<1x4x12xbf16> to vector<4x12xbf16>
    %c0_18 = arith.constant 0 : index
    %c17 = arith.constant 17 : index
    %20 = vector.load %arg12[%c0_18, %c17] : memref<12x804xbf16, #tpu.memory_space<vmem>>, vector<12x768xbf16>
    %cst = arith.constant dense<0.000000e+00> : vector<4x768xf32>
    %21 = tpu.matmul %19, %20, %cst {dimension_numbers = #tpu.dot_dimension_numbers<[1], [0], [0], [1], [0, 0, 1, 1], [], []>} : vector<4x12xbf16>, vector<12x768xbf16>, vector<4x768xf32> -> vector<4x768xf32>
    %c0_19 = arith.constant 0 : index
    %c0_20 = arith.constant 0 : index
    %22 = vector.load %arg3[%c0_19, %c0_20] : memref<12x12xbf16, #tpu.memory_space<vmem>>, vector<12x12xbf16>
    %c0_21 = arith.constant 0 : index
    %c18_22 = arith.constant 18 : index
    %23 = vector.load %arg12[%c0_21, %c18_22] : memref<12x804xbf16, #tpu.memory_space<vmem>>, vector<12x768xbf16>
    %cst_23 = arith.constant dense<0.000000e+00> : vector<12x768xf32>
    %24 = tpu.matmul %22, %23, %cst_23 {dimension_numbers = #tpu.dot_dimension_numbers<[1], [0], [0], [1], [0, 0, 1, 1], [], []>} : vector<12x12xbf16>, vector<12x768xbf16>, vector<12x768xf32> -> vector<12x768xf32>
    %c1 = arith.constant 1 : index
    %c0_24 = arith.constant 0 : index
    %c0_25 = arith.constant 0 : index
    %25 = vector.load %arg2[%c1, %c0_24, %c0_25] : memref<2x4x12xbf16, #tpu.memory_space<vmem>>, vector<1x4x12xbf16>
    %26 = vector.shape_cast %25 : vector<1x4x12xbf16> to vector<4x12xbf16>
    %c0_26 = arith.constant 0 : index
    %c19 = arith.constant 19 : index
    %27 = vector.load %arg12[%c0_26, %c19] : memref<12x804xbf16, #tpu.memory_space<vmem>>, vector<12x768xbf16>
    %cst_27 = arith.constant dense<0.000000e+00> : vector<4x768xf32>
    %28 = tpu.matmul %26, %27, %cst_27 {dimension_numbers = #tpu.dot_dimension_numbers<[1], [0], [0], [1], [0, 0, 1, 1], [], []>} : vector<4x12xbf16>, vector<12x768xbf16>, vector<4x768xf32> -> vector<4x768xf32>
    %29 = vector.extract_strided_slice %24 {offsets = [0, 0], sizes = [4, 768], strides = [1, 1]} : vector<12x768xf32> to vector<4x768xf32>
    %30 = arith.addf %21, %29 : vector<4x768xf32>
    %31 = arith.addf %30, %28 : vector<4x768xf32>
    %32 = vector.broadcast %11 : vector<4x1xf32> to vector<4x768xf32>
    %33 = arith.mulf %31, %32 : vector<4x768xf32>
    %34 = vector.broadcast %12 : vector<4x1xf32> to vector<4x768xf32>
    %35 = arith.addf %33, %34 : vector<4x768xf32>
    %cst_28 = arith.constant 0.000000e+00 : f32
    %36 = vector.broadcast %cst_28 : f32 to vector<4x768xf32>
    %37 = arith.cmpf oge, %35, %36 : vector<4x768xf32>
    %cst_29 = arith.constant 0.00999999977 : f32
    %38 = vector.broadcast %cst_29 : f32 to vector<4x768xf32>
    %39 = arith.mulf %38, %35 : vector<4x768xf32>
    %40 = arith.select %37, %35, %39 : vector<4x768xi1>, vector<4x768xf32>
    %41 = vector.broadcast %10 : vector<1x768xf32> to vector<4x768xf32>
    %42 = arith.mulf %40, %41 : vector<4x768xf32>
    %43 = vector.extract_strided_slice %24 {offsets = [4, 0], sizes = [8, 768], strides = [1, 1]} : vector<12x768xf32> to vector<8x768xf32>
    %c0_30 = arith.constant 0 : index
    %c18_31 = arith.constant 18 : index
    %44 = vector.load %arg13[%c0_30, %c18_31] : memref<8x804xf32, #tpu.memory_space<vmem>>, vector<4x768xf32>
    tpu.vector_store %arg13[%c0_30, %c18_31], %42 {strides = array<i32>} : memref<8x804xf32, #tpu.memory_space<vmem>>, vector<4x768xf32>,
    %c0_32 = arith.constant 0 : index
    %c0_33 = arith.constant 0 : index
    %45 = vector.load %arg13[%c0_32, %c0_33] : memref<8x804xf32, #tpu.memory_space<vmem>>, vector<4x768xf32>
    %c0_34 = arith.constant 0 : index
    %c36_35 = arith.constant 36 : index
    %46 = vector.load %arg13[%c0_34, %c36_35] : memref<8x804xf32, #tpu.memory_space<vmem>>, vector<4x768xf32>
    %cst_36 = arith.constant 2.500000e-01 : f32
    %47 = vector.broadcast %cst_36 : f32 to vector<1x768xf32>
    %48 = arith.mulf %47, %6 : vector<1x768xf32>
    %49 = arith.subf %45, %42 : vector<4x768xf32>
    %50 = vector.broadcast %48 : vector<1x768xf32> to vector<4x768xf32>
    %51 = arith.mulf %50, %49 : vector<4x768xf32>
    %52 = arith.addf %42, %51 : vector<4x768xf32>
    %cst_37 = arith.constant 2.500000e-01 : f32
    %53 = vector.broadcast %cst_37 : f32 to vector<1x768xf32>
    %54 = arith.mulf %53, %7 : vector<1x768xf32>
    %55 = arith.subf %46, %42 : vector<4x768xf32>
    %56 = vector.broadcast %54 : vector<1x768xf32> to vector<4x768xf32>
    %57 = arith.mulf %56, %55 : vector<4x768xf32>
    %58 = arith.addf %42, %57 : vector<4x768xf32>
    %c0_38 = arith.constant 0 : index
    %c18_39 = arith.constant 18 : index
    %59 = vector.load %arg13[%c0_38, %c18_39] : memref<8x804xf32, #tpu.memory_space<vmem>>, vector<4x768xf32>
    tpu.vector_store %arg13[%c0_38, %c18_39], %52 {strides = array<i32>} : memref<8x804xf32, #tpu.memory_space<vmem>>, vector<4x768xf32>,
    %c0_40 = arith.constant 0 : index
    %c17_41 = arith.constant 17 : index
    %60 = vector.load %arg13[%c0_40, %c17_41] : memref<8x804xf32, #tpu.memory_space<vmem>>, vector<4x768xf32>
    %c0_42 = arith.constant 0 : index
    %c19_43 = arith.constant 19 : index
    %61 = vector.load %arg13[%c0_42, %c19_43] : memref<8x804xf32, #tpu.memory_space<vmem>>, vector<4x768xf32>
    %cst_44 = arith.constant 2.500000e-01 : f32
    %62 = vector.broadcast %cst_44 : f32 to vector<1x768xf32>
    %63 = arith.mulf %62, %8 : vector<1x768xf32>
    %64 = arith.subf %60, %52 : vector<4x768xf32>
    %65 = vector.broadcast %63 : vector<1x768xf32> to vector<4x768xf32>
    %66 = arith.mulf %65, %64 : vector<4x768xf32>
    %67 = arith.addf %52, %66 : vector<4x768xf32>
    %cst_45 = arith.constant 2.500000e-01 : f32
    %68 = vector.broadcast %cst_45 : f32 to vector<1x768xf32>
    %69 = arith.mulf %68, %9 : vector<1x768xf32>
    %70 = arith.subf %61, %52 : vector<4x768xf32>
    %71 = vector.broadcast %69 : vector<1x768xf32> to vector<4x768xf32>
    %72 = arith.mulf %71, %70 : vector<4x768xf32>
    %73 = arith.addf %52, %72 : vector<4x768xf32>
    %c0_46 = arith.constant 0 : index
    %c18_47 = arith.constant 18 : index
    %74 = vector.load %arg13[%c0_46, %c18_47] : memref<8x804xf32, #tpu.memory_space<vmem>>, vector<4x768xf32>
    tpu.vector_store %arg13[%c0_46, %c18_47], %58 {strides = array<i32>} : memref<8x804xf32, #tpu.memory_space<vmem>>, vector<4x768xf32>,
    %c0_48 = arith.constant 0 : index
    %c17_49 = arith.constant 17 : index
    %75 = vector.load %arg13[%c0_48, %c17_49] : memref<8x804xf32, #tpu.memory_space<vmem>>, vector<4x768xf32>
    %c0_50 = arith.constant 0 : index
    %c19_51 = arith.constant 19 : index
    %76 = vector.load %arg13[%c0_50, %c19_51] : memref<8x804xf32, #tpu.memory_space<vmem>>, vector<4x768xf32>
    %cst_52 = arith.constant 2.500000e-01 : f32
    %77 = vector.broadcast %cst_52 : f32 to vector<1x768xf32>
    %78 = arith.mulf %77, %8 : vector<1x768xf32>
    %79 = arith.subf %75, %58 : vector<4x768xf32>
    %80 = vector.broadcast %78 : vector<1x768xf32> to vector<4x768xf32>
    %81 = arith.mulf %80, %79 : vector<4x768xf32>
    %82 = arith.addf %58, %81 : vector<4x768xf32>
    %cst_53 = arith.constant 2.500000e-01 : f32
    %83 = vector.broadcast %cst_53 : f32 to vector<1x768xf32>
    %84 = arith.mulf %83, %9 : vector<1x768xf32>
    %85 = arith.subf %76, %58 : vector<4x768xf32>
    %86 = vector.broadcast %84 : vector<1x768xf32> to vector<4x768xf32>
    %87 = arith.mulf %86, %85 : vector<4x768xf32>
    %88 = arith.addf %58, %87 : vector<4x768xf32>
    %89 = arith.truncf %67 : vector<4x768xf32> to vector<4x768xbf16>
    %90 = arith.truncf %82 : vector<4x768xf32> to vector<4x768xbf16>
    %c0_54 = arith.constant 0 : index
    %c36_55 = arith.constant 36 : index
    %91 = vector.load %arg14[%c0_54, %c36_55] : memref<32x804xbf16, #tpu.memory_space<vmem>>, vector<4x768xbf16>
    tpu.vector_store %arg14[%c0_54, %c36_55], %90 {strides = array<i32>} : memref<32x804xbf16, #tpu.memory_space<vmem>>, vector<4x768xbf16>,
    %c4_56 = arith.constant 4 : index
    %c18_57 = arith.constant 18 : index
    %92 = vector.load %arg14[%c4_56, %c18_57] : memref<32x804xbf16, #tpu.memory_space<vmem>>, vector<4x768xbf16>
    tpu.vector_store %arg14[%c4_56, %c18_57], %89 {strides = array<i32>} : memref<32x804xbf16, #tpu.memory_space<vmem>>, vector<4x768xbf16>,
    %c8_58 = arith.constant 8 : index
    %c18_59 = arith.constant 18 : index
    %93 = vector.load %arg14[%c8_58, %c18_59] : memref<32x804xbf16, #tpu.memory_space<vmem>>, vector<4x768xbf16>
    tpu.vector_store %arg14[%c8_58, %c18_59], %90 {strides = array<i32>} : memref<32x804xbf16, #tpu.memory_space<vmem>>, vector<4x768xbf16>,
    %c12 = arith.constant 12 : index
    %c0_60 = arith.constant 0 : index
    %94 = vector.load %arg14[%c12, %c0_60] : memref<32x804xbf16, #tpu.memory_space<vmem>>, vector<4x768xbf16>
    tpu.vector_store %arg14[%c12, %c0_60], %89 {strides = array<i32>} : memref<32x804xbf16, #tpu.memory_space<vmem>>, vector<4x768xbf16>,
    %95 = arith.truncf %73 : vector<4x768xf32> to vector<4x768xbf16>
    %96 = arith.truncf %88 : vector<4x768xf32> to vector<4x768xbf16>
    %c16 = arith.constant 16 : index
    %c36_61 = arith.constant 36 : index
    %97 = vector.load %arg14[%c16, %c36_61] : memref<32x804xbf16, #tpu.memory_space<vmem>>, vector<4x768xbf16>
    tpu.vector_store %arg14[%c16, %c36_61], %96 {strides = array<i32>} : memref<32x804xbf16, #tpu.memory_space<vmem>>, vector<4x768xbf16>,
    %c20 = arith.constant 20 : index
    %c18_62 = arith.constant 18 : index
    %98 = vector.load %arg14[%c20, %c18_62] : memref<32x804xbf16, #tpu.memory_space<vmem>>, vector<4x768xbf16>
    tpu.vector_store %arg14[%c20, %c18_62], %95 {strides = array<i32>} : memref<32x804xbf16, #tpu.memory_space<vmem>>, vector<4x768xbf16>,
    %c24 = arith.constant 24 : index
    %c18_63 = arith.constant 18 : index
    %99 = vector.load %arg14[%c24, %c18_63] : memref<32x804xbf16, #tpu.memory_space<vmem>>, vector<4x768xbf16>
    tpu.vector_store %arg14[%c24, %c18_63], %96 {strides = array<i32>} : memref<32x804xbf16, #tpu.memory_space<vmem>>, vector<4x768xbf16>,
    %c28 = arith.constant 28 : index
    %c0_64 = arith.constant 0 : index
    %100 = vector.load %arg14[%c28, %c0_64] : memref<32x804xbf16, #tpu.memory_space<vmem>>, vector<4x768xbf16>
    tpu.vector_store %arg14[%c28, %c0_64], %95 {strides = array<i32>} : memref<32x804xbf16, #tpu.memory_space<vmem>>, vector<4x768xbf16>,
    %c0_65 = arith.constant 0 : index
    %c18_66 = arith.constant 18 : index
    %101 = vector.load %arg13[%c0_65, %c18_66] : memref<8x804xf32, #tpu.memory_space<vmem>>, vector<8x768xf32>
    tpu.vector_store %arg13[%c0_65, %c18_66], %43 {strides = array<i32>} : memref<8x804xf32, #tpu.memory_space<vmem>>, vector<8x768xf32>,
    %c0_67 = arith.constant 0 : index
    %c0_68 = arith.constant 0 : index
    %102 = vector.load %arg13[%c0_67, %c0_68] : memref<8x804xf32, #tpu.memory_space<vmem>>, vector<8x768xf32>
    %c0_69 = arith.constant 0 : index
    %c36_70 = arith.constant 36 : index
    %103 = vector.load %arg13[%c0_69, %c36_70] : memref<8x804xf32, #tpu.memory_space<vmem>>, vector<8x768xf32>
    %cst_71 = arith.constant 2.500000e-01 : f32
    %104 = vector.broadcast %cst_71 : f32 to vector<1x768xf32>
    %105 = arith.mulf %104, %6 : vector<1x768xf32>
    %106 = arith.subf %102, %43 : vector<8x768xf32>
    %107 = vector.broadcast %105 : vector<1x768xf32> to vector<8x768xf32>
    %108 = arith.mulf %107, %106 : vector<8x768xf32>
    %109 = arith.addf %43, %108 : vector<8x768xf32>
    %cst_72 = arith.constant 2.500000e-01 : f32
    %110 = vector.broadcast %cst_72 : f32 to vector<1x768xf32>
    %111 = arith.mulf %110, %7 : vector<1x768xf32>
    %112 = arith.subf %103, %43 : vector<8x768xf32>
    %113 = vector.broadcast %111 : vector<1x768xf32> to vector<8x768xf32>
    %114 = arith.mulf %113, %112 : vector<8x768xf32>
    %115 = arith.addf %43, %114 : vector<8x768xf32>
    %c0_73 = arith.constant 0 : index
    %c18_74 = arith.constant 18 : index
    %116 = vector.load %arg14[%c0_73, %c18_74] : memref<32x804xbf16, #tpu.memory_space<vmem>>, vector<12x768xbf16>
    %c0_75 = arith.constant 0 : index
    %c19_76 = arith.constant 19 : index
    %117 = vector.load %arg14[%c0_75, %c19_76] : memref<32x804xbf16, #tpu.memory_space<vmem>>, vector<12x768xbf16>
    %c16_77 = arith.constant 16 : index
    %c18_78 = arith.constant 18 : index
    %118 = vector.load %arg14[%c16_77, %c18_78] : memref<32x804xbf16, #tpu.memory_space<vmem>>, vector<12x768xbf16>
    %c16_79 = arith.constant 16 : index
    %c17_80 = arith.constant 17 : index
    %119 = vector.load %arg14[%c16_79, %c17_80] : memref<32x804xbf16, #tpu.memory_space<vmem>>, vector<12x768xbf16>
    %c0_81 = arith.constant 0 : index
    %c0_82 = arith.constant 0 : index
    %c0_83 = arith.constant 0 : index
    %120 = vector.load %arg6[%c0_81, %c0_82, %c0_83] : memref<2x16x12xbf16, #tpu.memory_space<vmem>>, vector<1x16x12xbf16>
    %121 = vector.shape_cast %120 : vector<1x16x12xbf16> to vector<16x12xbf16>
    %cst_84 = arith.constant dense<0.000000e+00> : vector<16x768xf32>
    %122 = tpu.matmul %121, %116, %cst_84 {dimension_numbers = #tpu.dot_dimension_numbers<[1], [0], [0], [1], [0, 0, 1, 1], [], []>} : vector<16x12xbf16>, vector<12x768xbf16>, vector<16x768xf32> -> vector<16x768xf32>
    %c1_85 = arith.constant 1 : index
    %c0_86 = arith.constant 0 : index
    %c0_87 = arith.constant 0 : index
    %123 = vector.load %arg6[%c1_85, %c0_86, %c0_87] : memref<2x16x12xbf16, #tpu.memory_space<vmem>>, vector<1x16x12xbf16>
    %124 = vector.shape_cast %123 : vector<1x16x12xbf16> to vector<16x12xbf16>
    %cst_88 = arith.constant dense<0.000000e+00> : vector<16x768xf32>
    %125 = tpu.matmul %124, %118, %cst_88 {dimension_numbers = #tpu.dot_dimension_numbers<[1], [0], [0], [1], [0, 0, 1, 1], [], []>} : vector<16x12xbf16>, vector<12x768xbf16>, vector<16x768xf32> -> vector<16x768xf32>
    %c0_89 = arith.constant 0 : index
    %c0_90 = arith.constant 0 : index
    %c0_91 = arith.constant 0 : index
    %126 = vector.load %arg7[%c0_89, %c0_90, %c0_91] : memref<2x8x12xbf16, #tpu.memory_space<vmem>>, vector<1x8x12xbf16>
    %127 = vector.shape_cast %126 : vector<1x8x12xbf16> to vector<8x12xbf16>
    %cst_92 = arith.constant dense<0.000000e+00> : vector<8x768xf32>
    %128 = tpu.matmul %127, %119, %cst_92 {dimension_numbers = #tpu.dot_dimension_numbers<[1], [0], [0], [1], [0, 0, 1, 1], [], []>} : vector<8x12xbf16>, vector<12x768xbf16>, vector<8x768xf32> -> vector<8x768xf32>
    %c1_93 = arith.constant 1 : index
    %c0_94 = arith.constant 0 : index
    %c0_95 = arith.constant 0 : index
    %129 = vector.load %arg7[%c1_93, %c0_94, %c0_95] : memref<2x8x12xbf16, #tpu.memory_space<vmem>>, vector<1x8x12xbf16>
    %130 = vector.shape_cast %129 : vector<1x8x12xbf16> to vector<8x12xbf16>
    %cst_96 = arith.constant dense<0.000000e+00> : vector<8x768xf32>
    %131 = tpu.matmul %130, %117, %cst_96 {dimension_numbers = #tpu.dot_dimension_numbers<[1], [0], [0], [1], [0, 0, 1, 1], [], []>} : vector<8x12xbf16>, vector<12x768xbf16>, vector<8x768xf32> -> vector<8x768xf32>
    %c0_97 = arith.constant 0 : index
    %c18_98 = arith.constant 18 : index
    %132 = vector.load %arg13[%c0_97, %c18_98] : memref<8x804xf32, #tpu.memory_space<vmem>>, vector<8x768xf32>
    tpu.vector_store %arg13[%c0_97, %c18_98], %109 {strides = array<i32>} : memref<8x804xf32, #tpu.memory_space<vmem>>, vector<8x768xf32>,
    %c0_99 = arith.constant 0 : index
    %c17_100 = arith.constant 17 : index
    %133 = vector.load %arg13[%c0_99, %c17_100] : memref<8x804xf32, #tpu.memory_space<vmem>>, vector<8x768xf32>
    %c0_101 = arith.constant 0 : index
    %c19_102 = arith.constant 19 : index
    %134 = vector.load %arg13[%c0_101, %c19_102] : memref<8x804xf32, #tpu.memory_space<vmem>>, vector<8x768xf32>
    %cst_103 = arith.constant 2.500000e-01 : f32
    %135 = vector.broadcast %cst_103 : f32 to vector<1x768xf32>
    %136 = arith.mulf %135, %8 : vector<1x768xf32>
    %137 = arith.subf %133, %109 : vector<8x768xf32>
    %138 = vector.broadcast %136 : vector<1x768xf32> to vector<8x768xf32>
    %139 = arith.mulf %138, %137 : vector<8x768xf32>
    %140 = arith.addf %109, %139 : vector<8x768xf32>
    %cst_104 = arith.constant 2.500000e-01 : f32
    %141 = vector.broadcast %cst_104 : f32 to vector<1x768xf32>
    %142 = arith.mulf %141, %9 : vector<1x768xf32>
    %143 = arith.subf %134, %109 : vector<8x768xf32>
    %144 = vector.broadcast %142 : vector<1x768xf32> to vector<8x768xf32>
    %145 = arith.mulf %144, %143 : vector<8x768xf32>
    %146 = arith.addf %109, %145 : vector<8x768xf32>
    %147 = vector.extract_strided_slice %122 {offsets = [0, 0], sizes = [8, 768], strides = [1, 1]} : vector<16x768xf32> to vector<8x768xf32>
    %148 = arith.addf %128, %147 : vector<8x768xf32>
    %149 = vector.extract_strided_slice %125 {offsets = [0, 0], sizes = [8, 768], strides = [1, 1]} : vector<16x768xf32> to vector<8x768xf32>
    %150 = arith.addf %148, %149 : vector<8x768xf32>
    %151 = vector.extract_strided_slice %122 {offsets = [8, 0], sizes = [8, 768], strides = [1, 1]} : vector<16x768xf32> to vector<8x768xf32>
    %152 = arith.addf %131, %151 : vector<8x768xf32>
    %153 = vector.extract_strided_slice %125 {offsets = [8, 0], sizes = [8, 768], strides = [1, 1]} : vector<16x768xf32> to vector<8x768xf32>
    %154 = arith.addf %152, %153 : vector<8x768xf32>
    %155 = vector.broadcast %13 : vector<8x1xf32> to vector<8x768xf32>
    %156 = arith.mulf %150, %155 : vector<8x768xf32>
    %157 = vector.broadcast %14 : vector<8x1xf32> to vector<8x768xf32>
    %158 = arith.addf %156, %157 : vector<8x768xf32>
    %159 = arith.addf %158, %140 : vector<8x768xf32>
    %cst_105 = arith.constant 0.000000e+00 : f32
    %160 = vector.broadcast %cst_105 : f32 to vector<8x768xf32>
    %161 = arith.cmpf oge, %159, %160 : vector<8x768xf32>
    %cst_106 = arith.constant 0.00999999977 : f32
    %162 = vector.broadcast %cst_106 : f32 to vector<8x768xf32>
    %163 = arith.mulf %162, %159 : vector<8x768xf32>
    %164 = arith.select %161, %159, %163 : vector<8x768xi1>, vector<8x768xf32>
    %c0_107 = arith.constant 0 : index
    %c0_108 = arith.constant 0 : index
    %c0_109 = arith.constant 0 : index
    %c0_110 = arith.constant 0 : index
    %165 = vector.load %arg11[%c0_107, %c0_108, %c0_109, %c0_110] : memref<1x4x8x768xf32, #tpu.memory_space<vmem>>, vector<1x1x8x768xf32>
    %166 = vector.shape_cast %165 : vector<1x1x8x768xf32> to vector<8x768xf32>
    %167 = vector.shape_cast %164 : vector<8x768xf32> to vector<1x1x8x768xf32>
    tpu.vector_store %arg11[%c0_107, %c0_108, %c0_109, %c0_110], %167 {strides = array<i32>} : memref<1x4x8x768xf32, #tpu.memory_space<vmem>>, vector<1x1x8x768xf32>,
    %168 = vector.broadcast %13 : vector<8x1xf32> to vector<8x768xf32>
    %169 = arith.mulf %154, %168 : vector<8x768xf32>
    %170 = vector.broadcast %14 : vector<8x1xf32> to vector<8x768xf32>
    %171 = arith.addf %169, %170 : vector<8x768xf32>
    %172 = arith.addf %171, %146 : vector<8x768xf32>
    %cst_111 = arith.constant 0.000000e+00 : f32
    %173 = vector.broadcast %cst_111 : f32 to vector<8x768xf32>
    %174 = arith.cmpf oge, %172, %173 : vector<8x768xf32>
    %cst_112 = arith.constant 0.00999999977 : f32
    %175 = vector.broadcast %cst_112 : f32 to vector<8x768xf32>
    %176 = arith.mulf %175, %172 : vector<8x768xf32>
    %177 = arith.select %174, %172, %176 : vector<8x768xi1>, vector<8x768xf32>
    %c0_113 = arith.constant 0 : index
    %c1_114 = arith.constant 1 : index
    %c0_115 = arith.constant 0 : index
    %c0_116 = arith.constant 0 : index
    %178 = vector.load %arg11[%c0_113, %c1_114, %c0_115, %c0_116] : memref<1x4x8x768xf32, #tpu.memory_space<vmem>>, vector<1x1x8x768xf32>
    %179 = vector.shape_cast %178 : vector<1x1x8x768xf32> to vector<8x768xf32>
    %180 = vector.shape_cast %177 : vector<8x768xf32> to vector<1x1x8x768xf32>
    tpu.vector_store %arg11[%c0_113, %c1_114, %c0_115, %c0_116], %180 {strides = array<i32>} : memref<1x4x8x768xf32, #tpu.memory_space<vmem>>, vector<1x1x8x768xf32>,
    %c4_117 = arith.constant 4 : index
    %c18_118 = arith.constant 18 : index
    %181 = vector.load %arg14[%c4_117, %c18_118] : memref<32x804xbf16, #tpu.memory_space<vmem>>, vector<12x768xbf16>
    %c4_119 = arith.constant 4 : index
    %c19_120 = arith.constant 19 : index
    %182 = vector.load %arg14[%c4_119, %c19_120] : memref<32x804xbf16, #tpu.memory_space<vmem>>, vector<12x768xbf16>
    %c20_121 = arith.constant 20 : index
    %c18_122 = arith.constant 18 : index
    %183 = vector.load %arg14[%c20_121, %c18_122] : memref<32x804xbf16, #tpu.memory_space<vmem>>, vector<12x768xbf16>
    %c20_123 = arith.constant 20 : index
    %c17_124 = arith.constant 17 : index
    %184 = vector.load %arg14[%c20_123, %c17_124] : memref<32x804xbf16, #tpu.memory_space<vmem>>, vector<12x768xbf16>
    %c0_125 = arith.constant 0 : index
    %c0_126 = arith.constant 0 : index
    %c0_127 = arith.constant 0 : index
    %185 = vector.load %arg6[%c0_125, %c0_126, %c0_127] : memref<2x16x12xbf16, #tpu.memory_space<vmem>>, vector<1x16x12xbf16>
    %186 = vector.shape_cast %185 : vector<1x16x12xbf16> to vector<16x12xbf16>
    %cst_128 = arith.constant dense<0.000000e+00> : vector<16x768xf32>
    %187 = tpu.matmul %186, %181, %cst_128 {dimension_numbers = #tpu.dot_dimension_numbers<[1], [0], [0], [1], [0, 0, 1, 1], [], []>} : vector<16x12xbf16>, vector<12x768xbf16>, vector<16x768xf32> -> vector<16x768xf32>
    %c1_129 = arith.constant 1 : index
    %c0_130 = arith.constant 0 : index
    %c0_131 = arith.constant 0 : index
    %188 = vector.load %arg6[%c1_129, %c0_130, %c0_131] : memref<2x16x12xbf16, #tpu.memory_space<vmem>>, vector<1x16x12xbf16>
    %189 = vector.shape_cast %188 : vector<1x16x12xbf16> to vector<16x12xbf16>
    %cst_132 = arith.constant dense<0.000000e+00> : vector<16x768xf32>
    %190 = tpu.matmul %189, %183, %cst_132 {dimension_numbers = #tpu.dot_dimension_numbers<[1], [0], [0], [1], [0, 0, 1, 1], [], []>} : vector<16x12xbf16>, vector<12x768xbf16>, vector<16x768xf32> -> vector<16x768xf32>
    %c0_133 = arith.constant 0 : index
    %c0_134 = arith.constant 0 : index
    %c0_135 = arith.constant 0 : index
    %191 = vector.load %arg7[%c0_133, %c0_134, %c0_135] : memref<2x8x12xbf16, #tpu.memory_space<vmem>>, vector<1x8x12xbf16>
    %192 = vector.shape_cast %191 : vector<1x8x12xbf16> to vector<8x12xbf16>
    %cst_136 = arith.constant dense<0.000000e+00> : vector<8x768xf32>
    %193 = tpu.matmul %192, %184, %cst_136 {dimension_numbers = #tpu.dot_dimension_numbers<[1], [0], [0], [1], [0, 0, 1, 1], [], []>} : vector<8x12xbf16>, vector<12x768xbf16>, vector<8x768xf32> -> vector<8x768xf32>
    %c1_137 = arith.constant 1 : index
    %c0_138 = arith.constant 0 : index
    %c0_139 = arith.constant 0 : index
    %194 = vector.load %arg7[%c1_137, %c0_138, %c0_139] : memref<2x8x12xbf16, #tpu.memory_space<vmem>>, vector<1x8x12xbf16>
    %195 = vector.shape_cast %194 : vector<1x8x12xbf16> to vector<8x12xbf16>
    %cst_140 = arith.constant dense<0.000000e+00> : vector<8x768xf32>
    %196 = tpu.matmul %195, %182, %cst_140 {dimension_numbers = #tpu.dot_dimension_numbers<[1], [0], [0], [1], [0, 0, 1, 1], [], []>} : vector<8x12xbf16>, vector<12x768xbf16>, vector<8x768xf32> -> vector<8x768xf32>
    %c0_141 = arith.constant 0 : index
    %c18_142 = arith.constant 18 : index
    %197 = vector.load %arg13[%c0_141, %c18_142] : memref<8x804xf32, #tpu.memory_space<vmem>>, vector<8x768xf32>
    tpu.vector_store %arg13[%c0_141, %c18_142], %115 {strides = array<i32>} : memref<8x804xf32, #tpu.memory_space<vmem>>, vector<8x768xf32>,
    %c0_143 = arith.constant 0 : index
    %c17_144 = arith.constant 17 : index
    %198 = vector.load %arg13[%c0_143, %c17_144] : memref<8x804xf32, #tpu.memory_space<vmem>>, vector<8x768xf32>
    %c0_145 = arith.constant 0 : index
    %c19_146 = arith.constant 19 : index
    %199 = vector.load %arg13[%c0_145, %c19_146] : memref<8x804xf32, #tpu.memory_space<vmem>>, vector<8x768xf32>
    %cst_147 = arith.constant 2.500000e-01 : f32
    %200 = vector.broadcast %cst_147 : f32 to vector<1x768xf32>
    %201 = arith.mulf %200, %8 : vector<1x768xf32>
    %202 = arith.subf %198, %115 : vector<8x768xf32>
    %203 = vector.broadcast %201 : vector<1x768xf32> to vector<8x768xf32>
    %204 = arith.mulf %203, %202 : vector<8x768xf32>
    %205 = arith.addf %115, %204 : vector<8x768xf32>
    %cst_148 = arith.constant 2.500000e-01 : f32
    %206 = vector.broadcast %cst_148 : f32 to vector<1x768xf32>
    %207 = arith.mulf %206, %9 : vector<1x768xf32>
    %208 = arith.subf %199, %115 : vector<8x768xf32>
    %209 = vector.broadcast %207 : vector<1x768xf32> to vector<8x768xf32>
    %210 = arith.mulf %209, %208 : vector<8x768xf32>
    %211 = arith.addf %115, %210 : vector<8x768xf32>
    %212 = vector.extract_strided_slice %187 {offsets = [0, 0], sizes = [8, 768], strides = [1, 1]} : vector<16x768xf32> to vector<8x768xf32>
    %213 = arith.addf %193, %212 : vector<8x768xf32>
    %214 = vector.extract_strided_slice %190 {offsets = [0, 0], sizes = [8, 768], strides = [1, 1]} : vector<16x768xf32> to vector<8x768xf32>
    %215 = arith.addf %213, %214 : vector<8x768xf32>
    %216 = vector.extract_strided_slice %187 {offsets = [8, 0], sizes = [8, 768], strides = [1, 1]} : vector<16x768xf32> to vector<8x768xf32>
    %217 = arith.addf %196, %216 : vector<8x768xf32>
    %218 = vector.extract_strided_slice %190 {offsets = [8, 0], sizes = [8, 768], strides = [1, 1]} : vector<16x768xf32> to vector<8x768xf32>
    %219 = arith.addf %217, %218 : vector<8x768xf32>
    %220 = vector.broadcast %13 : vector<8x1xf32> to vector<8x768xf32>
    %221 = arith.mulf %215, %220 : vector<8x768xf32>
    %222 = vector.broadcast %14 : vector<8x1xf32> to vector<8x768xf32>
    %223 = arith.addf %221, %222 : vector<8x768xf32>
    %224 = arith.addf %223, %205 : vector<8x768xf32>
    %cst_149 = arith.constant 0.000000e+00 : f32
    %225 = vector.broadcast %cst_149 : f32 to vector<8x768xf32>
    %226 = arith.cmpf oge, %224, %225 : vector<8x768xf32>
    %cst_150 = arith.constant 0.00999999977 : f32
    %227 = vector.broadcast %cst_150 : f32 to vector<8x768xf32>
    %228 = arith.mulf %227, %224 : vector<8x768xf32>
    %229 = arith.select %226, %224, %228 : vector<8x768xi1>, vector<8x768xf32>
    %c0_151 = arith.constant 0 : index
    %c2 = arith.constant 2 : index
    %c0_152 = arith.constant 0 : index
    %c0_153 = arith.constant 0 : index
    %230 = vector.load %arg11[%c0_151, %c2, %c0_152, %c0_153] : memref<1x4x8x768xf32, #tpu.memory_space<vmem>>, vector<1x1x8x768xf32>
    %231 = vector.shape_cast %230 : vector<1x1x8x768xf32> to vector<8x768xf32>
    %232 = vector.shape_cast %229 : vector<8x768xf32> to vector<1x1x8x768xf32>
    tpu.vector_store %arg11[%c0_151, %c2, %c0_152, %c0_153], %232 {strides = array<i32>} : memref<1x4x8x768xf32, #tpu.memory_space<vmem>>, vector<1x1x8x768xf32>,
    %233 = vector.broadcast %13 : vector<8x1xf32> to vector<8x768xf32>
    %234 = arith.mulf %219, %233 : vector<8x768xf32>
    %235 = vector.broadcast %14 : vector<8x1xf32> to vector<8x768xf32>
    %236 = arith.addf %234, %235 : vector<8x768xf32>
    %237 = arith.addf %236, %211 : vector<8x768xf32>
    %cst_154 = arith.constant 0.000000e+00 : f32
    %238 = vector.broadcast %cst_154 : f32 to vector<8x768xf32>
    %239 = arith.cmpf oge, %237, %238 : vector<8x768xf32>
    %cst_155 = arith.constant 0.00999999977 : f32
    %240 = vector.broadcast %cst_155 : f32 to vector<8x768xf32>
    %241 = arith.mulf %240, %237 : vector<8x768xf32>
    %242 = arith.select %239, %237, %241 : vector<8x768xi1>, vector<8x768xf32>
    %c0_156 = arith.constant 0 : index
    %c3 = arith.constant 3 : index
    %c0_157 = arith.constant 0 : index
    %c0_158 = arith.constant 0 : index
    %243 = vector.load %arg11[%c0_156, %c3, %c0_157, %c0_158] : memref<1x4x8x768xf32, #tpu.memory_space<vmem>>, vector<1x1x8x768xf32>
    %244 = vector.shape_cast %243 : vector<1x1x8x768xf32> to vector<8x768xf32>
    %245 = vector.shape_cast %242 : vector<8x768xf32> to vector<1x1x8x768xf32>
    tpu.vector_store %arg11[%c0_156, %c3, %c0_157, %c0_158], %245 {strides = array<i32>} : memref<1x4x8x768xf32, #tpu.memory_space<vmem>>, vector<1x1x8x768xf32>,
    return
  }
  func.func @transform_0(%arg0: i32) -> (i32, i32, i32) {
    %c0_i32 = arith.constant 0 : i32
    %c0_i32_0 = arith.constant 0 : i32
    %c0_i32_1 = arith.constant 0 : i32
    return %arg0, %c0_i32, %c0_i32_0 : i32, i32, i32
  }
  func.func @transform_1(%arg0: i32) -> (i32, i32, i32) {
    %c0_i32 = arith.constant 0 : i32
    %c0_i32_0 = arith.constant 0 : i32
    %c0_i32_1 = arith.constant 0 : i32
    %c0_i32_2 = arith.constant 0 : i32
    return %c0_i32, %c0_i32_0, %c0_i32_1 : i32, i32, i32
  }
  func.func @transform_2(%arg0: i32) -> (i32, i32) {
    %c0_i32 = arith.constant 0 : i32
    %c0_i32_0 = arith.constant 0 : i32
    %c0_i32_1 = arith.constant 0 : i32
    return %c0_i32, %c0_i32_0 : i32, i32
  }
  func.func @transform_3(%arg0: i32) -> (i32, i32) {
    %c0_i32 = arith.constant 0 : i32
    %c0_i32_0 = arith.constant 0 : i32
    %c0_i32_1 = arith.constant 0 : i32
    return %c0_i32, %c0_i32_0 : i32, i32
  }
  func.func @transform_4(%arg0: i32) -> (i32, i32) {
    %c0_i32 = arith.constant 0 : i32
    %c0_i32_0 = arith.constant 0 : i32
    %c0_i32_1 = arith.constant 0 : i32
    return %c0_i32, %c0_i32_0 : i32, i32
  }
  func.func @transform_5(%arg0: i32) -> (i32, i32, i32) {
    %c0_i32 = arith.constant 0 : i32
    %c0_i32_0 = arith.constant 0 : i32
    %c0_i32_1 = arith.constant 0 : i32
    %c0_i32_2 = arith.constant 0 : i32
    return %c0_i32, %c0_i32_0, %c0_i32_1 : i32, i32, i32
  }
  func.func @transform_6(%arg0: i32) -> (i32, i32, i32) {
    %c0_i32 = arith.constant 0 : i32
    %c0_i32_0 = arith.constant 0 : i32
    %c0_i32_1 = arith.constant 0 : i32
    %c0_i32_2 = arith.constant 0 : i32
    return %c0_i32, %c0_i32_0, %c0_i32_1 : i32, i32, i32
  }
  func.func @transform_7(%arg0: i32) -> (i32, i32) {
    %c0_i32 = arith.constant 0 : i32
    %c0_i32_0 = arith.constant 0 : i32
    %c0_i32_1 = arith.constant 0 : i32
    return %c0_i32, %c0_i32_0 : i32, i32
  }
  func.func @transform_8(%arg0: i32) -> (i32, i32) {
    %c0_i32 = arith.constant 0 : i32
    %c0_i32_0 = arith.constant 0 : i32
    %c0_i32_1 = arith.constant 0 : i32
    return %c0_i32, %c0_i32_0 : i32, i32
  }
  func.func @transform_9(%arg0: i32) -> (i32, i32) {
    %c0_i32 = arith.constant 0 : i32
    %c0_i32_0 = arith.constant 0 : i32
    %c0_i32_1 = arith.constant 0 : i32
    return %c0_i32, %c0_i32_0 : i32, i32
  }
  func.func @transform_10(%arg0: i32) -> (i32, i32, i32, i32) {
    %c0_i32 = arith.constant 0 : i32
    %c0_i32_0 = arith.constant 0 : i32
    %c0_i32_1 = arith.constant 0 : i32
    %c0_i32_2 = arith.constant 0 : i32
    return %arg0, %c0_i32, %c0_i32_0, %c0_i32_1 : i32, i32, i32, i32
  }
}

</mosaic_0001>

<bundles_post_ra>
// kernel: tpu_custom_call.1
= control target key start
LH: loop header
LB: loop body
LE: loop exit
PB: predicated region body
PF: predicated region fallthrough
CT: control target
= control target key end

     0   :  { %15 = vsyncpa [#allocation6], 0  ;;  %s6151_s0 = inlined_call_operand.vmem [shape: bf16[1,4,768], index: 0, kind: input, shape index: {}]   ;;  %s6152_s1 = inlined_call_operand.vmem [shape: bf16[2,4,12], index: 1, kind: input, shape index: {}]   ;;  %s6153_s2 = inlined_call_operand.vmem [shape: bf16[12,12], index: 2, kind: input, shape index: {}]   ;;  %s6154_s3 = inlined_call_operand.vmem [shape: f32[4,1], index: 3, kind: input, shape index: {}]   ;;  %s6155_s4 = inlined_call_operand.vmem [shape: f32[4,1], index: 4, kind: input, shape index: {}]   ;;  %s6156_s5 = inlined_call_operand.vmem [shape: bf16[2,16,12], index: 5, kind: input, shape index: {}]   ;;  %s6157_s6 = inlined_call_operand.vmem [shape: bf16[2,8,12], index: 6, kind: input, shape index: {}]   ;;  %s6158_s7 = inlined_call_operand.vmem [shape: f32[8,1], index: 7, kind: input, shape index: {}]   ;;  %s6159_s8 = inlined_call_operand.vmem [shape: f32[8,1], index: 8, kind: input, shape index: {}]   ;;  %s6160_s9 = inlined_call_operand.hbm [shape: f32[5,768], index: 9, kind: input, shape index: {}]   ;;  %s6161_s10 = inlined_call_operand.hbm [shape: f32[1,4,8,768], index: 10, kind: output, shape index: {}]  }
   0x1   :  { %16 = vsyncpa [#allocation7], 0  ;;  %s40_s15 = sshll.u32 %s6160_s9, 4  ;;  %s4043_s16 = smov [#allocation5]   ;;  %s41_s15 = int_to_ptr.hbm [resolvable:$true] %s40_s15 }
   0x2   :  { %s42_s17 = sshll.u32 %s4043_s16, 4  ;;  %s43_s17 = int_to_ptr.vmem [resolvable:$true] %s42_s17 }
   0x3   :  { %45 = dma.hbm_to_vmem [thread:$0]  %s41_s15, 768, %s43_s17, [#allocation6]  }
   0x4   :  { %4039 = dma.done.wait [#allocation6], 768  }
   0x5   :  { %4040 = vsyncadd [#allocation6], 4294966528  ;;  %v4044_v0 = vmov 0   ;;  %v89_v1 = vld [vmem:[%s6151_s0] sm:$0xff]  ;;  %v90_v2 = vld [vmem:[%s6151_s0 + $0x8] sm:$0xf] }
   0x6   :  { %55 = vst [vmem:[#allocation2] sm:$0xff] %v4044_v0  ;;  %3989 = vset.pattern.permute.xlu0 %v4044_v0  ;;  %3990 = vset.pattern.permute.xlu1 %v4044_v0  ;;  %s4045_s21 = smov 36   ;;  %s4046_s0 = smov 18   ;;  %vm58_vm0 = vcmask 289792   ;;  %vm63_vm1 = vcmask 287744   ;;  %vm175_vm2 = vcmask 142338  }
   0x7   :  { %56 = vst [vmem:[#allocation2 + $0x8] sm:$0xff] %v4044_v0  ;;  %vm132_vm3 = vcmask 1041696   ;;  %vm133_vm4 = vcmask 1045508   ;;  %vm71_vm5 = vcmask 293888   ;;  %vm169_vm7 = vcmask 1043602   ;;  %s4047_s22 = smov 110  }
   0x8   :  { %57 = vst [vmem:[#allocation2 + $0x10] sm:$0xff] %v4044_v0  ;;  %vm4131_vm6 = vmor %vm133_vm4, %vm132_vm3  ;;  %vm170_vm8 = vcmask 1047558   ;;  %vm123_vm9 = vcmask 1043456   ;;  %vm6238_vm10 = vcmask 146432   ;;  %s4048_s23 = smov 109   ;;  %s4049_s24 = smov 111  }
   0x9   :  { %60 = vst [vmem:[#allocation2 + $0x1c] sm:$0x33] %v4044_v0  ;;  %vm4138_vm11 = vmor %vm170_vm8, %vm169_vm7  ;;  %vm6170_vm12 = vcmask 900096   ;;  %vm6165_vm13 = vcmask 1045504   ;;  %v3704_v59 = vld [vmem:[%s6153_s2] sm:$0xf] }
   0xa   :  { %61 = vst [vmem:[#allocation2 + $0x24] sm:$0x33] %v4044_v0  ;;  %v3942_v60 = vld [vmem:[%s6153_s2] sm:$0x30]  ;;  %vm6162_vm14 = vcmask 97280   ;;  %vm378_vm15 = vcmask 891904  }
   0xb   :  { %62 = vst [vmem:[#allocation2 + $0x2c] sm:$0x33] %v4044_v0  ;;  %s4052_s14 = smov 92   ;;  %s4053_s15 = smov 17  }
   0xc   :  { %73 = vst [vmem:[#allocation4] sm:$0xff] %v4044_v0  ;;  %s3689_s13 = sshll.u32 %s6161_s10, 4  ;;  %s4055_s10 = smov 768   ;;  %s3690_s13 = int_to_ptr.hbm [resolvable:$true] %s3689_s13 }
   0xd   :  { %102 = vst [vmem:[#allocation1] ss:$2 sm:$0xff] %v89_v1 }
   0xe   :  { %105 = vst [vmem:[#allocation1 + $0x10] ss:$2 sm:$0xff] %v90_v2 }
   0xf   :  { %74 = vst [vmem:[#allocation4 + $0x8] sm:$0xff] %v4044_v0 }
  0x10   :  { %75 = vst [vmem:[#allocation4 + $0x10] sm:$0xff] %v4044_v0 }
  0x11   :  { %77 = vst [vmem:[#allocation4 + $0x1c] sm:$0xff] %v4044_v0 }
  0x12   :  { %78 = vst [vmem:[#allocation4 + $0x24] sm:$0xff] %v4044_v0 }
  0x13   :  { %79 = vst [vmem:[#allocation4 + $0x2c] sm:$0xff] %v4044_v0 }
  0x14   :  { %v106_v3 = vld.sshfl [vmem:[#allocation1] sm:$0xff pattern:$0x75643120]  ;;  %v108_v4 = vld.sshfl [vmem:[#allocation1 + $0x8] sm:$0xff pattern:$0x75643120] }
  0x15   :  { %112 = vrot.lane.b32.xlu0 %v106_v3, %s4045_s21  ;;  %141 = vst [vmem:[#allocation1 + $0x1] ss:$2 sm:$0xff] %v89_v1  ;;  %v110_v5 = vld.sshfl [vmem:[#allocation1 + $0x10] sm:$0xff pattern:$0x75643120]  ;;  %v3705_v3 = vor.u32 %v3942_v60, %v3704_v59 }
  0x16   :  { %116 = vrot.lane.b32.xlu2 %v110_v5, %s4045_s21  ;;  %143 = vst [vmem:[#allocation1 + $0x11] ss:$2 sm:$0xff] %v90_v2 }
  0x17   :  { %81 = vst [vmem:[#allocation4 + $0x38] sm:$0xff] %v4044_v0 }
  0x18   :  { %82 = vst [vmem:[#allocation4 + $0x40] sm:$0xff] %v4044_v0 }
  0x19   :  { %83 = vst [vmem:[#allocation4 + $0x48] sm:$0xff] %v4044_v0 }
  0x1a   :  { %85 = vst [vmem:[#allocation4 + $0x54] sm:$0xff] %v4044_v0 }
  0x1b   :  { %86 = vst [vmem:[#allocation4 + $0x5c] sm:$0xff] %v4044_v0 }
  0x1c   :  { %v144_v6 = vld.sshfl [vmem:[#allocation1] sm:$0xff pattern:$0x75643120]  ;;  %v146_v7 = vld.sshfl [vmem:[#allocation1 + $0x8] sm:$0xff pattern:$0x75643120] }
  0x1d   :  { %114 = vrot.lane.b32.xlu0 %v108_v4, %s4045_s21  ;;  %150 = vrot.lane.b32.xlu1 %v144_v6, %s4046_s0  ;;  %177 = vst [vmem:[#allocation1] ss:$2 sm:$0xff] %v89_v1  ;;  %v148_v8 = vld.sshfl [vmem:[#allocation1 + $0x10] sm:$0xff pattern:$0x75643120] }
  0x1e   :  { %154 = vrot.lane.b32.xlu2 %v148_v8, %s4046_s0  ;;  %179 = vst [vmem:[#allocation1 + $0x10] ss:$2 sm:$0xff] %v90_v2 }
  0x1f   :  { %87 = vst [vmem:[#allocation4 + $0x64] sm:$0xff] %v4044_v0 }
  0x20   :  { %59 = vst.msk [vmem:[#allocation2 + $0x18] sm:$0xf] %vm58_vm0, %v4044_v0 }
  0x21   :  { %64 = vst.msk [vmem:[#allocation2 + $0x34] sm:$0x3] %vm63_vm1, %v4044_v0 }
  0x22   :  { %76 = vst.msk [vmem:[#allocation4 + $0x18] sm:$0xf] %vm58_vm0, %v4044_v0 }
  0x23   :  { %80 = vst.msk [vmem:[#allocation4 + $0x34] sm:$0xf] %vm58_vm0, %v4044_v0 }
  0x24   :  { %84 = vst.msk [vmem:[#allocation4 + $0x50] sm:$0xf] %vm58_vm0, %v4044_v0  ;;  %v180_v11 = vld.sshfl [vmem:[#allocation1] sm:$0xff pattern:$0x75643120] }
  0x25   :  { %152 = vrot.lane.b32.xlu1 %v146_v7, %s4046_s0  ;;  %88 = vst.msk [vmem:[#allocation4 + $0x6c] sm:$0xf] %vm58_vm0, %v4044_v0  ;;  %v181_v14 = vld.sshfl [vmem:[#allocation1 + $0x8] sm:$0xff pattern:$0x75643120]  ;;  %vm498_vm0 = vcmask 908288  }
  0x26   :  { %186 = vst [vmem:[#allocation2 + $0x1c] sm:$0x33] %v180_v11  ;;  %v182_v15 = vld.sshfl [vmem:[#allocation1 + $0x10] sm:$0xff pattern:$0x75643120] }
  0x27   :  { %187 = vst [vmem:[#allocation2 + $0x24] sm:$0x33] %v181_v14 }
  0x28   :  { %188 = vst [vmem:[#allocation2 + $0x2c] sm:$0x33] %v182_v15  ;;  %v3941_v51 = vld [vmem:[#allocation2 + $0x30] sm:$0x30] }
  0x2d   :  { %v3938_v32 = vld [vmem:[#allocation2 + $0x18] sm:$0x30]  ;;  %v3710_v33 = vld [vmem:[#allocation2 + $0x1c] sm:$0x30] }
  0x2e   :  { %v3939_v42 = vld [vmem:[#allocation2 + $0x20] sm:$0x30]  ;;  %v3718_v43 = vld [vmem:[#allocation2 + $0x24] sm:$0x30] }
  0x2f   :  { %v3940_v44 = vld [vmem:[#allocation2 + $0x28] sm:$0x30]  ;;  %v3726_v53 = vld [vmem:[#allocation2 + $0x2c] sm:$0x30] }
  0x70   :  { %v117_v9 = vpop.permute.xlu2 %116 }
  0x71   :  { %v120_v10 = vrot.slane %v117_v9, 4 }
  0x73   :  { %139 = vst.msk [vmem:[#allocation2 + $0x18] sm:$0x3] %vm63_vm1, %v120_v10 }
  0x78   :  { %v155_v12 = vpop.permute.xlu2 %154 }
  0x79   :  { %v158_v13 = vrot.slane %v155_v12, 4 }
  0x7b   :  { %176 = vst.msk [vmem:[#allocation2 + $0x18] sm:$0xc] %vm175_vm2, %v158_v13 }
  0x82   :  { %v3732_v54 = vld [vmem:[#allocation2 + $0x18] sm:$0xf] }
  0x83   :  { %v3733_v56 = vor.u32 %v3941_v51, %v3732_v54 }
  0x87   :  { %v113_v16 = vpop.permute.xlu0 %112 }
  0x88   :  { %v118_v18 = vrot.slane %v113_v16, 4 }
  0x8a   :  { %v122_v19 = vsel %vm71_vm5, %v118_v18, %v113_v16 }
  0x8b   :  { %135 = vst.msk [vmem:[#allocation2] sm:$0x33] %vm4131_vm6, %v122_v19 }
  0x8f   :  { %v115_v20 = vpop.permute.xlu0 %114  ;;  %v151_v21 = vpop.permute.xlu1 %150 }
  0x90   :  { %v119_v22 = vrot.slane %v115_v20, 4  ;;  %v156_v24 = vrot.slane %v151_v21, 4 }
  0x92   :  { %v124_v25 = vsel %vm123_vm9, %v118_v18, %v119_v22  ;;  %v126_v26 = vsel %vm123_vm9, %v119_v22, %v120_v10  ;;  %v160_v27 = vsel %vm6238_vm10, %v156_v24, %v151_v21 }
  0x93   :  { %v125_v28 = vsel %vm71_vm5, %v124_v25, %v115_v20  ;;  %v127_v29 = vsel %vm71_vm5, %v126_v26, %v117_v9  ;;  %172 = vst.msk [vmem:[#allocation2] sm:$0xcc] %vm4138_vm11, %v160_v27 }
  0x94   :  { %136 = vst [vmem:[#allocation2 + $0x8] sm:$0x33] %v125_v28 }
  0x95   :  { %137 = vst [vmem:[#allocation2 + $0x10] sm:$0x33] %v127_v29 }
  0x97   :  { %v153_v30 = vpop.permute.xlu1 %152 }
  0x98   :  { %v157_v31 = vrot.slane %v153_v30, 4 }
  0x9a   :  { %v161_v34 = vsel %vm123_vm9, %v156_v24, %v157_v31  ;;  %v163_v35 = vsel %vm123_vm9, %v157_v31, %v158_v13  ;;  %v3708_v36 = vld [vmem:[#allocation2] sm:$0xf]  ;;  %v3935_v37 = vld [vmem:[#allocation2 + $0x4] sm:$0xf] }
  0x9b   :  { %v162_v38 = vsel %vm6238_vm10, %v161_v34, %v153_v30  ;;  %v164_v39 = vsel %vm6238_vm10, %v163_v35, %v155_v12  ;;  %v3709_v40 = vor.u32 %v3938_v32, %v3708_v36  ;;  %v3713_v41 = vor.u32 %v3935_v37, %v3710_v33  ;;  %v3740_v30 = vld [vmem:[%s6152_s1 + $0x2] sm:$0x3] }
  0x9c   :  { %173 = vst [vmem:[#allocation2 + $0x8] sm:$0xcc] %v162_v38  ;;  %v97_v32 = vld [vmem:[%s6154_s3] sm:$0xf]  ;;  %s4056_s3 = smov 48  }
  0x9d   :  { %174 = vst [vmem:[#allocation2 + $0x10] sm:$0xcc] %v164_v39  ;;  %234 = vrot.lane.b32.xlu0 %v3709_v40, %s4047_s22  ;;  %236 = vrot.lane.b32.xlu1 %v3713_v41, %s4047_s22  ;;  %v98_v39 = vld [vmem:[%s6155_s4] sm:$0xf] }
  0xa3   :  { %v3716_v45 = vld [vmem:[#allocation2 + $0x8] sm:$0xf]  ;;  %v3936_v46 = vld [vmem:[#allocation2 + $0xc] sm:$0xf] }
  0xa4   :  { %v3717_v47 = vor.u32 %v3939_v42, %v3716_v45  ;;  %v3721_v48 = vor.u32 %v3936_v46, %v3718_v43  ;;  %v3724_v49 = vld [vmem:[#allocation2 + $0x10] sm:$0xf]  ;;  %v3937_v52 = vld [vmem:[#allocation2 + $0x14] sm:$0xf] }
  0xa5   :  { %v3725_v50 = vor.u32 %v3940_v44, %v3724_v49  ;;  %v3729_v55 = vor.u32 %v3937_v52, %v3726_v53 }
  0xa6   :  { %238 = vrot.lane.b32.xlu2 %v3717_v47, %s4047_s22  ;;  %240 = vrot.lane.b32.xlu0 %v3721_v48, %s4047_s22 }
  0xa7   :  { %242 = vrot.lane.b32.xlu1 %v3725_v50, %s4047_s22 }
  0xae   :  { %244 = vrot.lane.b32.xlu2 %v3729_v55, %s4047_s22  ;;  %246 = vrot.lane.b32.xlu0 %v3733_v56, %s4047_s22 }
  0xaf   :  { %364 = vrot.lane.b32.xlu1 %v3709_v40, %s4048_s23 }
  0xb6   :  { %368 = vrot.lane.b32.xlu0 %v3717_v47, %s4048_s23  ;;  %366 = vrot.lane.b32.xlu2 %v3713_v41, %s4048_s23 }
  0xb7   :  { %370 = vrot.lane.b32.xlu1 %v3721_v48, %s4048_s23 }
  0xbe   :  { %374 = vrot.lane.b32.xlu0 %v3729_v55, %s4048_s23  ;;  %372 = vrot.lane.b32.xlu2 %v3725_v50, %s4048_s23 }
  0xbf   :  { %376 = vrot.lane.b32.xlu1 %v3733_v56, %s4048_s23 }
  0xc6   :  { %486 = vrot.lane.b32.xlu0 %v3713_v41, %s4049_s24  ;;  %484 = vrot.lane.b32.xlu2 %v3709_v40, %s4049_s24 }
  0xc7   :  { %488 = vrot.lane.b32.xlu1 %v3717_v47, %s4049_s24 }
  0xce   :  { %492 = vrot.lane.b32.xlu0 %v3725_v50, %s4049_s24  ;;  %490 = vrot.lane.b32.xlu2 %v3721_v48, %s4049_s24 }
  0xcf   :  { %494 = vrot.lane.b32.xlu1 %v3729_v55, %s4049_s24 }
  0xd6   :  { %496 = vrot.lane.b32.xlu2 %v3733_v56, %s4049_s24  ;;  %612 = vperm.xlu0 %3989, %v97_v32   ;;  %v189_v56 = vld [vmem:[%s6152_s1] sm:$0x3]  ;;  %s4051_s1 = smov 19  }
  0xd7   :  { %623 = vperm.xlu1 %3990, %v98_v39   ;;  %v4301_v39 = vld [vmem:[#allocation5 + $0x8] sm:$0x1f] }
 0x100   :  { %v239_v57 = vpop.permute.xlu2 %238 }
 0x108   :  { %v245_v58 = vpop.permute.xlu2 %244 }
 0x10f   :  { %v235_v61 = vpop.permute.xlu0 %234  ;;  %v237_v62 = vpop.permute.xlu1 %236 }
 0x110   :  { %v249_v63 = vsel %vm6170_vm12, %v235_v61, %v237_v62  ;;  %v250_v0 = vsel %vm6170_vm12, %v237_v62, %v239_v57  ;;  %v367_v5 = vpop.permute.xlu2 %366 }
 0x111   :  { %v261_v1 = vsel %vm6165_vm13, %v249_v63, 0  ;;  %v264_v2 = vsel %vm6165_vm13, %v250_v0, 0 }
 0x112   :  { %285 = vmatpush.bf16.msra.mxu0 %v261_v1  ;;  %299 = vmatpush.bf16.msra.mxu1 %v264_v2 }
 0x115   :  { %3734 = vmatmul.msk.bf16.vlgmr.msra.gmra.mxu0 %vm6162_vm14, %v3705_v3  ;;  %3735 = vmatmul.msk.bf16.vlgmr.msra.gmra.mxu1 %vm6162_vm14, %v3705_v3 }
 0x118   :  { %v241_v4 = vpop.permute.xlu0 %240  ;;  %v373_v19 = vpop.permute.xlu2 %372 }
 0x119   :  { %v243_v6 = vpop.permute.xlu1 %242  ;;  %v251_v7 = vsel %vm6170_vm12, %v239_v57, %v241_v4 }
 0x11a   :  { %v267_v8 = vsel %vm6165_vm13, %v251_v7, 0  ;;  %v252_v9 = vsel %vm6170_vm12, %v241_v4, %v243_v6  ;;  %v253_v10 = vsel %vm6170_vm12, %v243_v6, %v245_v58 }
 0x11b   :  { %313 = vmatpush.bf16.msra.mxu2 %v267_v8  ;;  %v270_v11 = vsel %vm6165_vm13, %v252_v9, 0  ;;  %v273_v12 = vsel %vm6165_vm13, %v253_v10, 0 }
 0x11c   :  { %327 = vmatpush.bf16.msra.mxu3 %v270_v11  ;;  %341 = vmatpush.bf16.msrb.mxu0 %v273_v12 }
 0x11e   :  { %3736 = vmatmul.msk.bf16.vlgmr.msra.gmra.mxu2 %vm6162_vm14, %v3705_v3 }
 0x11f   :  { %3737 = vmatmul.msk.bf16.vlgmr.msra.gmra.mxu3 %vm6162_vm14, %v3705_v3 }
 0x120   :  { %v247_v13 = vpop.permute.xlu0 %246  ;;  %v485_v31 = vpop.permute.xlu2 %484 }
 0x121   :  { %v365_v14 = vpop.permute.xlu1 %364  ;;  %v254_v15 = vsel %vm6170_vm12, %v245_v58, %v247_v13  ;;  %vm1463_vm12 = vcmask 1047696  }
 0x122   :  { %v276_v16 = vsel %vm6165_vm13, %v254_v15, 0  ;;  %v379_v18 = vsel %vm378_vm15, %v365_v14, %v367_v5 }
 0x123   :  { %355 = vmatpush.bf16.msrb.mxu1 %v276_v16  ;;  %v389_v20 = vsel %vm6165_vm13, %v379_v18, 0 }
 0x124   :  { %413 = vmatpush.bf16.msrb.mxu2 %v389_v20 }
 0x125   :  { %3738 = vmatmul.msk.bf16.vlgmr.msrb.gmra.mxu0 %vm6162_vm14, %v3705_v3 }
 0x126   :  { %3739 = vmatmul.msk.bf16.vlgmr.msrb.gmra.mxu1 %vm6162_vm14, %v3705_v3 }
 0x128   :  { %v369_v21 = vpop.permute.xlu0 %368  ;;  %v491_v40 = vpop.permute.xlu2 %490 }
 0x129   :  { %v371_v22 = vpop.permute.xlu1 %370  ;;  %v380_v24 = vsel %vm378_vm15, %v367_v5, %v369_v21 }
 0x12a   :  { %v381_v25 = vsel %vm378_vm15, %v369_v21, %v371_v22  ;;  %v382_v26 = vsel %vm378_vm15, %v371_v22, %v373_v19  ;;  %v392_v27 = vsel %vm6165_vm13, %v380_v24, 0 }
 0x12b   :  { %426 = vmatpush.bf16.msrb.mxu3 %v392_v27  ;;  %v395_v28 = vsel %vm6165_vm13, %v381_v25, 0  ;;  %v398_v29 = vsel %vm6165_vm13, %v382_v26, 0 }
 0x12c   :  { %439 = vmatpush.bf16.msra.mxu0 %v395_v28  ;;  %452 = vmatpush.bf16.msra.mxu1 %v398_v29 }
 0x12e   :  { %3741 = vmatmul.msk.bf16.vlgmr.msrb.gmra.mxu2 %vm6162_vm14, %v3740_v30 }
 0x12f   :  { %3742 = vmatmul.msk.bf16.vlgmr.msrb.gmra.mxu3 %vm6162_vm14, %v3740_v30 }
 0x130   :  { %v375_v33 = vpop.permute.xlu0 %374  ;;  %v497_v50 = vpop.permute.xlu2 %496 }
 0x131   :  { %v383_v34 = vsel %vm378_vm15, %v373_v19, %v375_v33  ;;  %v377_v35 = vpop.permute.xlu1 %376 }
 0x132   :  { %v384_v36 = vsel %vm378_vm15, %v375_v33, %v377_v35  ;;  %v401_v37 = vsel %vm6165_vm13, %v383_v34, 0 }
 0x133   :  { %v404_v38 = vsel %vm6165_vm13, %v384_v36, 0  ;;  %465 = vmatpush.bf16.msra.mxu2 %v401_v37  ;;  %v4298_v37 = vld [vmem:[#allocation5] sm:$0x1f] }
 0x134   :  { %478 = vmatpush.bf16.msra.mxu3 %v404_v38 }
 0x135   :  { %3743 = vmatmul.msk.bf16.vlgmr.msra.gmra.mxu0 %vm6162_vm14, %v3740_v30 }
 0x136   :  { %3744 = vmatmul.msk.bf16.vlgmr.msra.gmra.mxu1 %vm6162_vm14, %v3740_v30 }
 0x138   :  { %v487_v41 = vpop.permute.xlu0 %486 }
 0x139   :  { %v499_v42 = vsel %vm498_vm0, %v485_v31, %v487_v41  ;;  %v489_v43 = vpop.permute.xlu1 %488 }
 0x13a   :  { %v500_v44 = vsel %vm498_vm0, %v487_v41, %v489_v43  ;;  %v501_v45 = vsel %vm498_vm0, %v489_v43, %v491_v40  ;;  %v509_v46 = vsel %vm6165_vm13, %v499_v42, 0 }
 0x13b   :  { %533 = vmatpush.bf16.msrb.mxu0 %v509_v46  ;;  %v512_v47 = vsel %vm6165_vm13, %v500_v44, 0  ;;  %v515_v48 = vsel %vm6165_vm13, %v501_v45, 0  ;;  %v650_v45 = vperm.slane %v4298_v37, 4 }
 0x13c   :  { %546 = vmatpush.bf16.msrb.mxu1 %v512_v47  ;;  %559 = vmatpush.bf16.msrb.mxu2 %v515_v48  ;;  %v651_v48 = vperm.slane %v4301_v39, 4 }
 0x13e   :  { %3745 = vmatmul.msk.bf16.vlgmr.msra.gmra.mxu2 %vm6162_vm14, %v3740_v30 }
 0x13f   :  { %3746 = vmatmul.msk.bf16.vlgmr.msra.gmra.mxu3 %vm6162_vm14, %v3740_v30 }
 0x140   :  { %v493_v49 = vpop.permute.xlu0 %492 }
 0x141   :  { %v502_v51 = vsel %vm498_vm0, %v491_v40, %v493_v49  ;;  %v495_v52 = vpop.permute.xlu1 %494 }
 0x142   :  { %v503_v53 = vsel %vm498_vm0, %v493_v49, %v495_v52  ;;  %v504_v54 = vsel %vm498_vm0, %v495_v52, %v497_v50  ;;  %v518_v55 = vsel %vm6165_vm13, %v502_v51, 0 }
 0x143   :  { %572 = vmatpush.bf16.msrb.mxu3 %v518_v55  ;;  %v521_v57 = vsel %vm6165_vm13, %v503_v53, 0  ;;  %v524_v58 = vsel %vm6165_vm13, %v504_v54, 0  ;;  %vm879_vm13 = vcmask 138240  }
 0x144   :  { %585 = vmatpush.bf16.msra.mxu0 %v521_v57  ;;  %598 = vmatpush.bf16.msra.mxu1 %v524_v58 }
 0x145   :  { %3747 = vmatmul.msk.bf16.vlgmr.msrb.gmra.mxu0 %vm6162_vm14, %v189_v56 }
 0x146   :  { %3748 = vmatmul.msk.bf16.vlgmr.msrb.gmra.mxu1 %vm6162_vm14, %v189_v56 }
 0x148   :  { %v4293_v32 = vpop.permute.xlu0 %612 }
 0x149   :  { %v4295_v35 = vpop.permute.xlu1 %623 }
 0x14e   :  { %3749 = vmatmul.msk.bf16.vlgmr.msrb.gmra.mxu2 %vm6162_vm14, %v189_v56 }
 0x14f   :  { %3750 = vmatmul.msk.bf16.vlgmr.msrb.gmra.mxu3 %vm6162_vm14, %v189_v56 }
 0x155   :  { %3751 = vmatmul.msk.bf16.vlgmr.msra.gmra.mxu0 %vm6162_vm14, %v189_v56 }
 0x156   :  { %3752 = vmatmul.msk.bf16.vlgmr.msra.gmra.mxu1 %vm6162_vm14, %v189_v56  ;;  %vm963_vm14 = vcmask 154624  }
 0x192   :  { %v4246_v59 = vpop.f32.mrf.mxu0  ;;  %v4248_v60 = vpop.f32.mrf.mxu1 }
 0x193   :  { %6264 = vst [vmem:[#allocation11_spill] sm:$0xff] %v4246_v59  ;;  %v1421_v61 = vrot.slane %v4246_v59, 4  ;;  %v1424_v0 = vrot.slane %v4248_v60, 4 }
 0x194   :  { %6265 = vst [vmem:[#allocation12_spill] sm:$0xff] %v4248_v60 }
 0x19a   :  { %v4251_v62 = vpop.f32.mrf.mxu0  ;;  %v4253_v63 = vpop.f32.mrf.mxu1 }
 0x19b   :  { %6266 = vst [vmem:[#allocation13_spill] sm:$0xff] %v4251_v62  ;;  %v1422_v1 = vrot.slane %v4251_v62, 4  ;;  %v1425_v2 = vrot.slane %v4253_v63, 4 }
 0x19c   :  { %6267 = vst [vmem:[#allocation14_spill] sm:$0xff] %v4253_v63 }
 0x19d   :  { %v4259_v3 = vsel %vm123_vm9, %v1424_v0, %v1425_v2  ;;  %v4262_v4 = vsel %vm123_vm9, %v1421_v61, %v1422_v1 }
 0x19e   :  { %1441 = vrot.lane.b32.xlu0 %v4259_v3, %s4046_s0  ;;  %1439 = vrot.lane.b32.xlu2 %v4262_v4, %s4046_s0 }
 0x1a1   :  { %v4268_v5 = vpop.f32.mrf.mxu2 }
 0x1a2   :  { %6268 = vst [vmem:[#allocation15_spill] sm:$0xff] %v4268_v5  ;;  %v4270_v6 = vpop.f32.mrf.mxu3  ;;  %v4272_v7 = vpop.f32.mrf.mxu0  ;;  %v1427_v9 = vrot.slane %v4268_v5, 4 }
 0x1a3   :  { %6269 = vst [vmem:[#allocation16_spill] sm:$0xff] %v4270_v6  ;;  %v4274_v8 = vpop.f32.mrf.mxu1 }
 0x1a4   :  { %6270 = vst [vmem:[#allocation17_spill] sm:$0xff] %v4272_v7 }
 0x1a5   :  { %6271 = vst [vmem:[#allocation18_spill] sm:$0xff] %v4274_v8 }
 0x1a9   :  { %v4277_v10 = vpop.f32.mrf.mxu2 }
 0x1aa   :  { %6272 = vst [vmem:[#allocation19_spill] sm:$0xff] %v4277_v10  ;;  %v1428_v11 = vrot.slane %v4277_v10, 4  ;;  %v4280_v12 = vpop.f32.mrf.mxu3  ;;  %v4282_v13 = vpop.f32.mrf.mxu0 }
 0x1ab   :  { %6273 = vst [vmem:[#allocation20_spill] sm:$0xff] %v4280_v12  ;;  %v4284_v14 = vpop.f32.mrf.mxu1 }
 0x1ac   :  { %6274 = vst [vmem:[#allocation21_spill] sm:$0xff] %v4282_v13  ;;  %v4287_v15 = vsel %vm123_vm9, %v1427_v9, %v1428_v11 }
 0x1ad   :  { %6275 = vst [vmem:[#allocation22_spill] sm:$0xff] %v4284_v14  ;;  %1443 = vrot.lane.b32.xlu1 %v4287_v15, %s4046_s0 }
 0x1b1   :  { %v415_v16 = vpop.f32.mrf.mxu2 }
 0x1b2   :  { %v428_v18 = vpop.f32.mrf.mxu3  ;;  %v441_v19 = vpop.f32.mrf.mxu0 }
 0x1b3   :  { %v454_v20 = vpop.f32.mrf.mxu1 }
 0x1b9   :  { %v417_v21 = vpop.f32.mrf.mxu2 }
 0x1ba   :  { %v430_v22 = vpop.f32.mrf.mxu3  ;;  %v443_v24 = vpop.f32.mrf.mxu0  ;;  %v4324_v21 = vld [vmem:[#allocation5 + $0x10] sm:$0x1f] }
 0x1bb   :  { %v456_v25 = vpop.f32.mrf.mxu1 }
 0x1bc   :  { %v4328_v25 = vld [vmem:[#allocation5 + $0x20] sm:$0x1f] }
 0x1c1   :  { %v467_v26 = vpop.f32.mrf.mxu2 }
 0x1c2   :  { %v480_v27 = vpop.f32.mrf.mxu3  ;;  %v535_v28 = vpop.f32.mrf.mxu0 }
 0x1c3   :  { %v536_v29 = vadd.f32 %v535_v28, %v4246_v59  ;;  %v548_v30 = vpop.f32.mrf.mxu1 }
 0x1c4   :  { %v549_v31 = vadd.f32 %v548_v30, %v4248_v60 }
 0x1c5   :  { %v604_v33 = vadd.f32 %v536_v29, %v415_v16  ;;  %v652_v29 = vperm.slane %v4324_v21, 4 }
 0x1c6   :  { %v605_v34 = vadd.f32 %v549_v31, %v428_v18  ;;  %v4322_v18 = vld [vmem:[#allocation5 + $0x18] sm:$0x1f] }
 0x1c7   :  { %v615_v36 = vmul.f32 %v4293_v32, %v604_v33 }
 0x1c8   :  { %v616_v38 = vmul.f32 %v4293_v32, %v605_v34  ;;  %v654_v34 = vperm.slane %v4328_v25, 4 }
 0x1c9   :  { %v626_v40 = vadd.f32 %v4295_v35, %v615_v36  ;;  %v469_v41 = vpop.f32.mrf.mxu2 }
 0x1ca   :  { %v627_v42 = vadd.f32 %v4295_v35, %v616_v38  ;;  %v482_v43 = vpop.f32.mrf.mxu3  ;;  %v537_v44 = vpop.f32.mrf.mxu0 }
 0x1cb   :  { %v550_v46 = vpop.f32.mrf.mxu1  ;;  %vm632_vm3 = vcmp.ge.f32.partialorder %v626_v40, 0.0  ;;  %v638_v47 = vmul.f32 0.01, %v626_v40 }
 0x1cc   :  { %vm633_vm7 = vcmp.ge.f32.partialorder %v627_v42, 0.0  ;;  %v639_v49 = vmul.f32 0.01, %v627_v42 }
 0x1cd   :  { %v644_v50 = vsel %vm632_vm3, %v626_v40, %v638_v47 }
 0x1ce   :  { %v4307_v51 = vmul.f32 %v650_v45, %v644_v50  ;;  %v645_v52 = vsel %vm633_vm7, %v627_v42, %v639_v49 }
 0x1cf   :  { %v4309_v53 = vmul.f32 %v651_v48, %v645_v52  ;;  %v4352_v52 = vld [vmem:[#allocation5 + $0x28] sm:$0x1f] }
 0x1d0   :  { %739 = vrot.lane.b32.xlu0 %v4307_v51, %s4045_s21  ;;  %668 = vrot.lane.b32.xlu2 %v4307_v51, %s4046_s0 }
 0x1d1   :  { %v561_v54 = vpop.f32.mrf.mxu2  ;;  %670 = vrot.lane.b32.xlu1 %v4309_v53, %s4046_s0 }
 0x1d2   :  { %v562_v55 = vadd.f32 %v561_v54, %v4268_v5  ;;  %v574_v56 = vpop.f32.mrf.mxu3  ;;  %v587_v57 = vpop.f32.mrf.mxu0 }
 0x1d3   :  { %v575_v58 = vadd.f32 %v574_v56, %v4270_v6  ;;  %v588_v61 = vadd.f32 %v587_v57, %v4272_v7  ;;  %v600_v0 = vpop.f32.mrf.mxu1 }
 0x1d4   :  { %v606_v1 = vadd.f32 %v562_v55, %v441_v19  ;;  %v601_v16 = vadd.f32 %v600_v0, %v4274_v8 }
 0x1d5   :  { %v607_v2 = vadd.f32 %v575_v58, %v454_v20  ;;  %v608_v9 = vadd.f32 %v588_v61, %v467_v26  ;;  %v653_v26 = vperm.slane %v4322_v18, 4  ;;  %v4372_v58 = vmul.f32 0.25, %v4298_v37 }
 0x1d6   :  { %v617_v11 = vmul.f32 %v4293_v32, %v606_v1  ;;  %v609_v33 = vadd.f32 %v601_v16, %v480_v27 }
 0x1d7   :  { %v618_v22 = vmul.f32 %v4293_v32, %v607_v2  ;;  %v619_v24 = vmul.f32 %v4293_v32, %v608_v9  ;;  %6277 = vst [vmem:[#allocation24_spill] sm:$0xff] %v4372_v58  ;;  %v6176_v61 = vperm.slane %v4372_v58, 0 }
 0x1d8   :  { %v628_v28 = vadd.f32 %v4295_v35, %v617_v11  ;;  %v620_v47 = vmul.f32 %v4293_v32, %v609_v33  ;;  %v655_v32 = vperm.slane %v4352_v52, 4 }
 0x1d9   :  { %v629_v19 = vadd.f32 %v4295_v35, %v618_v22  ;;  %v630_v20 = vadd.f32 %v4295_v35, %v619_v24  ;;  %741 = vrot.lane.b32.xlu1 %v4309_v53, %s4045_s21  ;;  %v563_v30 = vpop.f32.mrf.mxu2 }
 0x1da   :  { %vm634_vm8 = vcmp.ge.f32.partialorder %v628_v28, 0.0  ;;  %v640_v31 = vmul.f32 0.01, %v628_v28  ;;  %v576_v36 = vpop.f32.mrf.mxu3  ;;  %v589_v38 = vpop.f32.mrf.mxu0  ;;  %v631_v27 = vadd.f32 %v4295_v35, %v620_v47  ;;  %v4050_v35 = vmov 0.0  }
 0x1db   :  { %vm635_vm3 = vcmp.ge.f32.partialorder %v629_v19, 0.0  ;;  %v641_v40 = vmul.f32 0.01, %v629_v19  ;;  %vm636_vm7 = vcmp.ge.f32.partialorder %v630_v20, 0.0  ;;  %v642_v41 = vmul.f32 0.01, %v630_v20  ;;  %v602_v42 = vpop.f32.mrf.mxu1 }
 0x1dc   :  { %v646_v43 = vsel %vm634_vm8, %v628_v28, %v640_v31  ;;  %v643_v50 = vmul.f32 0.01, %v631_v27  ;;  %vm637_vm8 = vcmp.ge.f32.partialorder %v631_v27, 0.0  ;;  %65 = vst [vmem:[#allocation3] sm:$0xff] %v4050_v35 }
 0x1dd   :  { %v647_v44 = vsel %vm635_vm3, %v629_v19, %v641_v40  ;;  %v648_v45 = vsel %vm636_vm7, %v630_v20, %v642_v41  ;;  %v4338_v46 = vmul.f32 %v652_v29, %v646_v43  ;;  %66 = vst [vmem:[#allocation3 + $0x8] sm:$0xff] %v4050_v35  ;;  %vm693_vm3 = vcmask 1043600  }
 0x1de   :  { %v4341_v48 = vmul.f32 %v653_v26, %v647_v44  ;;  %v4343_v49 = vmul.f32 %v654_v34, %v648_v45  ;;  %v649_v54 = vsel %vm637_vm8, %v631_v27, %v643_v50  ;;  %67 = vst [vmem:[#allocation3 + $0x10] sm:$0xff] %v4050_v35  ;;  %vm700_vm7 = vcmask 142336  }
 0x1df   :  { %672 = vrot.lane.b32.xlu2 %v4338_v46, %s4046_s0  ;;  %v4361_v55 = vmul.f32 %v655_v32, %v649_v54  ;;  %68 = vst [vmem:[#allocation3 + $0x18] sm:$0xff] %v4050_v35  ;;  %v4391_v29 = vmul.f32 0.25, %v4301_v39  ;;  %v4413_v27 = vmul.f32 0.25, %v4322_v18  ;;  %v4416_v32 = vmul.f32 0.25, %v4324_v21 }
 0x1e0   :  { %674 = vrot.lane.b32.xlu0 %v4341_v48, %s4046_s0  ;;  %69 = vst [vmem:[#allocation3 + $0x20] sm:$0xff] %v4050_v35  ;;  %vm798_vm8 = vcmask 752640  }
 0x1e1   :  { %676 = vrot.lane.b32.xlu1 %v4343_v49, %s4046_s0  ;;  %70 = vst [vmem:[#allocation3 + $0x28] sm:$0xff] %v4050_v35  ;;  %v6175_v40 = vperm.slane %v4391_v29, 0  ;;  %v6169_v18 = vperm.slane %v4413_v27, 0  ;;  %v6174_v21 = vperm.slane %v4416_v32, 0 }
 0x1e2   :  { %72 = vst.msk [vmem:[#allocation3 + $0x30] sm:$0xff] %vm71_vm5, %v4050_v35 }
 0x1e3   :  { %6278 = vst [vmem:[#allocation25_spill] sm:$0xff] %v4391_v29 }
 0x1e7   :  { %743 = vrot.lane.b32.xlu2 %v4338_v46, %s4045_s21 }
 0x1e8   :  { %745 = vrot.lane.b32.xlu0 %v4341_v48, %s4045_s21 }
 0x1e9   :  { %747 = vrot.lane.b32.xlu1 %v4343_v49, %s4045_s21 }
 0x1ef   :  { %678 = vrot.lane.b32.xlu2 %v4361_v55, %s4046_s0 }
 0x1f7   :  { %749 = vrot.lane.b32.xlu2 %v4361_v55, %s4045_s21 }
 0x1f8   :  { %v4368_v56 = vpop.permute.xlu2 %1439 }
 0x1f9   :  { %6276 = vst [vmem:[#allocation23_spill] sm:$0xff] %v4368_v56 }
 0x210   :  { %v4383_v16 = vpop.permute.xlu0 %1441 }
 0x21f   :  { %v4385_v37 = vpop.permute.xlu1 %1443 }
 0x22a   :  { %v669_v57 = vpop.permute.xlu2 %668 }
 0x22b   :  { %694 = vst.msk [vmem:[#allocation3] sm:$0xf] %vm693_vm3, %v669_v57 }
 0x232   :  { %v702_v0 = vld [vmem:[#allocation3] sm:$0xf] }
 0x233   :  { %v715_v1 = vsub.f32 %v702_v0, %v4307_v51 }
 0x235   :  { %v727_v2 = vmul.f32 %v6176_v61, %v715_v1 }
 0x237   :  { %v4379_v9 = vadd.f32 %v727_v2, %v4307_v51 }
 0x239   :  { %951 = vrot.lane.b32.xlu2 %v4379_v9, %s4051_s1  ;;  %v673_v11 = vpop.permute.xlu2 %672 }
 0x241   :  { %v744_v22 = vpop.permute.xlu2 %743 }
 0x242   :  { %v740_v24 = vpop.permute.xlu0 %739 }
 0x243   :  { %v764_v28 = vsub.f32 %v702_v0, %v740_v24  ;;  %v671_v19 = vpop.permute.xlu1 %670 }
 0x244   :  { %v681_v20 = vsel %vm6238_vm10, %v669_v57, %v671_v19  ;;  %v682_v26 = vsel %vm6238_vm10, %v671_v19, %v673_v11 }
 0x245   :  { %695 = vst [vmem:[#allocation3 + $0x8] sm:$0xf] %v681_v20  ;;  %784 = vrot.lane.b32.xlu0 %v764_v28, %s4052_s14 }
 0x246   :  { %696 = vst [vmem:[#allocation3 + $0x10] sm:$0xf] %v682_v26 }
 0x249   :  { %v679_v30 = vpop.permute.xlu2 %678 }
 0x24a   :  { %701 = vst.msk [vmem:[#allocation3 + $0x30] sm:$0xf] %vm700_vm7, %v679_v30 }
 0x24b   :  { %v742_v31 = vpop.permute.xlu1 %741 }
 0x24c   :  { %v752_v33 = vsel %vm71_vm5, %v740_v24, %v742_v31  ;;  %v703_v34 = vld [vmem:[#allocation3 + $0x8] sm:$0xf] }
 0x24d   :  { %v765_v36 = vsub.f32 %v703_v34, %v752_v33  ;;  %v716_v38 = vsub.f32 %v703_v34, %v4309_v53  ;;  %v704_v50 = vld [vmem:[#allocation3 + $0x10] sm:$0xf] }
 0x24e   :  { %v717_v1 = vsub.f32 %v704_v50, %v4338_v46 }
 0x24f   :  { %786 = vrot.lane.b32.xlu1 %v765_v36, %s4052_s14  ;;  %v728_v41 = vmul.f32 %v6175_v40, %v716_v38 }
 0x250   :  { %v729_v24 = vmul.f32 %v6174_v21, %v717_v1 }
 0x251   :  { %v4401_v39 = vadd.f32 %v728_v41, %v4309_v53  ;;  %v708_v38 = vld [vmem:[#allocation3 + $0x30] sm:$0xf] }
 0x252   :  { %v675_v42 = vpop.permute.xlu0 %674  ;;  %v4435_v20 = vadd.f32 %v729_v24, %v4338_v46 }
 0x253   :  { %v683_v43 = vsel %vm6238_vm10, %v673_v11, %v675_v42  ;;  %953 = vrot.lane.b32.xlu0 %v4401_v39, %s4051_s1  ;;  %831 = vrot.lane.b32.xlu2 %v4401_v39, %s4046_s0  ;;  %v677_v44 = vpop.permute.xlu1 %676  ;;  %v753_v11 = vsel %vm71_vm5, %v742_v31, %v744_v22  ;;  %v750_v31 = vpop.permute.xlu2 %749 }
 0x254   :  { %697 = vst [vmem:[#allocation3 + $0x18] sm:$0xf] %v683_v43  ;;  %v684_v45 = vsel %vm6238_vm10, %v675_v42, %v677_v44  ;;  %v685_v47 = vsel %vm6238_vm10, %v677_v44, %v679_v30  ;;  %v766_v28 = vsub.f32 %v704_v50, %v753_v11  ;;  %v4447_v30 = vmul.f32 0.25, %v4328_v25 }
 0x255   :  { %698 = vst [vmem:[#allocation3 + $0x20] sm:$0xf] %v684_v45  ;;  %v770_v25 = vsub.f32 %v708_v38, %v750_v31  ;;  %v4463_v45 = vmul.f32 0.25, %v4352_v52 }
 0x256   :  { %699 = vst [vmem:[#allocation3 + $0x28] sm:$0xf] %v685_v47  ;;  %v6168_v43 = vperm.slane %v4447_v30, 0 }
 0x257   :  { %829 = vrot.lane.b32.xlu1 %v4379_v9, %s4046_s0  ;;  %6279 = vst [vmem:[#allocation26_spill] sm:$0xff] %v4463_v45 }
 0x25a   :  { %v746_v54 = vpop.permute.xlu0 %745 }
 0x25b   :  { %v754_v35 = vsel %vm71_vm5, %v744_v22, %v746_v54  ;;  %869 = vrot.lane.b32.xlu2 %v4401_v39, %s4053_s15  ;;  %v705_v57 = vld [vmem:[#allocation3 + $0x18] sm:$0xf]  ;;  %v748_v26 = vpop.permute.xlu1 %747 }
 0x25c   :  { %v767_v0 = vsub.f32 %v705_v57, %v754_v35  ;;  %v718_v2 = vsub.f32 %v705_v57, %v4341_v48  ;;  %v756_v33 = vsel %vm71_vm5, %v748_v26, %v750_v31  ;;  %v706_v36 = vld [vmem:[#allocation3 + $0x20] sm:$0xf]  ;;  %v755_v50 = vsel %vm71_vm5, %v746_v54, %v748_v26 }
 0x25d   :  { %v707_v34 = vld [vmem:[#allocation3 + $0x28] sm:$0xf]  ;;  %v719_v42 = vsub.f32 %v706_v36, %v4343_v49  ;;  %v6167_v57 = vperm.slane %v4463_v45, 0 }
 0x25e   :  { %790 = vrot.lane.b32.xlu0 %v767_v0, %s4052_s14  ;;  %v730_v19 = vmul.f32 %v6169_v18, %v718_v2  ;;  %v769_v41 = vsub.f32 %v707_v34, %v756_v33  ;;  %v720_v35 = vsub.f32 %v707_v34, %v4361_v55  ;;  %v768_v0 = vsub.f32 %v706_v36, %v755_v50 }
 0x25f   :  { %867 = vrot.lane.b32.xlu1 %v4379_v9, %s4053_s15  ;;  %v731_v44 = vmul.f32 %v6168_v43, %v719_v42  ;;  %v6164_v34 = vperm.slane %v4391_v29, 1 }
 0x260   :  { %v4438_v22 = vadd.f32 %v730_v19, %v4341_v48  ;;  %v732_v52 = vmul.f32 %v6167_v57, %v720_v35  ;;  %v6163_v35 = vperm.slane %v4416_v32, 1 }
 0x261   :  { %v4466_v47 = vadd.f32 %v731_v44, %v4343_v49 }
 0x262   :  { %v4481_v54 = vadd.f32 %v732_v52, %v4361_v55 }
 0x263   :  { %788 = vrot.lane.b32.xlu2 %v766_v28, %s4052_s14  ;;  %v6166_v28 = vperm.slane %v4372_v58, 1 }
 0x266   :  { %833 = vrot.lane.b32.xlu0 %v4435_v20, %s4046_s0 }
 0x267   :  { %835 = vrot.lane.b32.xlu1 %v4438_v22, %s4046_s0 }
 0x26b   :  { %957 = vrot.lane.b32.xlu2 %v4438_v22, %s4051_s1 }
 0x26e   :  { %871 = vrot.lane.b32.xlu0 %v4435_v20, %s4053_s15 }
 0x26f   :  { %873 = vrot.lane.b32.xlu1 %v4438_v22, %s4053_s15 }
 0x273   :  { %794 = vrot.lane.b32.xlu2 %v769_v41, %s4052_s14 }
 0x276   :  { %796 = vrot.lane.b32.xlu0 %v770_v25, %s4052_s14 }
 0x277   :  { %955 = vrot.lane.b32.xlu1 %v4435_v20, %s4051_s1 }
 0x27b   :  { %837 = vrot.lane.b32.xlu2 %v4466_v47, %s4046_s0 }
 0x27e   :  { %959 = vrot.lane.b32.xlu0 %v4466_v47, %s4051_s1 }
 0x27f   :  { %792 = vrot.lane.b32.xlu1 %v768_v0, %s4052_s14 }
 0x283   :  { %875 = vrot.lane.b32.xlu2 %v4466_v47, %s4053_s15 }
 0x286   :  { %839 = vrot.lane.b32.xlu0 %v4481_v54, %s4046_s0 }
 0x287   :  { %961 = vrot.lane.b32.xlu1 %v4481_v54, %s4051_s1 }
 0x28e   :  { %877 = vrot.lane.b32.xlu0 %v4481_v54, %s4053_s15 }
 0x293   :  { %v952_v1 = vpop.permute.xlu2 %951 }
 0x2ad   :  { %v832_v2 = vpop.permute.xlu2 %831 }
 0x2b5   :  { %v4489_v11 = vpop.permute.xlu2 %869 }
 0x2b7   :  { %v785_v19 = vpop.permute.xlu0 %784 }
 0x2bd   :  { %v789_v24 = vpop.permute.xlu2 %788 }
 0x2c1   :  { %v787_v26 = vpop.permute.xlu1 %786 }
 0x2c2   :  { %v799_v31 = vsel %vm798_vm8, %v785_v19, %v787_v26  ;;  %v800_v41 = vsel %vm798_vm8, %v787_v26, %v789_v24 }
 0x2c3   :  { %v811_v33 = vmul.f32 %v799_v31, %v6166_v28  ;;  %v812_v25 = vmul.f32 %v800_v41, %v6164_v34 }
 0x2c5   :  { %v4497_v36 = vadd.f32 %v811_v33, %v4307_v51  ;;  %v4499_v38 = vpop.permute.xlu2 %957  ;;  %v4506_v42 = vpop.permute.xlu0 %953  ;;  %v4513_v51 = vadd.f32 %v812_v25, %v4309_v53 }
 0x2c7   :  { %1155 = vrot.lane.b32.xlu1 %v4497_v36, %s4051_s1  ;;  %1041 = vrot.lane.b32.xlu0 %v4497_v36, %s4046_s0 }
 0x2c9   :  { %v830_v44 = vpop.permute.xlu1 %829 }
 0x2ca   :  { %v841_v50 = vsel %vm6238_vm10, %v830_v44, %v832_v2  ;;  %853 = vst.msk [vmem:[#allocation3] sm:$0xf] %vm693_vm3, %v830_v44 }
 0x2cb   :  { %854 = vst [vmem:[#allocation3 + $0x8] sm:$0xf] %v841_v50 }
 0x2cd   :  { %v4516_v0 = vpop.permute.xlu2 %794 }
 0x2cf   :  { %1043 = vrot.lane.b32.xlu1 %v4513_v51, %s4046_s0  ;;  %1079 = vrot.lane.b32.xlu0 %v4497_v36, %s4053_s15 }
 0x2d0   :  { %v791_v52 = vpop.permute.xlu0 %790 }
 0x2d1   :  { %v801_v19 = vsel %vm798_vm8, %v789_v24, %v791_v52  ;;  %v868_v26 = vpop.permute.xlu1 %867  ;;  %v860_v44 = vld [vmem:[#allocation3] sm:$0xf] }
 0x2d2   :  { %v813_v31 = vmul.f32 %v801_v19, %v6163_v35  ;;  %v861_v19 = vld [vmem:[#allocation3 + $0x8] sm:$0xf]  ;;  %v892_v35 = vsub.f32 %v860_v44, %v868_v26  ;;  %v880_v28 = vsel %vm879_vm13, %v868_v26, %v4489_v11 }
 0x2d3   :  { %v893_v43 = vsub.f32 %v861_v19, %v880_v28 }
 0x2d4   :  { %v4526_v53 = vadd.f32 %v813_v31, %v4338_v46  ;;  %v964_v31 = vsel %vm963_vm14, %v952_v1, %v4506_v42 }
 0x2d5   :  { %v838_v41 = vpop.permute.xlu2 %837  ;;  %v977_v34 = vsub.f32 %v861_v19, %v964_v31 }
 0x2d6   :  { %1045 = vrot.lane.b32.xlu2 %v4526_v53, %s4046_s0 }
 0x2d7   :  { %1081 = vrot.lane.b32.xlu1 %v4513_v51, %s4053_s15  ;;  %1159 = vrot.lane.b32.xlu0 %v4526_v53, %s4051_s1 }
 0x2d8   :  { %v834_v33 = vpop.permute.xlu0 %833 }
 0x2d9   :  { %v842_v24 = vsel %vm6238_vm10, %v832_v2, %v834_v33  ;;  %v836_v25 = vpop.permute.xlu1 %835 }
 0x2da   :  { %855 = vst [vmem:[#allocation3 + $0x10] sm:$0xf] %v842_v24  ;;  %v843_v46 = vsel %vm6238_vm10, %v834_v33, %v836_v25  ;;  %v844_v50 = vsel %vm6238_vm10, %v836_v25, %v838_v41 }
 0x2db   :  { %856 = vst [vmem:[#allocation3 + $0x18] sm:$0xf] %v843_v46  ;;  %v976_v46 = vsub.f32 %v860_v44, %v952_v1 }
 0x2dc   :  { %857 = vst [vmem:[#allocation3 + $0x20] sm:$0xf] %v844_v50  ;;  %v6172_v50 = vperm.slane %v4413_v27, 1 }
 0x2de   :  { %1083 = vrot.lane.b32.xlu2 %v4526_v53, %s4053_s15 }
 0x2df   :  { %998 = vrot.lane.b32.xlu0 %v977_v34, %s4048_s23  ;;  %912 = vrot.lane.b32.xlu1 %v892_v35, %s4049_s24 }
 0x2e0   :  { %v872_v2 = vpop.permute.xlu0 %871 }
 0x2e1   :  { %v874_v24 = vpop.permute.xlu1 %873 }
 0x2e2   :  { %v882_v28 = vsel %vm879_vm13, %v872_v2, %v874_v24 }
 0x2e6   :  { %1157 = vrot.lane.b32.xlu2 %v4513_v51, %s4051_s1 }
 0x2e8   :  { %v797_v33 = vpop.permute.xlu0 %796 }
 0x2e9   :  { %v956_v25 = vpop.permute.xlu1 %955  ;;  %v804_v44 = vsel %vm798_vm8, %v4516_v0, %v797_v33 }
 0x2ea   :  { %v966_v26 = vsel %vm963_vm14, %v956_v25, %v4499_v38 }
 0x2ee   :  { %996 = vrot.lane.b32.xlu2 %v976_v46, %s4048_s23  ;;  %v881_v46 = vsel %vm879_vm13, %v4489_v11, %v872_v2 }
 0x2f0   :  { %v960_v31 = vpop.permute.xlu0 %959 }
 0x2f1   :  { %v793_v34 = vpop.permute.xlu1 %792 }
 0x2f2   :  { %v802_v35 = vsel %vm798_vm8, %v791_v52, %v793_v34 }
 0x2f3   :  { %v814_v57 = vmul.f32 %v802_v35, %v6172_v50  ;;  %v965_v35 = vsel %vm963_vm14, %v4506_v42, %v956_v25  ;;  %v967_v42 = vsel %vm963_vm14, %v4499_v38, %v960_v31  ;;  %v4646_v50 = vperm.slane %v4372_v58, 3 }
 0x2f5   :  { %v4553_v18 = vadd.f32 %v814_v57, %v4341_v48  ;;  %v863_v48 = vld [vmem:[#allocation3 + $0x18] sm:$0xf]  ;;  %6280 = vst [vmem:[#allocation27_spill] sm:$0xff] %v4646_v50 }
 0x2f6   :  { %914 = vrot.lane.b32.xlu2 %v893_v43, %s4049_s24  ;;  %v6171_v43 = vperm.slane %v4463_v45, 1  ;;  %v979_v57 = vsub.f32 %v863_v48, %v966_v26  ;;  %v895_v19 = vsub.f32 %v863_v48, %v882_v28  ;;  %v6173_v26 = vperm.slane %v4447_v30, 1 }
 0x2f7   :  { %1161 = vrot.lane.b32.xlu1 %v4553_v18, %s4051_s1  ;;  %1047 = vrot.lane.b32.xlu0 %v4553_v18, %s4046_s0  ;;  %v803_v48 = vsel %vm798_vm8, %v793_v34, %v4516_v0  ;;  %v864_v0 = vld [vmem:[#allocation3 + $0x20] sm:$0xf] }
 0x2f8   :  { %v840_v1 = vpop.permute.xlu0 %839  ;;  %v815_v11 = vmul.f32 %v803_v48, %v6173_v26  ;;  %v980_v2 = vsub.f32 %v864_v0, %v967_v42 }
 0x2f9   :  { %v845_v52 = vsel %vm6238_vm10, %v838_v41, %v840_v1  ;;  %859 = vst.msk [vmem:[#allocation3 + $0x30] sm:$0xf] %vm700_vm7, %v840_v1  ;;  %v816_v41 = vmul.f32 %v804_v44, %v6171_v43  ;;  %v862_v1 = vld [vmem:[#allocation3 + $0x10] sm:$0xf] }
 0x2fa   :  { %858 = vst [vmem:[#allocation3 + $0x28] sm:$0xf] %v845_v52  ;;  %v978_v52 = vsub.f32 %v862_v1, %v965_v35  ;;  %v894_v28 = vsub.f32 %v862_v1, %v881_v46  ;;  %v962_v35 = vpop.permute.xlu1 %961 }
 0x2fb   :  { %v4579_v33 = vadd.f32 %v816_v41, %v4361_v55  ;;  %v4591_v55 = vadd.f32 %v815_v11, %v4343_v49  ;;  %v876_v49 = vpop.permute.xlu2 %875  ;;  %v968_v1 = vsel %vm963_vm14, %v960_v31, %v962_v35 }
 0x2fc   :  { %v883_v34 = vsel %vm879_vm13, %v874_v24, %v876_v49 }
 0x2fd   :  { %v896_v41 = vsub.f32 %v864_v0, %v883_v34 }
 0x2fe   :  { %1002 = vrot.lane.b32.xlu2 %v979_v57, %s4048_s23 }
 0x2ff   :  { %918 = vrot.lane.b32.xlu1 %v895_v19, %s4049_s24  ;;  %1085 = vrot.lane.b32.xlu0 %v4553_v18, %s4053_s15 }
 0x300   :  { %v878_v25 = vpop.permute.xlu0 %877  ;;  %v866_v57 = vld [vmem:[#allocation3 + $0x30] sm:$0xf] }
 0x301   :  { %v884_v44 = vsel %vm879_vm13, %v876_v49, %v878_v25  ;;  %v865_v19 = vld [vmem:[#allocation3 + $0x28] sm:$0xf]  ;;  %v898_v38 = vsub.f32 %v866_v57, %v878_v25 }
 0x302   :  { %v897_v46 = vsub.f32 %v865_v19, %v884_v44 }
 0x306   :  { %1051 = vrot.lane.b32.xlu2 %v4579_v33, %s4046_s0 }
 0x307   :  { %1000 = vrot.lane.b32.xlu1 %v978_v52, %s4048_s23  ;;  %916 = vrot.lane.b32.xlu0 %v894_v28, %s4049_s24  ;;  %v982_v52 = vsub.f32 %v866_v57, %v962_v35  ;;  %v981_v28 = vsub.f32 %v865_v19, %v968_v1 }
 0x30e   :  { %1089 = vrot.lane.b32.xlu2 %v4579_v33, %s4053_s15 }
 0x30f   :  { %1049 = vrot.lane.b32.xlu1 %v4591_v55, %s4046_s0  ;;  %1165 = vrot.lane.b32.xlu0 %v4579_v33, %s4051_s1 }
 0x316   :  { %1163 = vrot.lane.b32.xlu2 %v4591_v55, %s4051_s1 }
 0x317   :  { %1087 = vrot.lane.b32.xlu1 %v4591_v55, %s4053_s15  ;;  %1004 = vrot.lane.b32.xlu0 %v980_v2, %s4048_s23 }
 0x31e   :  { %920 = vrot.lane.b32.xlu2 %v896_v41, %s4049_s24 }
 0x31f   :  { %924 = vrot.lane.b32.xlu1 %v898_v38, %s4049_s24  ;;  %922 = vrot.lane.b32.xlu0 %v897_v46, %s4049_s24 }
 0x326   :  { %1008 = vrot.lane.b32.xlu2 %v982_v52, %s4048_s23 }
 0x327   :  { %1006 = vrot.lane.b32.xlu1 %v981_v28, %s4048_s23 }
 0x330   :  { %v1046_v24 = vpop.permute.xlu2 %1045 }
 0x338   :  { %v1084_v48 = vpop.permute.xlu2 %1083 }
 0x339   :  { %v1042_v11 = vpop.permute.xlu0 %1041  ;;  %v1156_v42 = vpop.permute.xlu1 %1155 }
 0x33a   :  { %1065 = vst.msk [vmem:[#allocation3] sm:$0xf] %vm693_vm3, %v1042_v11 }
 0x340   :  { %v1158_v0 = vpop.permute.xlu2 %1157 }
 0x341   :  { %v1072_v2 = vld [vmem:[#allocation3] sm:$0xf]  ;;  %v1080_v25 = vpop.permute.xlu0 %1079  ;;  %v1044_v49 = vpop.permute.xlu1 %1043 }
 0x342   :  { %1464 = vst.msk [vmem:[#allocation3] sm:$0xff] %vm1463_vm12, %v4368_v56  ;;  %v1179_v31 = vsub.f32 %v1072_v2, %v1156_v42  ;;  %v1103_v34 = vsub.f32 %v1072_v2, %v1080_v25  ;;  %v1053_v57 = vsel %vm6238_vm10, %v1042_v11, %v1044_v49  ;;  %v1054_v44 = vsel %vm6238_vm10, %v1044_v49, %v1046_v24 }
 0x343   :  { %1066 = vst [vmem:[#allocation3 + $0x8] sm:$0xf] %v1053_v57 }
 0x344   :  { %1067 = vst [vmem:[#allocation3 + $0x10] sm:$0xf] %v1054_v44  ;;  %1117 = vrot.lane.b32.xlu0 %v1103_v34, %s4049_s24  ;;  %1193 = vrot.lane.b32.xlu1 %v1179_v31, %s4048_s23  ;;  %v1167_v34 = vsel %vm963_vm14, %v1156_v42, %v1158_v0 }
 0x348   :  { %v997_v19 = vpop.permute.xlu2 %996 }
 0x349   :  { %v1160_v41 = vpop.permute.xlu0 %1159  ;;  %v1082_v38 = vpop.permute.xlu1 %1081 }
 0x34a   :  { %v1168_v46 = vsel %vm963_vm14, %v1158_v0, %v1160_v41  ;;  %v1091_v35 = vsel %vm879_vm13, %v1080_v25, %v1082_v38  ;;  %v1092_v1 = vsel %vm879_vm13, %v1082_v38, %v1084_v48  ;;  %v1073_v52 = vld [vmem:[#allocation3 + $0x8] sm:$0xf] }
 0x34b   :  { %v1074_v28 = vld [vmem:[#allocation3 + $0x10] sm:$0xf]  ;;  %v1104_v11 = vsub.f32 %v1073_v52, %v1091_v35  ;;  %v1180_v57 = vsub.f32 %v1073_v52, %v1167_v34 }
 0x34c   :  { %v1181_v2 = vsub.f32 %v1074_v28, %v1168_v46  ;;  %v1105_v49 = vsub.f32 %v1074_v28, %v1092_v1 }
 0x34d   :  { %1119 = vrot.lane.b32.xlu1 %v1104_v11, %s4049_s24 }
 0x34e   :  { %1197 = vrot.lane.b32.xlu0 %v1181_v2, %s4048_s23  ;;  %1121 = vrot.lane.b32.xlu2 %v1105_v49, %s4049_s24 }
 0x350   :  { %v915_v31 = vpop.permute.xlu2 %914 }
 0x351   :  { %v999_v38 = vpop.permute.xlu0 %998  ;;  %v913_v43 = vpop.permute.xlu1 %912 }
 0x352   :  { %v927_v26 = vsel %vm498_vm0, %v913_v43, %v915_v31 }
 0x356   :  { %1195 = vrot.lane.b32.xlu2 %v1180_v57, %s4048_s23 }
 0x358   :  { %v4629_v25 = vpop.permute.xlu2 %1002 }
 0x360   :  { %v1052_v44 = vpop.permute.xlu2 %1051 }
 0x361   :  { %1071 = vst.msk [vmem:[#allocation3 + $0x30] sm:$0xf] %vm700_vm7, %v1052_v44  ;;  %vm6326_vm7 = vcmask 97280  }
 0x368   :  { %v4632_v46 = vpop.permute.xlu2 %1089 }
 0x369   :  { %v1048_v35 = vpop.permute.xlu0 %1047  ;;  %v4634_v1 = vpop.permute.xlu1 %1161 }
 0x36a   :  { %v1055_v28 = vsel %vm6238_vm10, %v1046_v24, %v1048_v35  ;;  %v1169_v52 = vsel %vm963_vm14, %v1160_v41, %v4634_v1  ;;  %v4649_v24 = vperm.slane %v4372_v58, 2  ;;  %v4656_v41 = vperm.slane %v4413_v27, 2 }
 0x36b   :  { %1068 = vst [vmem:[#allocation3 + $0x18] sm:$0xf] %v1055_v28  ;;  %v1011_v28 = vsel %vm378_vm15, %v997_v19, %v999_v38 }
 0x36c   :  { %6281 = vst [vmem:[#allocation28_spill] sm:$0xff] %v4649_v24  ;;  %v1023_v19 = vmul.f32 %v1011_v28, %v4646_v50  ;;  %v939_v43 = vmul.f32 %v927_v26, %v4649_v24 }
 0x36d   :  { %6282 = vst [vmem:[#allocation29_spill] sm:$0xff] %v4656_v41 }
 0x36e   :  { %v945_v59 = vadd.f32 %v939_v43, %v4379_v9 }
 0x370   :  { %v4637_v11 = vpop.permute.xlu2 %1163 }
 0x371   :  { %v4639_v42 = vpop.permute.xlu0 %1085  ;;  %v919_v0 = vpop.permute.xlu1 %918 }
 0x372   :  { %v1093_v2 = vsel %vm879_vm13, %v1084_v48, %v4639_v42  ;;  %v1075_v49 = vld [vmem:[#allocation3 + $0x18] sm:$0xf]  ;;  %v4659_v48 = vperm.slane %v4391_v29, 2 }
 0x373   :  { %v1106_v34 = vsub.f32 %v1075_v49, %v1093_v2  ;;  %v1182_v57 = vsub.f32 %v1075_v49, %v1169_v52  ;;  %v4662_v52 = vperm.slane %v4416_v32, 2  ;;  %v4665_v2 = vperm.slane %v4391_v29, 3  ;;  %v1078_v49 = vld [vmem:[#allocation3 + $0x30] sm:$0xf] }
 0x374   :  { %6283 = vst [vmem:[#allocation30_spill] sm:$0xff] %v4659_v48  ;;  %v1109_v28 = vsub.f32 %v1078_v49, %v4632_v46  ;;  %v1029_v29 = vadd.f32 %v1023_v19, %v4379_v9 }
 0x375   :  { %1123 = vrot.lane.b32.xlu0 %v1106_v34, %s4049_s24  ;;  %1199 = vrot.lane.b32.xlu1 %v1182_v57, %s4048_s23  ;;  %6284 = vst [vmem:[#allocation31_spill] sm:$0xff] %v4662_v52 }
 0x376   :  { %6285 = vst [vmem:[#allocation32_spill] sm:$0xff] %v4665_v2 }
 0x378   :  { %v4669_v34 = vpop.permute.xlu2 %920 }
 0x379   :  { %v930_v57 = vsel %vm498_vm0, %v919_v0, %v4669_v34  ;;  %v917_v21 = vpop.permute.xlu0 %916  ;;  %v1001_v40 = vpop.permute.xlu1 %1000 }
 0x37a   :  { %v942_v61 = vmul.f32 %v930_v57, %v4656_v41  ;;  %v928_v10 = vsel %vm498_vm0, %v915_v31, %v917_v21  ;;  %v929_v5 = vsel %vm498_vm0, %v917_v21, %v919_v0  ;;  %v1012_v63 = vsel %vm378_vm15, %v999_v38, %v1001_v40 }
 0x37b   :  { %v940_v26 = vmul.f32 %v928_v10, %v4659_v48  ;;  %v941_v60 = vmul.f32 %v929_v5, %v4662_v52  ;;  %v1024_v62 = vmul.f32 %v1012_v63, %v4665_v2  ;;  %v1433_v5 = vrot.slane %v4272_v7, 4 }
 0x37c   :  { %v948_v0 = vadd.f32 %v942_v61, %v4438_v22  ;;  %v1434_v63 = vrot.slane %v4282_v13, 4  ;;  %v4698_v61 = vperm.slane %v4416_v32, 3 }
 0x37d   :  { %1129 = vrot.lane.b32.xlu0 %v1109_v28, %s4049_s24  ;;  %v946_v31 = vadd.f32 %v940_v26, %v4401_v39  ;;  %v1030_v21 = vadd.f32 %v1024_v62, %v4401_v39  ;;  %v947_v38 = vadd.f32 %v941_v60, %v4435_v20 }
 0x37e   :  { %6286 = vst [vmem:[#allocation33_spill] sm:$0xff] %v4698_v61 }
 0x37f   :  { %v1231_v57 = vpack.c.bf16 %v946_v31, %v945_v59  ;;  %v1321_v10 = vpack.c.bf16 %v1030_v21, %v1029_v29  ;;  %v1232_v58 = vpack.c.bf16 %v948_v0, %v947_v38  ;;  %v4695_v59 = vsel %vm123_vm9, %v1433_v5, %v1434_v63 }
 0x380   :  { %v4705_v29 = vperm.slane %v4413_v27, 3  ;;  %v1437_v63 = vrot.slane %v4284_v14, 4 }
 0x381   :  { %v1166_v43 = vpop.permute.xlu0 %1165  ;;  %v1050_v56 = vpop.permute.xlu1 %1049  ;;  %v1265_v9 = vrot.slane %v1231_v57, 6  ;;  %v1355_v62 = vrot.slane %v1321_v10, 6  ;;  %v1266_v60 = vrot.slane %v1232_v58, 6  ;;  %v4725_v10 = vperm.slane %v4463_v45, 2 }
 0x382   :  { %v1185_v19 = vsub.f32 %v1078_v49, %v1166_v43  ;;  %v1056_v28 = vsel %vm6238_vm10, %v1048_v35, %v1050_v56  ;;  %v1057_v26 = vsel %vm6238_vm10, %v1050_v56, %v1052_v44  ;;  %v1013_v56 = vsel %vm378_vm15, %v1001_v40, %v4629_v25  ;;  %6287 = vst [vmem:[#allocation34_spill] sm:$0xff] %v4705_v29 }
 0x383   :  { %1069 = vst [vmem:[#allocation3 + $0x20] sm:$0xf] %v1056_v28  ;;  %1268 = vrot.lane.b32.xlu2 %v1265_v9, %s4046_s0  ;;  %v1025_v58 = vmul.f32 %v1013_v56, %v4698_v61 }
 0x384   :  { %1070 = vst [vmem:[#allocation3 + $0x28] sm:$0xf] %v1057_v26  ;;  %1205 = vrot.lane.b32.xlu1 %v1185_v19, %s4048_s23 }
 0x385   :  { %1318 = vst [vmem:[#allocation4 + $0x1c] sm:$0xcc] %v1265_v9  ;;  %1447 = vrot.lane.b32.xlu0 %v4695_v59, %s4046_s0  ;;  %v1031_v38 = vadd.f32 %v1025_v58, %v4435_v20  ;;  %v1436_v20 = vrot.slane %v4274_v8, 4 }
 0x386   :  { %1405 = vst [vmem:[#allocation4 + $0x54] sm:$0xcc] %v1355_v62 }
 0x387   :  { %1319 = vst [vmem:[#allocation4 + $0x24] sm:$0xcc] %v1266_v60 }
 0x388   :  { %6289 = vst [vmem:[#allocation36_spill] sm:$0xff] %v4725_v10 }
 0x389   :  { %v1005_v39 = vpop.permute.xlu0 %1004  ;;  %v1088_v44 = vpop.permute.xlu1 %1087 }
 0x38a   :  { %v1014_v35 = vsel %vm378_vm15, %v4629_v25, %v1005_v39  ;;  %v1094_v49 = vsel %vm879_vm13, %v4639_v42, %v1088_v44  ;;  %v1076_v31 = vld [vmem:[#allocation3 + $0x20] sm:$0xf]  ;;  %v1095_v25 = vsel %vm879_vm13, %v1088_v44, %v4632_v46  ;;  %v4722_v42 = vperm.slane %v4447_v30, 2 }
 0x38b   :  { %v1026_v21 = vmul.f32 %v1014_v35, %v4705_v29  ;;  %1358 = vrot.lane.b32.xlu2 %v1355_v62, %s4046_s0  ;;  %v1107_v40 = vsub.f32 %v1076_v31, %v1094_v49  ;;  %v1077_v57 = vld [vmem:[#allocation3 + $0x28] sm:$0xf]  ;;  %v4738_v35 = vsel %vm123_vm9, %v1436_v20, %v1437_v63 }
 0x38c   :  { %6288 = vst [vmem:[#allocation35_spill] sm:$0xff] %v4722_v42  ;;  %v1108_v28 = vsub.f32 %v1077_v57, %v1095_v25  ;;  %v1009_v25 = vpop.permute.xlu2 %1008 }
 0x38d   :  { %1528 = vrot.lane.b32.xlu0 %v4259_v3, %s4045_s21  ;;  %1125 = vrot.lane.b32.xlu1 %v1107_v40, %s4049_s24  ;;  %v1032_v0 = vadd.f32 %v1026_v21, %v4438_v22  ;;  %v1171_v22 = vsel %vm963_vm14, %v4637_v11, %v1166_v43  ;;  %v1431_v43 = vrot.slane %v4280_v12, 4  ;;  %v4747_v21 = vperm.slane %v4447_v30, 3 }
 0x38e   :  { %v1184_v44 = vsub.f32 %v1077_v57, %v1171_v22  ;;  %v4750_v40 = vperm.slane %v4463_v45, 3 }
 0x38f   :  { %v1322_v5 = vpack.c.bf16 %v1032_v0, %v1031_v38  ;;  %6290 = vst [vmem:[#allocation37_spill] sm:$0xff] %v4747_v21  ;;  %v1430_v0 = vrot.slane %v4270_v6, 4 }
 0x390   :  { %6291 = vst [vmem:[#allocation38_spill] sm:$0xff] %v4750_v40 }
 0x391   :  { %v923_v9 = vpop.permute.xlu0 %922  ;;  %v925_v19 = vpop.permute.xlu1 %924  ;;  %v1356_v26 = vrot.slane %v1322_v5, 6 }
 0x392   :  { %v931_v46 = vsel %vm498_vm0, %v4669_v34, %v923_v9  ;;  %v932_v62 = vsel %vm498_vm0, %v923_v9, %v925_v19  ;;  %v4756_v19 = vsel %vm123_vm9, %v1430_v0, %v1431_v43 }
 0x393   :  { %v943_v56 = vmul.f32 %v931_v46, %v4722_v42  ;;  %v944_v58 = vmul.f32 %v932_v62, %v4725_v10  ;;  %1127 = vrot.lane.b32.xlu2 %v1108_v28, %s4049_s24  ;;  %1406 = vst [vmem:[#allocation4 + $0x5c] sm:$0xcc] %v1356_v26  ;;  %v1170_v62 = vsel %vm963_vm14, %v4634_v1, %v4637_v11 }
 0x395   :  { %v950_v49 = vadd.f32 %v944_v58, %v4481_v54  ;;  %1203 = vrot.lane.b32.xlu0 %v1184_v44, %s4048_s23  ;;  %1449 = vrot.lane.b32.xlu1 %v4738_v35, %s4046_s0  ;;  %v949_v34 = vadd.f32 %v943_v56, %v4466_v47  ;;  %v1183_v56 = vsub.f32 %v1076_v31, %v1170_v62 }
 0x397   :  { %v1233_v38 = vpack.c.bf16 %v950_v49, %v949_v34 }
 0x399   :  { %v1007_v57 = vpop.permute.xlu1 %1006  ;;  %v1267_v5 = vrot.slane %v1233_v38, 6 }
 0x39a   :  { %v1015_v63 = vsel %vm378_vm15, %v1005_v39, %v1007_v57  ;;  %v1016_v9 = vsel %vm378_vm15, %v1007_v57, %v1009_v25 }
 0x39b   :  { %v1027_v28 = vmul.f32 %v1015_v63, %v4747_v21  ;;  %v1028_v20 = vmul.f32 %v1016_v9, %v4750_v40  ;;  %1445 = vrot.lane.b32.xlu2 %v4756_v19, %s4046_s0  ;;  %1320 = vst [vmem:[#allocation4 + $0x2c] sm:$0xcc] %v1267_v5 }
 0x39d   :  { %1270 = vrot.lane.b32.xlu0 %v1266_v60, %s4046_s0  ;;  %1530 = vrot.lane.b32.xlu1 %v4287_v15, %s4045_s21  ;;  %v1033_v39 = vadd.f32 %v1027_v28, %v4466_v47  ;;  %v1034_v22 = vadd.f32 %v1028_v20, %v4481_v54 }
 0x39f   :  { %v1323_v46 = vpack.c.bf16 %v1034_v22, %v1033_v39 }
 0x3a1   :  { %v1357_v58 = vrot.slane %v1323_v46, 6 }
 0x3a3   :  { %1201 = vrot.lane.b32.xlu2 %v1183_v56, %s4048_s23  ;;  %1407 = vst [vmem:[#allocation4 + $0x64] sm:$0xcc] %v1357_v58 }
 0x3a5   :  { %1360 = vrot.lane.b32.xlu0 %v1356_v26, %s4046_s0  ;;  %1272 = vrot.lane.b32.xlu1 %v1267_v5, %s4046_s0 }
 0x3a8   :  { %v1122_v54 = vpop.permute.xlu2 %1121 }
 0x3ab   :  { %1526 = vrot.lane.b32.xlu2 %v4262_v4, %s4045_s21 }
 0x3ad   :  { %1362 = vrot.lane.b32.xlu1 %v1357_v58, %s4046_s0 }
 0x3b0   :  { %v1196_v0 = vpop.permute.xlu2 %1195 }
 0x3b6   :  { %v1194_v47 = vpop.permute.xlu1 %1193  ;;  %v1118_v60 = vpop.permute.xlu0 %1117 }
 0x3b7   :  { %v1207_v57 = vsel %vm378_vm15, %v1194_v47, %v1196_v0 }
 0x3b8   :  { %v1219_v63 = vmul.f32 %v1207_v57, %v4646_v50 }
 0x3ba   :  { %v1225_v28 = vadd.f32 %v1219_v63, %v4497_v36 }
 0x3bf   :  { %v1120_v44 = vpop.permute.xlu1 %1119 }
 0x3c0   :  { %v1131_v1 = vsel %vm498_vm0, %v1118_v60, %v1120_v44  ;;  %v1132_v11 = vsel %vm498_vm0, %v1120_v44, %v1122_v54  ;;  %v4783_v38 = vpop.permute.xlu0 %1197 }
 0x3c1   :  { %v1143_v31 = vmul.f32 %v1131_v1, %v4649_v24  ;;  %v1144_v49 = vmul.f32 %v1132_v11, %v4659_v48  ;;  %v1208_v25 = vsel %vm378_vm15, %v1196_v0, %v4783_v38 }
 0x3c2   :  { %v1220_v5 = vmul.f32 %v1208_v25, %v4665_v2 }
 0x3c3   :  { %v1149_v26 = vadd.f32 %v1143_v31, %v4497_v36  ;;  %v1150_v34 = vadd.f32 %v1144_v49, %v4513_v51 }
 0x3c4   :  { %v1226_v9 = vadd.f32 %v1220_v5, %v4513_v51 }
 0x3c5   :  { %v1234_v43 = vpack.c.bf16 %v1150_v34, %v1149_v26 }
 0x3c6   :  { %v1324_v39 = vpack.c.bf16 %v1226_v9, %v1225_v28 }
 0x3c7   :  { %1240 = vrot.lane.b32.xlu2 %v1234_v43, %s4045_s21 }
 0x3cf   :  { %1290 = vrot.lane.b32.xlu2 %v1234_v43, %s4046_s0 }
 0x3d7   :  { %1532 = vrot.lane.b32.xlu2 %v4756_v19, %s4045_s21 }
 0x3dd   :  { %v1269_v20 = vpop.permute.xlu2 %1268 }
 0x3de   :  { %v1274_v22 = vrot.slane %v1269_v20, 4 }
 0x3df   :  { %1330 = vrot.lane.b32.xlu2 %v1324_v39, %s4045_s21 }
 0x3e0   :  { %v1277_v46 = vsel %vm6238_vm10, %v1274_v22, %v1269_v20 }
 0x3e1   :  { %1286 = vst.msk [vmem:[#allocation4] sm:$0xcc] %vm4138_vm11, %v1277_v46 }
 0x3e5   :  { %v4799_v62 = vpop.permute.xlu2 %1358 }
 0x3e6   :  { %v1364_v56 = vrot.slane %v4799_v62, 4 }
 0x3e7   :  { %v1124_v58 = vpop.permute.xlu0 %1123  ;;  %1380 = vrot.lane.b32.xlu2 %v1324_v39, %s4046_s0  ;;  %v1200_v47 = vpop.permute.xlu1 %1199  ;;  %v4827_v39 = vld [vmem:[#allocation3] sm:$0xff] }
 0x3e8   :  { %v1367_v36 = vsel %vm6238_vm10, %v1364_v56, %v4799_v62  ;;  %v1133_v31 = vsel %vm498_vm0, %v1122_v54, %v1124_v58 }
 0x3e9   :  { %1376 = vst.msk [vmem:[#allocation4 + $0x38] sm:$0xcc] %vm4138_vm11, %v1367_v36  ;;  %v1145_v34 = vmul.f32 %v1133_v31, %v4662_v52 }
 0x3eb   :  { %v1151_v28 = vadd.f32 %v1145_v34, %v4526_v53 }
 0x3ed   :  { %v1128_v51 = vpop.permute.xlu2 %1127 }
 0x3ef   :  { %v1130_v60 = vpop.permute.xlu0 %1129 }
 0x3f0   :  { %v1136_v49 = vsel %vm498_vm0, %v1128_v51, %v1130_v60 }
 0x3f1   :  { %v1148_v43 = vmul.f32 %v1136_v49, %v4725_v10 }
 0x3f3   :  { %v1154_v54 = vadd.f32 %v1148_v43, %v4579_v33 }
 0x3f5   :  { %v4809_v44 = vpop.permute.xlu2 %1445 }
 0x3f6   :  { %v1206_v1 = vpop.permute.xlu1 %1205 }
 0x3f7   :  { %v4811_v11 = vpop.permute.xlu0 %1447 }
 0x3fd   :  { %v1202_v26 = vpop.permute.xlu2 %1201 }
 0x3ff   :  { %v4817_v0 = vpop.permute.xlu0 %1528  ;;  %v1126_v23 = vpop.permute.xlu1 %1125 }
 0x400   :  { %v1134_v25 = vsel %vm498_vm0, %v1124_v58, %v1126_v23  ;;  %v1135_v57 = vsel %vm498_vm0, %v1126_v23, %v1128_v51  ;;  %v1210_v23 = vsel %vm378_vm15, %v1200_v47, %v1202_v26 }
 0x401   :  { %v1146_v5 = vmul.f32 %v1134_v25, %v4656_v41  ;;  %v1147_v63 = vmul.f32 %v1135_v57, %v4722_v42 }
 0x403   :  { %v1153_v9 = vadd.f32 %v1147_v63, %v4591_v55  ;;  %v1152_v20 = vadd.f32 %v1146_v5, %v4553_v18 }
 0x405   :  { %v4829_v46 = vpop.permute.xlu2 %1526  ;;  %v1236_v36 = vpack.c.bf16 %v1154_v54, %v1153_v9  ;;  %v1235_v58 = vpack.c.bf16 %v1152_v20, %v1151_v28  ;;  %v1209_v54 = vsel %vm378_vm15, %v4783_v38, %v1200_v47  ;;  %v1222_v9 = vmul.f32 %v1210_v23, %v4705_v29 }
 0x406   :  { %v1550_v51 = vsub.f32 %v4827_v39, %v4829_v46  ;;  %v6315_v29 = vperm.slane %v4447_v30, 0 }
 0x407   :  { %v1204_v60 = vpop.permute.xlu0 %1203  ;;  %1244 = vrot.lane.b32.xlu1 %v1236_v36, %s4045_s21  ;;  %1242 = vrot.lane.b32.xlu0 %v1235_v58, %s4045_s21  ;;  %v4835_v31 = vpop.permute.xlu1 %1449 }
 0x408   :  { %1470 = vst.msk [vmem:[#allocation3 + $0x30] sm:$0xff] %vm6238_vm10, %v4835_v31  ;;  %1564 = vrot.lane.b32.xlu2 %v1550_v51, %s4052_s14  ;;  %v1211_v25 = vsel %vm378_vm15, %v1202_v26, %v1204_v60  ;;  %v1212_v57 = vsel %vm378_vm15, %v1204_v60, %v1206_v1  ;;  %v1228_v60 = vadd.f32 %v1222_v9, %v4553_v18 }
 0x409   :  { %v1223_v28 = vmul.f32 %v1211_v25, %v4747_v21  ;;  %v1224_v20 = vmul.f32 %v1212_v57, %v4750_v40 }
 0x40b   :  { %v1229_v38 = vadd.f32 %v1223_v28, %v4591_v55  ;;  %v1230_v47 = vadd.f32 %v1224_v20, %v4579_v33 }
 0x40d   :  { %v1326_v55 = vpack.c.bf16 %v1230_v47, %v1229_v38 }
 0x40f   :  { %v1271_v49 = vpop.permute.xlu0 %1270  ;;  %1536 = vrot.lane.b32.xlu1 %v4738_v35, %s4045_s21  ;;  %1292 = vrot.lane.b32.xlu0 %v1235_v58, %s4046_s0  ;;  %v4843_v34 = vpop.permute.xlu1 %1530  ;;  %v1221_v58 = vmul.f32 %v1209_v54, %v4698_v61  ;;  %v4881_v54 = vsel %vm6238_vm10, %v4383_v16, %v4385_v37 }
 0x410   :  { %v1275_v43 = vrot.slane %v1271_v49, 4 }
 0x411   :  { %v1227_v57 = vadd.f32 %v1221_v58, %v4526_v53  ;;  %v1538_v58 = vsel %vm71_vm5, %v4829_v46, %v4817_v0  ;;  %v4911_v46 = vsel %vm6238_vm10, %v4385_v37, %v4809_v44 }
 0x412   :  { %v1278_v5 = vsel %vm123_vm9, %v1274_v22, %v1275_v43 }
 0x413   :  { %v1279_v63 = vsel %vm6238_vm10, %v1278_v5, %v1271_v49  ;;  %v1325_v33 = vpack.c.bf16 %v1228_v60, %v1227_v57 }
 0x414   :  { %1287 = vst [vmem:[#allocation4 + $0x8] sm:$0xcc] %v1279_v63 }
 0x417   :  { %v1361_v51 = vpop.permute.xlu0 %1360  ;;  %1294 = vrot.lane.b32.xlu1 %v1236_v36, %s4046_s0  ;;  %1534 = vrot.lane.b32.xlu0 %v4695_v59, %s4045_s21  ;;  %v1273_v22 = vpop.permute.xlu1 %1272 }
 0x418   :  { %v1365_v1 = vrot.slane %v1361_v51, 4  ;;  %v1276_v26 = vrot.slane %v1273_v22, 4 }
 0x41a   :  { %v1368_v49 = vsel %vm123_vm9, %v1364_v56, %v1365_v1  ;;  %v1280_v23 = vsel %vm123_vm9, %v1275_v43, %v1276_v26  ;;  %1289 = vst.msk [vmem:[#allocation4 + $0x18] sm:$0xc] %vm175_vm2, %v1276_v26  ;;  %v1539_v43 = vsel %vm71_vm5, %v4817_v0, %v4843_v34 }
 0x41b   :  { %v1369_v36 = vsel %vm6238_vm10, %v1368_v49, %v1361_v51  ;;  %v1281_v25 = vsel %vm6238_vm10, %v1280_v23, %v1273_v22  ;;  %v1552_v28 = vsub.f32 %v4881_v54, %v1539_v43  ;;  %v4940_v51 = vsel %vm6238_vm10, %v4809_v44, %v4811_v11 }
 0x41c   :  { %1377 = vst [vmem:[#allocation4 + $0x40] sm:$0xcc] %v1369_v36 }
 0x41d   :  { %1288 = vst [vmem:[#allocation4 + $0x10] sm:$0xcc] %v1281_v25 }
 0x41f   :  { %1334 = vrot.lane.b32.xlu1 %v1326_v55, %s4045_s21  ;;  %1332 = vrot.lane.b32.xlu0 %v1325_v33, %s4045_s21  ;;  %v1363_v18 = vpop.permute.xlu1 %1362 }
 0x420   :  { %v1366_v62 = vrot.slane %v1363_v18, 4 }
 0x421   :  { %v1241_v56 = vpop.permute.xlu2 %1240 }
 0x422   :  { %v1370_v5 = vsel %vm123_vm9, %v1365_v1, %v1366_v62  ;;  %1379 = vst.msk [vmem:[#allocation4 + $0x50] sm:$0xc] %vm175_vm2, %v1366_v62  ;;  %v1246_v53 = vrot.slane %v1241_v56, 4  ;;  %vm1308_vm2 = vcmask 1041552   ;;  %v6294_v1 = vld [vmem:[#allocation23_spill] sm:$0xff] }
 0x423   :  { %v1371_v63 = vsel %vm6238_vm10, %v1370_v5, %v1363_v18  ;;  %vm4893_vm11 = vmor %vm133_vm4, %vm1308_vm2  ;;  %v4900_v26 = vsel %vm6238_vm10, %v6294_v1, %v4383_v16  ;;  %vm1313_vm4 = vcmask 140288  }
 0x424   :  { %1378 = vst [vmem:[#allocation4 + $0x48] sm:$0xcc] %v1371_v63  ;;  %v1249_v9 = vsel %vm71_vm5, %v1246_v53, %v1241_v56  ;;  %v1551_v47 = vsub.f32 %v4900_v26, %v1538_v58  ;;  %v1477_v63 = vld [vmem:[#allocation3 + $0x30] sm:$0xff]  ;;  %vm6327_vm2 = vmmov %vm6326_vm7 }
 0x425   :  { %1258 = vst.msk [vmem:[#allocation4] sm:$0x33] %vm4131_vm6, %v1249_v9 }
 0x427   :  { %1382 = vrot.lane.b32.xlu0 %v1325_v33, %s4046_s0  ;;  %1568 = vrot.lane.b32.xlu1 %v1552_v28, %s4052_s14 }
 0x429   :  { %v1291_v20 = vpop.permute.xlu2 %1290 }
 0x42a   :  { %v1296_v22 = vrot.slane %v1291_v20, 4 }
 0x42b   :  { %v3906_v41 = vld [vmem:[#allocation4 + $0x48] sm:$0xc] }
 0x42c   :  { %v1299_v38 = vsel %vm6238_vm10, %v1296_v22, %v1291_v20 }
 0x42d   :  { %1310 = vst.msk [vmem:[#allocation4 + $0x1c] sm:$0x33] %vm4893_vm11, %v1299_v38 }
 0x42f   :  { %1566 = vrot.lane.b32.xlu0 %v1551_v47, %s4052_s14  ;;  %1384 = vrot.lane.b32.xlu1 %v1326_v55, %s4046_s0  ;;  %v4945_v47 = vsel %vm6238_vm10, %v4811_v11, %v4835_v31 }
 0x431   :  { %v1533_v0 = vpop.permute.xlu2 %1532 }
 0x432   :  { %v1540_v16 = vsel %vm71_vm5, %v4843_v34, %v1533_v0 }
 0x433   :  { %v1553_v60 = vsub.f32 %v4911_v46, %v1540_v16 }
 0x435   :  { %1570 = vrot.lane.b32.xlu2 %v1553_v60, %s4052_s14 }
 0x439   :  { %v1331_v49 = vpop.permute.xlu2 %1330 }
 0x43a   :  { %v1336_v23 = vrot.slane %v1331_v49, 4 }
 0x43c   :  { %v1339_v36 = vsel %vm71_vm5, %v1336_v23, %v1331_v49 }
 0x43d   :  { %1348 = vst.msk [vmem:[#allocation4 + $0x38] sm:$0x33] %vm4131_vm6, %v1339_v36  ;;  %vm6324_vm6 = vcmask 1045504  }
 0x43e   :  { %vm6325_vm3 = vmmov %vm6324_vm6 }
 0x441   :  { %v4920_v25 = vpop.permute.xlu2 %1380 }
 0x442   :  { %v1386_v57 = vrot.slane %v4920_v25, 4 }
 0x444   :  { %v1389_v37 = vsel %vm6238_vm10, %v1386_v57, %v4920_v25 }
 0x445   :  { %1398 = vst.msk [vmem:[#allocation4 + $0x54] sm:$0x33] %vm4893_vm11, %v1389_v37 }
 0x479   :  { %v1243_v34 = vpop.permute.xlu0 %1242  ;;  %v1245_v55 = vpop.permute.xlu1 %1244 }
 0x47a   :  { %v1247_v33 = vrot.slane %v1243_v34, 4  ;;  %v1248_v18 = vrot.slane %v1245_v55, 4 }
 0x47c   :  { %v1250_v62 = vsel %vm123_vm9, %v1246_v53, %v1247_v33  ;;  %v1252_v17 = vsel %vm123_vm9, %v1247_v33, %v1248_v18  ;;  %1261 = vst.msk [vmem:[#allocation4 + $0x18] sm:$0x3] %vm63_vm1, %v1248_v18 }
 0x47d   :  { %v1251_v56 = vsel %vm71_vm5, %v1250_v62, %v1243_v34  ;;  %v1253_v43 = vsel %vm71_vm5, %v1252_v17, %v1245_v55  ;;  %v3946_v34 = vld [vmem:[#allocation4 + $0x18] sm:$0x30]  ;;  %v3761_v55 = vld [vmem:[#allocation4 + $0x1c] sm:$0x30]  ;;  %v1484_v62 = vsub.f32 %v4827_v39, %v4262_v4  ;;  %v6295_v39 = vld [vmem:[#allocation24_spill] sm:$0xff] }
 0x47e   :  { %1259 = vst [vmem:[#allocation4 + $0x8] sm:$0x33] %v1251_v56  ;;  %v3950_v4 = vld [vmem:[#allocation4 + $0x3c] sm:$0xf] }
 0x47f   :  { %1260 = vst [vmem:[#allocation4 + $0x10] sm:$0x33] %v1253_v43  ;;  %v3759_v43 = vld [vmem:[#allocation4] sm:$0xf] }
 0x481   :  { %v1293_v5 = vpop.permute.xlu0 %1292  ;;  %v1537_v9 = vpop.permute.xlu1 %1536 }
 0x482   :  { %v1297_v28 = vrot.slane %v1293_v5, 4  ;;  %v1556_v20 = vsub.f32 %v1477_v63, %v1537_v9  ;;  %v4962_v63 = vor.u32 %v3946_v34, %v3759_v43 }
 0x483   :  { %v3783_v34 = vld [vmem:[#allocation4 + $0x18] sm:$0xf] }
 0x484   :  { %v1300_v58 = vsel %vm123_vm9, %v1296_v22, %v1297_v28  ;;  %1576 = vrot.lane.b32.xlu2 %v1556_v20, %s4052_s14 }
 0x485   :  { %v1301_v53 = vsel %vm6238_vm10, %v1300_v58, %v1293_v5  ;;  %v3767_v11 = vld [vmem:[#allocation4 + $0x8] sm:$0xf]  ;;  %v3943_v5 = vld [vmem:[#allocation4 + $0x4] sm:$0xf] }
 0x486   :  { %1311 = vst [vmem:[#allocation4 + $0x24] sm:$0x33] %v1301_v53  ;;  %v3945_v43 = vld [vmem:[#allocation4 + $0x14] sm:$0xf] }
 0x489   :  { %v1535_v1 = vpop.permute.xlu0 %1534  ;;  %v1295_v38 = vpop.permute.xlu1 %1294 }
 0x48a   :  { %v1541_v22 = vsel %vm71_vm5, %v1533_v0, %v1535_v1  ;;  %v1542_v16 = vsel %vm71_vm5, %v1535_v1, %v1537_v9  ;;  %v1298_v60 = vrot.slane %v1295_v38, 4  ;;  %v4964_v9 = vor.u32 %v3943_v5, %v3761_v55  ;;  %v6299_v5 = vld [vmem:[#allocation11_spill] sm:$0xff] }
 0x48b   :  { %v1554_v49 = vsub.f32 %v4940_v51, %v1541_v22  ;;  %v1555_v36 = vsub.f32 %v4945_v47, %v1542_v16  ;;  %v1485_v16 = vsub.f32 %v4900_v26, %v4259_v3 }
 0x48c   :  { %v1302_v44 = vsel %vm123_vm9, %v1297_v28, %v1298_v60  ;;  %1314 = vst.msk [vmem:[#allocation4 + $0x34] sm:$0x3] %vm1313_vm4, %v1298_v60  ;;  %v3801_v28 = vld [vmem:[#allocation4 + $0x54] sm:$0x30]  ;;  %v3953_v60 = vld [vmem:[#allocation4 + $0x50] sm:$0x30] }
 0x48d   :  { %v1303_v37 = vsel %vm6238_vm10, %v1302_v44, %v1295_v38  ;;  %1572 = vrot.lane.b32.xlu0 %v1554_v49, %s4052_s14  ;;  %1574 = vrot.lane.b32.xlu1 %v1555_v36, %s4052_s14  ;;  %v3947_v31 = vld [vmem:[#allocation4 + $0x20] sm:$0x30]  ;;  %v6296_v38 = vperm.slane %v6295_v39, 0 }
 0x48e   :  { %1312 = vst [vmem:[#allocation4 + $0x2c] sm:$0x33] %v1303_v37  ;;  %v4956_v0 = vor.u32 %v3947_v31, %v3767_v11  ;;  %v3799_v31 = vld [vmem:[#allocation4 + $0x38] sm:$0xf] }
 0x48f   :  { %v1490_v22 = vmul.f32 %v1484_v62, %v6296_v38  ;;  %v4985_v55 = vor.u32 %v3953_v60, %v3799_v31  ;;  %v6297_v62 = vld [vmem:[#allocation25_spill] sm:$0xff] }
 0x490   :  { %1682 = vrot.lane.b32.xlu2 %v4956_v0, %s4047_s22  ;;  %v3775_v60 = vld [vmem:[#allocation4 + $0x10] sm:$0xf] }
 0x491   :  { %v1333_v33 = vpop.permute.xlu0 %1332  ;;  %v1335_v18 = vpop.permute.xlu1 %1334  ;;  %v1502_v37 = vrot.slane %v1490_v22, 4 }
 0x492   :  { %v1337_v17 = vrot.slane %v1333_v33, 4  ;;  %v1338_v56 = vrot.slane %v1335_v18, 4 }
 0x493   :  { %v3949_v49 = vld [vmem:[#allocation4 + $0x30] sm:$0x30] }
 0x494   :  { %v1340_v20 = vsel %vm123_vm9, %v1336_v23, %v1337_v17  ;;  %v1342_v58 = vsel %vm123_vm9, %v1337_v17, %v1338_v56  ;;  %1351 = vst.msk [vmem:[#allocation4 + $0x50] sm:$0x3] %vm63_vm1, %v1338_v56  ;;  %v4977_v23 = vor.u32 %v3950_v4, %v3801_v28  ;;  %v6298_v17 = vperm.slane %v6297_v62, 0 }
 0x495   :  { %v1341_v53 = vsel %vm71_vm5, %v1340_v20, %v1333_v33  ;;  %v1343_v1 = vsel %vm71_vm5, %v1342_v58, %v1335_v18  ;;  %1678 = vrot.lane.b32.xlu0 %v4962_v63, %s4047_s22  ;;  %1680 = vrot.lane.b32.xlu1 %v4964_v9, %s4047_s22  ;;  %v4987_v33 = vor.u32 %v3949_v49, %v3783_v34  ;;  %v3777_v18 = vld [vmem:[#allocation4 + $0x2c] sm:$0x30]  ;;  %vm6322_vm1 = vcmask 900096  }
 0x496   :  { %1349 = vst [vmem:[#allocation4 + $0x40] sm:$0x33] %v1341_v53  ;;  %v1491_v3 = vmul.f32 %v1485_v16, %v6298_v17  ;;  %v5000_v28 = vadd.f32 %v1502_v37, %v6299_v5  ;;  %v5002_v20 = vor.u32 %v3945_v43, %v3777_v18  ;;  %v6301_v58 = vld [vmem:[#allocation13_spill] sm:$0xff]  ;;  %v1486_v4 = vsub.f32 %v4881_v54, %v4287_v15  ;;  %v3944_v16 = vld [vmem:[#allocation4 + $0xc] sm:$0xf]  ;;  %vm6323_vm5 = vmmov %vm6322_vm1 }
 0x497   :  { %1350 = vst [vmem:[#allocation4 + $0x48] sm:$0x33] %v1343_v1  ;;  %v5005_v53 = vadd.f32 %v1502_v37, %v6301_v58  ;;  %v3948_v1 = vld [vmem:[#allocation4 + $0x28] sm:$0x30]  ;;  %vm6328_vm11 = vmmov %vm6322_vm1 }
 0x498   :  { %1842 = vrot.lane.b32.xlu2 %v4977_v23, %s4047_s22  ;;  %6300 = vst [vmem:[#allocation23_spill] sm:$0xff] %v5000_v28  ;;  %v1503_v25 = vrot.slane %v1491_v3, 4  ;;  %v1980_v49 = vrot.slane %v5000_v28, 4  ;;  %v5016_v31 = vor.u32 %v3948_v1, %v3775_v60  ;;  %v6303_v18 = vld [vmem:[#allocation12_spill] sm:$0xff]  ;;  %v6305_v3 = vld [vmem:[#allocation14_spill] sm:$0xff] }
 0x499   :  { %v1383_v36 = vpop.permute.xlu0 %1382  ;;  %v4983_v44 = vpop.permute.xlu1 %1568  ;;  %6302 = vst [vmem:[#allocation24_spill] sm:$0xff] %v5005_v53  ;;  %v1981_v34 = vrot.slane %v5005_v53, 4  ;;  %v3967_v28 = vld [vmem:[#allocation4 + $0x44] sm:$0xc] }
 0x49a   :  { %v1387_v11 = vrot.slane %v1383_v36, 4  ;;  %v5020_v17 = vadd.f32 %v1503_v25, %v6303_v18  ;;  %v5023_v15 = vadd.f32 %v1503_v25, %v6305_v3 }
 0x49b   :  { %v5037_v25 = vsel %vm123_vm9, %v1980_v49, %v1981_v34  ;;  %v6309_v34 = vld [vmem:[#allocation15_spill] sm:$0xff] }
 0x49c   :  { %v1390_v26 = vsel %vm123_vm9, %v1386_v57, %v1387_v11  ;;  %v3769_v57 = vld [vmem:[#allocation4 + $0x24] sm:$0x30]  ;;  %6304 = vst [vmem:[#allocation25_spill] sm:$0xff] %v5020_v17 }
 0x49d   :  { %v1391_v56 = vsel %vm6238_vm10, %v1390_v26, %v1383_v36  ;;  %1840 = vrot.lane.b32.xlu1 %v4985_v55, %s4047_s22  ;;  %1690 = vrot.lane.b32.xlu0 %v4987_v33, %s4047_s22  ;;  %v1487_v36 = vsub.f32 %v4911_v46, %v4756_v19  ;;  %v5014_v37 = vor.u32 %v3944_v16, %v3769_v57  ;;  %v6307_v26 = vperm.slane %v4416_v32, 0 }
 0x49e   :  { %1399 = vst [vmem:[#allocation4 + $0x5c] sm:$0x33] %v1391_v56  ;;  %v6308_v46 = vperm.slane %v4413_v27, 0  ;;  %v1984_v57 = vrot.slane %v5023_v15, 4  ;;  %v3815_v49 = vld [vmem:[#allocation4 + $0x48] sm:$0xf] }
 0x49f   :  { %6306 = vst [vmem:[#allocation11_spill] sm:$0xff] %v5023_v15  ;;  %v1492_v56 = vmul.f32 %v1486_v4, %v6307_v26  ;;  %v6311_v26 = vld [vmem:[#allocation19_spill] sm:$0xff] }
 0x4a0   :  { %1688 = vrot.lane.b32.xlu2 %v5002_v20, %s4047_s22  ;;  %v1493_v43 = vmul.f32 %v1487_v36, %v6308_v46 }
 0x4a1   :  { %v1385_v38 = vpop.permute.xlu1 %1384  ;;  %v1504_v1 = vrot.slane %v1492_v56, 4 }
 0x4a2   :  { %v1388_v22 = vrot.slane %v1385_v38, 4  ;;  %v1505_v4 = vrot.slane %v1493_v43, 4 }
 0x4a4   :  { %v1392_v54 = vsel %vm123_vm9, %v1387_v11, %v1388_v22  ;;  %1401 = vst.msk [vmem:[#allocation4 + $0x6c] sm:$0x3] %vm1313_vm4, %v1388_v22  ;;  %v1983_v11 = vrot.slane %v5020_v17, 4  ;;  %v5056_v46 = vadd.f32 %v1505_v4, %v4270_v6  ;;  %v5059_v43 = vadd.f32 %v1505_v4, %v4280_v12  ;;  %vm6329_vm4 = vmmov %vm6325_vm3 }
 0x4a5   :  { %v1393_v19 = vsel %vm6238_vm10, %v1392_v54, %v1385_v38  ;;  %1684 = vrot.lane.b32.xlu0 %v5014_v37, %s4047_s22  ;;  %1686 = vrot.lane.b32.xlu1 %v5016_v31, %s4047_s22  ;;  %v3823_v38 = vld [vmem:[#allocation4 + $0x50] sm:$0xf]  ;;  %v5049_v54 = vadd.f32 %v1504_v1, %v6309_v34 }
 0x4a6   :  { %1400 = vst [vmem:[#allocation4 + $0x64] sm:$0x33] %v1393_v19  ;;  %v5044_v16 = vsel %vm123_vm9, %v1983_v11, %v1984_v57  ;;  %v5052_v19 = vadd.f32 %v1504_v1, %v6311_v26  ;;  %v3954_v11 = vld [vmem:[#allocation4 + $0x58] sm:$0x30]  ;;  %v1488_v1 = vsub.f32 %v4940_v51, %v4695_v59  ;;  %v3809_v59 = vld [vmem:[#allocation4 + $0x5c] sm:$0x30] }
 0x4a7   :  { %6310 = vst [vmem:[#allocation13_spill] sm:$0xff] %v5049_v54  ;;  %v1986_v57 = vrot.slane %v5049_v54, 4  ;;  %v3961_v54 = vld [vmem:[#allocation4 + $0x14] sm:$0xc] }
 0x4a8   :  { %1998 = vrot.lane.b32.xlu2 %v5037_v25, %s4046_s0  ;;  %6312 = vst [vmem:[#allocation12_spill] sm:$0xff] %v5052_v19  ;;  %v1494_v40 = vmul.f32 %v1488_v1, %v6315_v29  ;;  %v3952_v1 = vld [vmem:[#allocation4 + $0x4c] sm:$0xf] }
 0x4a9   :  { %6313 = vst [vmem:[#allocation14_spill] sm:$0xff] %v5056_v46 }
 0x4aa   :  { %6314 = vst [vmem:[#allocation39_spill] sm:$0xff] %v5059_v43  ;;  %v1506_v51 = vrot.slane %v1494_v40, 4 }
 0x4ab   :  { %v3956_v22 = vld [vmem:[#allocation4 + $0x68] sm:$0x30] }
 0x4ac   :  { %v3824_v60 = vor.u32 %v3956_v22, %v3823_v38  ;;  %v1987_v38 = vrot.slane %v5052_v19, 4  ;;  %v3807_v22 = vld [vmem:[#allocation4 + $0x40] sm:$0xf]  ;;  %v5088_v29 = vadd.f32 %v1506_v51, %v4282_v13  ;;  %v3868_v19 = vld [vmem:[#allocation4 + $0x2c] sm:$0xf0] }
 0x4ad   :  { %2000 = vrot.lane.b32.xlu0 %v5044_v16, %s4046_s0  ;;  %v3955_v36 = vld [vmem:[#allocation4 + $0x60] sm:$0x30]  ;;  %v3808_v21 = vor.u32 %v3954_v11, %v3807_v22 }
 0x4ae   :  { %1852 = vrot.lane.b32.xlu1 %v3824_v60, %s4047_s22  ;;  %v3816_v56 = vor.u32 %v3955_v36, %v3815_v49  ;;  %v1989_v49 = vrot.slane %v5056_v46, 4  ;;  %v1990_v36 = vrot.slane %v5059_v43, 4  ;;  %v5070_v4 = vsel %vm123_vm9, %v1986_v57, %v1987_v38  ;;  %v3951_v11 = vld [vmem:[#allocation4 + $0x44] sm:$0xf]  ;;  %6317 = vst [vmem:[#allocation41_spill] sm:$0xff] %v5088_v29 }
 0x4af   :  { %v3812_v22 = vor.u32 %v3951_v11, %v3809_v59  ;;  %v5085_v57 = vadd.f32 %v1506_v51, %v4272_v7  ;;  %v3817_v38 = vld [vmem:[#allocation4 + $0x64] sm:$0x30]  ;;  %v5108_v59 = vpop.permute.xlu2 %1564  ;;  %v3962_v11 = vld [vmem:[#allocation4 + $0x18] sm:$0xf0]  ;;  %v3972_v46 = vld [vmem:[#allocation4 + $0x68] sm:$0xf0] }
 0x4b0   :  { %1848 = vrot.lane.b32.xlu2 %v3816_v56, %s4047_s22  ;;  %v5077_v2 = vsel %vm123_vm9, %v1989_v49, %v1990_v36  ;;  %v3820_v49 = vor.u32 %v3952_v1, %v3817_v38  ;;  %v1993_v36 = vrot.slane %v5088_v29, 4  ;;  %v3850_v38 = vld [vmem:[#allocation4] sm:$0xc] }
 0x4b1   :  { %6316 = vst [vmem:[#allocation40_spill] sm:$0xff] %v5085_v57  ;;  %v1992_v40 = vrot.slane %v5085_v57, 4  ;;  %v3970_v57 = vld [vmem:[#allocation4 + $0x58] sm:$0xf0] }
 0x4b5   :  { %1844 = vrot.lane.b32.xlu0 %v3808_v21, %s4047_s22 }
 0x4b6   :  { %2002 = vrot.lane.b32.xlu1 %v5070_v4, %s4046_s0 }
 0x4b8   :  { %2004 = vrot.lane.b32.xlu2 %v5077_v2, %s4046_s0 }
 0x4bd   :  { %2236 = vrot.lane.b32.xlu0 %v4985_v55, %s4049_s24  ;;  %v5097_v55 = vsel %vm123_vm9, %v1992_v40, %v1993_v36  ;;  %v3959_v40 = vld [vmem:[#allocation4 + $0x4] sm:$0xc] }
 0x4be   :  { %1846 = vrot.lane.b32.xlu1 %v3812_v22, %s4047_s22 }
 0x4c0   :  { %2240 = vrot.lane.b32.xlu2 %v3808_v21, %s4049_s24  ;;  %v1489_v21 = vsub.f32 %v4945_v47, %v4738_v35  ;;  %v5116_v35 = vpop.permute.xlu2 %1570 }
 0x4c5   :  { %1850 = vrot.lane.b32.xlu0 %v3820_v49, %s4047_s22 }
 0x4c6   :  { %2238 = vrot.lane.b32.xlu1 %v4977_v23, %s4049_s24  ;;  %v6318_v23 = vperm.slane %v4463_v45, 0 }
 0x4c8   :  { %2006 = vrot.lane.b32.xlu2 %v5097_v55, %s4046_s0  ;;  %v1495_v51 = vmul.f32 %v1489_v21, %v6318_v23 }
 0x4cd   :  { %2363 = vrot.lane.b32.xlu0 %v4964_v9, %s4048_s23  ;;  %v1507_v9 = vrot.slane %v1495_v51, 4  ;;  %v3965_v51 = vld [vmem:[#allocation4 + $0x30] sm:$0xf0] }
 0x4ce   :  { %2248 = vrot.lane.b32.xlu1 %v3824_v60, %s4049_s24  ;;  %v3851_v60 = vor.u32 %v3962_v11, %v3850_v38 }
 0x4cf   :  { %v5119_v47 = vadd.f32 %v1507_v9, %v4274_v8 }
 0x4d0   :  { %2361 = vrot.lane.b32.xlu2 %v4962_v63, %s4048_s23  ;;  %v5122_v63 = vadd.f32 %v1507_v9, %v4284_v14  ;;  %v5124_v1 = vrot.slane %v3851_v60, 2  ;;  %v3892_v9 = vld [vmem:[#allocation4 + $0x54] sm:$0xf0] }
 0x4d1   :  { %6319 = vst [vmem:[#allocation42_spill] sm:$0xff] %v5119_v47 }
 0x4d2   :  { %6320 = vst [vmem:[#allocation43_spill] sm:$0xff] %v5122_v63 }
 0x4d5   :  { %2242 = vrot.lane.b32.xlu0 %v3812_v22, %s4049_s24  ;;  %v1996_v22 = vrot.slane %v5122_v63, 4 }
 0x4d6   :  { %2244 = vrot.lane.b32.xlu1 %v3816_v56, %s4049_s24  ;;  %v3852_v56 = vld [vmem:[#allocation4 + $0x1c] sm:$0xf0] }
 0x4d7   :  { %v3855_v21 = vor.u32 %v3959_v40, %v3852_v56  ;;  %v3964_v56 = vld [vmem:[#allocation4 + $0x28] sm:$0xf0] }
 0x4d8   :  { %2373 = vrot.lane.b32.xlu2 %v4987_v33, %s4048_s23  ;;  %v1995_v33 = vrot.slane %v5119_v47, 4  ;;  %v3860_v47 = vld [vmem:[#allocation4 + $0x24] sm:$0xf0] }
 0x4da   :  { %v5134_v23 = vsel %vm123_vm9, %v1995_v33, %v1996_v22  ;;  %v3866_v22 = vld [vmem:[#allocation4 + $0x10] sm:$0xc] }
 0x4dd   :  { %2246 = vrot.lane.b32.xlu0 %v3820_v49, %s4049_s24  ;;  %v5140_v49 = vrot.slane %v3855_v21, 2  ;;  %v3867_v21 = vor.u32 %v3964_v56, %v3866_v22 }
 0x4de   :  { %2712 = vrot.lane.b32.xlu1 %v5124_v1, %s4047_s22  ;;  %v1577_v36 = vpop.permute.xlu2 %1576 }
 0x4e0   :  { %2367 = vrot.lane.b32.xlu2 %v5014_v37, %s4048_s23  ;;  %v3874_v37 = vld [vmem:[#allocation4 + $0x18] sm:$0xc] }
 0x4e1   :  { %v3875_v38 = vor.u32 %v3965_v51, %v3874_v37  ;;  %v3963_v37 = vld [vmem:[#allocation4 + $0x20] sm:$0xf0] }
 0x4e3   :  { %v5150_v60 = vrot.slane %v3875_v38, 2  ;;  %v5164_v38 = vpop.permute.xlu0 %1566 }
 0x4e5   :  { %2008 = vrot.lane.b32.xlu0 %v5134_v23, %s4046_s0 }
 0x4e6   :  { %2365 = vrot.lane.b32.xlu1 %v4956_v0, %s4048_s23  ;;  %v3966_v0 = vld [vmem:[#allocation4 + $0x3c] sm:$0xc] }
 0x4e7   :  { %v3895_v33 = vor.u32 %v3966_v0, %v3892_v9  ;;  %v3969_v9 = vld [vmem:[#allocation4 + $0x50] sm:$0xf0]  ;;  %v3890_v0 = vld [vmem:[#allocation4 + $0x38] sm:$0xc] }
 0x4e8   :  { %2714 = vrot.lane.b32.xlu2 %v5140_v49, %s4047_s22 }
 0x4e9   :  { %v5156_v51 = vrot.slane %v3895_v33, 2  ;;  %v3891_v33 = vor.u32 %v3969_v9, %v3890_v0  ;;  %v3898_v0 = vld [vmem:[#allocation4 + $0x40] sm:$0xc] }
 0x4ea   :  { %v5144_v11 = vpop.permute.xlu2 %1682  ;;  %v3899_v43 = vor.u32 %v3970_v57, %v3898_v0 }
 0x4ed   :  { %2369 = vrot.lane.b32.xlu0 %v5016_v31, %s4048_s23  ;;  %v3858_v31 = vld [vmem:[#allocation4 + $0x8] sm:$0xc] }
 0x4ee   :  { %2371 = vrot.lane.b32.xlu1 %v5002_v20, %s4048_s23  ;;  %v5162_v20 = vrot.slane %v3867_v21, 2  ;;  %v3859_v63 = vor.u32 %v3963_v37, %v3858_v31  ;;  %v2873_v21 = vrot.slane %v3891_v33, 2  ;;  %v3960_v31 = vld [vmem:[#allocation4 + $0xc] sm:$0xc] }
 0x4ef   :  { %v3863_v9 = vor.u32 %v3960_v31, %v3860_v47 }
 0x4f0   :  { %2724 = vrot.lane.b32.xlu2 %v5150_v60, %s4047_s22  ;;  %v5170_v22 = vrot.slane %v3859_v63, 2 }
 0x4f1   :  { %v5190_v33 = vrot.slane %v3863_v9, 2 }
 0x4f2   :  { %v5154_v40 = vpop.permute.xlu2 %1842 }
 0x4f5   :  { %2036 = vrot.lane.b32.xlu0 %v5037_v25, %s4053_s15 }
 0x4f6   :  { %2882 = vrot.lane.b32.xlu1 %v5156_v51, %s4047_s22 }
 0x4f8   :  { %2720 = vrot.lane.b32.xlu2 %v5162_v20, %s4047_s22 }
 0x4fa   :  { %v5168_v56 = vpop.permute.xlu2 %1688 }
 0x4fd   :  { %2716 = vrot.lane.b32.xlu0 %v5170_v22, %s4047_s22 }
 0x4fe   :  { %2038 = vrot.lane.b32.xlu1 %v5044_v16, %s4053_s15 }
 0x4ff   :  { %v5176_v29 = vpop.permute.xlu0 %1572  ;;  %v1575_v37 = vpop.permute.xlu1 %1574 }
 0x500   :  { %v5180_v50 = vsel %vm798_vm8, %v5176_v29, %v1575_v37  ;;  %v5183_v63 = vsel %vm798_vm8, %v1575_v37, %v1577_v36  ;;  %3275 = vrot.lane.b32.xlu2 %v2873_v21, %s4049_s24  ;;  %v5195_v36 = vrot.slane %v3899_v43, 2  ;;  %v3914_v37 = vld [vmem:[#allocation4 + $0x50] sm:$0xc]  ;;  %v3957_v43 = vld [vmem:[%s6156_s5] sm:$0xff] }
 0x501   :  { %6321 = vst [vmem:[#allocation44_spill] sm:$0xff] %v5183_v63  ;;  %v3915_v15 = vor.u32 %v3972_v46, %v3914_v37 }
 0x502   :  { %v5186_v61 = vpop.permute.xlu2 %1998 }
 0x503   :  { %2022 = vst.msk [vmem:[#allocation3] sm:$0xff] %vm1463_vm12, %v5186_v61  ;;  %v2879_v46 = vrot.slane %v3915_v15, 2  ;;  %v3968_v15 = vld [vmem:[#allocation4 + $0x4c] sm:$0xc] }
 0x505   :  { %2880 = vrot.lane.b32.xlu0 %v2873_v21, %s4047_s22  ;;  %v3871_v21 = vor.u32 %v3961_v54, %v3868_v19 }
 0x506   :  { %2718 = vrot.lane.b32.xlu1 %v5190_v33, %s4047_s22 }
 0x507   :  { %v1679_v47 = vpop.permute.xlu0 %1678  ;;  %v1681_v31 = vpop.permute.xlu1 %1680  ;;  %v5209_v37 = vrot.slane %v3871_v21, 2  ;;  %v3900_v21 = vld [vmem:[#allocation4 + $0x5c] sm:$0xf0] }
 0x508   :  { %v1692_v57 = vsel %vm6322_vm1, %v1679_v47, %v1681_v31  ;;  %v1693_v9 = vsel %vm6323_vm5, %v1681_v31, %v5144_v11  ;;  %2884 = vrot.lane.b32.xlu2 %v5195_v36, %s4047_s22  ;;  %v3908_v47 = vld [vmem:[#allocation4 + $0x64] sm:$0xf0]  ;;  %vm6330_vm5 = vmmov %vm6322_vm1 }
 0x509   :  { %v1702_v0 = vsel %vm6324_vm6, %v1692_v57, 0  ;;  %v1705_v17 = vsel %vm6325_vm3, %v1693_v9, 0  ;;  %v3911_v9 = vor.u32 %v3968_v15, %v3908_v47  ;;  %vm6331_vm6 = vmmov %vm6322_vm1 }
 0x50a   :  { %v5207_v10 = vpop.permute.xlu2 %1848  ;;  %1726 = vmatpush.bf16.msra.mxu2 %v1702_v0  ;;  %1740 = vmatpush.bf16.msra.mxu3 %v1705_v17  ;;  %v3971_v0 = vld [vmem:[#allocation4 + $0x60] sm:$0xf0]  ;;  %vm6332_vm3 = vmmov %vm6322_vm1 }
 0x50b   :  { %v2878_v53 = vrot.slane %v3911_v9, 2  ;;  %v3907_v15 = vor.u32 %v3971_v0, %v3906_v41 }
 0x50d   :  { %2892 = vrot.lane.b32.xlu0 %v2879_v46, %s4047_s22  ;;  %3785 = vmatmul.msk.bf16.vlgmr.msra.gmra.mxu2 %vm6326_vm7, %v3957_v43  ;;  %vm6333_vm7 = vmmov %vm6329_vm4 }
 0x50e   :  { %2722 = vrot.lane.b32.xlu1 %v5209_v37, %s4047_s22  ;;  %3786 = vmatmul.msk.bf16.vlgmr.msra.gmra.mxu3 %vm6327_vm2, %v3957_v43  ;;  %vm6334_vm2 = vmmov %vm6329_vm4 }
 0x50f   :  { %v1691_v54 = vpop.permute.xlu0 %1690  ;;  %v1841_v19 = vpop.permute.xlu1 %1840 }
 0x510   :  { %v1697_v31 = vsel %vm6328_vm11, %v5168_v56, %v1691_v54  ;;  %3402 = vrot.lane.b32.xlu2 %v5140_v49, %s4048_s23  ;;  %v1854_v54 = vsel %vm6322_vm1, %v1841_v19, %v5154_v40  ;;  %vm6335_vm11 = vmmov %vm6334_vm2  ;;  %vm6337_vm1 = vcmask 97280  }
 0x511   :  { %v1717_v17 = vsel %vm6329_vm4, %v1697_v31, 0  ;;  %v3903_v31 = vor.u32 %v3967_v28, %v3900_v21  ;;  %vm6336_vm4 = vmmov %vm6334_vm2 }
 0x512   :  { %v2005_v57 = vpop.permute.xlu2 %2004  ;;  %1796 = vmatpush.bf16.msrb.mxu3 %v1717_v17  ;;  %v1864_v28 = vsel %vm6336_vm4, %v1854_v54, 0  ;;  %vm6343_vm4 = vmmov %vm6337_vm1 }
 0x515   :  { %3277 = vrot.lane.b32.xlu0 %v5156_v51, %s4049_s24 }
 0x516   :  { %2040 = vrot.lane.b32.xlu1 %v5070_v4, %s4053_s15 }
 0x517   :  { %v1685_v49 = vpop.permute.xlu0 %1684  ;;  %v1687_v42 = vpop.permute.xlu1 %1686 }
 0x518   :  { %v1694_v47 = vsel %vm6330_vm5, %v5144_v11, %v1685_v49  ;;  %v1695_v17 = vsel %vm6331_vm6, %v1685_v49, %v1687_v42  ;;  %v1696_v51 = vsel %vm6332_vm3, %v1687_v42, %v5168_v56  ;;  %2890 = vrot.lane.b32.xlu2 %v2878_v53, %s4047_s22  ;;  %v2876_v11 = vrot.slane %v3903_v31, 2  ;;  %vm6338_vm5 = vmmov %vm6337_vm1 }
 0x519   :  { %v1708_v9 = vsel %vm6333_vm7, %v1694_v47, 0  ;;  %v1711_v52 = vsel %vm6334_vm2, %v1695_v17, 0  ;;  %v1714_v19 = vsel %vm6335_vm11, %v1696_v51, 0  ;;  %v2877_v49 = vrot.slane %v3907_v15, 2  ;;  %vm6339_vm6 = vmmov %vm6337_vm1 }
 0x51a   :  { %1754 = vmatpush.bf16.msrb.mxu0 %v1708_v9  ;;  %v5237_v21 = vpop.permute.xlu2 %2240  ;;  %1768 = vmatpush.bf16.msrb.mxu1 %v1711_v52  ;;  %vm6340_vm3 = vmmov %vm6337_vm1  ;;  %vm6341_vm7 = vcmask 900096  }
 0x51b   :  { %1782 = vmatpush.bf16.msrb.mxu2 %v1714_v19  ;;  %vm6342_vm11 = vmmov %vm6337_vm1 }
 0x51d   :  { %2886 = vrot.lane.b32.xlu0 %v2876_v11, %s4047_s22  ;;  %3788 = vmatmul.msk.bf16.vlgmr.msrb.gmra.mxu1 %vm6337_vm1, %v3957_v43  ;;  %vm6344_vm1 = vmmov %vm6341_vm7 }
 0x51e   :  { %1888 = vmatpush.bf16.msra.mxu0 %v1864_v28  ;;  %2888 = vrot.lane.b32.xlu1 %v2877_v49, %s4047_s22 }
 0x51f   :  { %3787 = vmatmul.msk.bf16.vlgmr.msrb.gmra.mxu0 %vm6338_vm5, %v3957_v43  ;;  %v2001_v41 = vpop.permute.xlu0 %2000  ;;  %3789 = vmatmul.msk.bf16.vlgmr.msrb.gmra.mxu2 %vm6339_vm6, %v3957_v43  ;;  %vm6345_vm5 = vmmov %vm6344_vm1 }
 0x520   :  { %3790 = vmatmul.msk.bf16.vlgmr.msrb.gmra.mxu3 %vm6340_vm3, %v3957_v43  ;;  %v5247_v52 = vsel %vm6238_vm10, %v5186_v61, %v2001_v41  ;;  %2042 = vrot.lane.b32.xlu2 %v5077_v2, %s4053_s15  ;;  %v1853_v42 = vpop.permute.xlu1 %1852  ;;  %vm6346_vm6 = vmmov %vm6334_vm2 }
 0x521   :  { %vm6347_vm3 = vmmov %vm6334_vm2 }
 0x522   :  { %v5251_v56 = vpop.permute.xlu2 %2006 }
 0x523   :  { %v5255_v0 = vsel %vm6238_vm10, %v2005_v57, %v5251_v56 }
 0x525   :  { %3287 = vrot.lane.b32.xlu0 %v2879_v46, %s4049_s24  ;;  %v3958_v46 = vld [vmem:[%s6156_s5 + $0x8] sm:$0xff] }
 0x526   :  { %3400 = vrot.lane.b32.xlu1 %v5124_v1, %s4048_s23 }
 0x527   :  { %v1845_v43 = vpop.permute.xlu0 %1844 }
 0x528   :  { %v1855_v61 = vsel %vm6341_vm7, %v5154_v40, %v1845_v43  ;;  %3281 = vrot.lane.b32.xlu2 %v2876_v11, %s4049_s24  ;;  %v2003_v54 = vpop.permute.xlu1 %2002  ;;  %vm6348_vm7 = vmmov %vm6343_vm4 }
 0x529   :  { %v1867_v31 = vsel %vm6334_vm2, %v1855_v61, 0  ;;  %v5265_v47 = vsel %vm6238_vm10, %v2001_v41, %v2003_v54  ;;  %v5268_v17 = vsel %vm6238_vm10, %v2003_v54, %v2005_v57  ;;  %vm6349_vm2 = vmmov %vm6343_vm4 }
 0x52a   :  { %v2362_v1 = vpop.permute.xlu2 %2361  ;;  %1902 = vmatpush.bf16.msra.mxu1 %v1867_v31 }
 0x52d   :  { %2044 = vrot.lane.b32.xlu0 %v5097_v55, %s4053_s15  ;;  %3826 = vmatmul.msk.bf16.vlgmr.msra.gmra.mxu1 %vm6342_vm11, %v3958_v46  ;;  %vm6350_vm11 = vmmov %vm6344_vm1 }
 0x52e   :  { %3279 = vrot.lane.b32.xlu1 %v5195_v36, %s4049_s24 }
 0x52f   :  { %3825 = vmatmul.msk.bf16.vlgmr.msra.gmra.mxu0 %vm6343_vm4, %v3958_v46  ;;  %v2237_v40 = vpop.permute.xlu0 %2236  ;;  %vm6351_vm4 = vmmov %vm6344_vm1 }
 0x530   :  { %3285 = vrot.lane.b32.xlu2 %v2878_v53, %s4049_s24  ;;  %v1847_v57 = vpop.permute.xlu1 %1846 }
 0x531   :  { %v1856_v51 = vsel %vm6344_vm1, %v1845_v43, %v1847_v57  ;;  %v1857_v15 = vsel %vm6345_vm5, %v1847_v57, %v5207_v10  ;;  %vm6352_vm1 = vmmov %vm6347_vm3 }
 0x532   :  { %v1870_v9 = vsel %vm6346_vm6, %v1856_v51, 0  ;;  %v1873_v19 = vsel %vm6347_vm3, %v1857_v15, 0  ;;  %v5285_v28 = vpop.permute.xlu2 %2373  ;;  %vm6353_vm5 = vmmov %vm6352_vm1  ;;  %v1965_v51 = vld [vmem:[%s6157_s6] sm:$0xf] }
 0x533   :  { %1916 = vmatpush.bf16.msra.mxu2 %v1870_v9  ;;  %1930 = vmatpush.bf16.msra.mxu3 %v1873_v19  ;;  %vm6354_vm6 = vmmov %vm6352_vm1 }
 0x534   :  { %vm6355_vm3 = vmmov %vm6352_vm1 }
 0x535   :  { %3283 = vrot.lane.b32.xlu0 %v2877_v49, %s4049_s24 }
 0x536   :  { %3412 = vrot.lane.b32.xlu1 %v5150_v60, %s4048_s23  ;;  %3827 = vmatmul.msk.bf16.vlgmr.msra.gmra.mxu2 %vm6348_vm7, %v3958_v46  ;;  %vm6356_vm7 = vmmov %vm6349_vm2 }
 0x537   :  { %v1851_v53 = vpop.permute.xlu0 %1850  ;;  %3828 = vmatmul.msk.bf16.vlgmr.msra.gmra.mxu3 %vm6349_vm2, %v3958_v46 }
 0x538   :  { %v1858_v36 = vsel %vm6350_vm11, %v5207_v10, %v1851_v53  ;;  %v1859_v11 = vsel %vm6351_vm4, %v1851_v53, %v1853_v42  ;;  %v2239_v41 = vpop.permute.xlu1 %2238  ;;  %vm6357_vm11 = vmmov %vm6349_vm2 }
 0x539   :  { %v1876_v43 = vsel %vm6352_vm1, %v1858_v36, 0  ;;  %v1879_v61 = vsel %vm6353_vm5, %v1859_v11, 0  ;;  %v2250_v49 = vsel %vm498_vm0, %v2237_v40, %v2239_v41  ;;  %v2251_v60 = vsel %vm498_vm0, %v2239_v41, %v5237_v21  ;;  %vm6358_vm4 = vmmov %vm6349_vm2 }
 0x53a   :  { %v2260_v54 = vsel %vm6354_vm6, %v2250_v49, 0  ;;  %v2263_v31 = vsel %vm6355_vm3, %v2251_v60, 0  ;;  %v2368_v57 = vpop.permute.xlu2 %2367  ;;  %1944 = vmatpush.bf16.msrb.mxu0 %v1876_v43  ;;  %1958 = vmatpush.bf16.msrb.mxu1 %v1879_v61  ;;  %vm6359_vm5 = vmmov %vm6352_vm1 }
 0x53b   :  { %2284 = vmatpush.bf16.msrb.mxu2 %v2260_v54  ;;  %2297 = vmatpush.bf16.msrb.mxu3 %v2263_v31  ;;  %vm6360_vm6 = vmmov %vm6352_vm1 }
 0x53c   :  { %vm6361_vm3 = vmmov %vm6349_vm2 }
 0x53d   :  { %3830 = vmatmul.msk.bf16.vlgmr.msrb.gmra.mxu1 %vm6356_vm7, %v3958_v46  ;;  %vm6362_vm7 = vmmov %vm6349_vm2 }
 0x53e   :  { %2046 = vrot.lane.b32.xlu1 %v5134_v23, %s4053_s15 }
 0x53f   :  { %3829 = vmatmul.msk.bf16.vlgmr.msrb.gmra.mxu0 %vm6349_vm2, %v3958_v46  ;;  %v2364_v10 = vpop.permute.xlu0 %2363  ;;  %vm6363_vm2 = vmmov %vm6352_vm1 }
 0x540   :  { %v2249_v42 = vpop.permute.xlu1 %2248  ;;  %v2375_v15 = vsel %vm378_vm15, %v2362_v1, %v2364_v10 }
 0x541   :  { %v2385_v11 = vsel %vm6359_vm5, %v2375_v15, 0  ;;  %vm6367_vm5 = vcmask 900096  }
 0x542   :  { %v5306_v40 = vpop.permute.xlu2 %2714 }
 0x546   :  { %3832 = vmatmul.msk.bf16.vlgmr.msrb.gmra.mxu2 %vm6357_vm11, %v1965_v51  ;;  %vm6364_vm11 = vmmov %vm6352_vm1 }
 0x547   :  { %v2243_v9 = vpop.permute.xlu0 %2242  ;;  %3833 = vmatmul.msk.bf16.vlgmr.msrb.gmra.mxu3 %vm6358_vm4, %v1965_v51  ;;  %vm6365_vm4 = vmmov %vm6361_vm3 }
 0x548   :  { %v2252_v19 = vsel %vm498_vm0, %v5237_v21, %v2243_v9  ;;  %v2245_v53 = vpop.permute.xlu1 %2244 }
 0x549   :  { %v2266_v46 = vsel %vm6352_vm1, %v2252_v19, 0  ;;  %v2253_v36 = vsel %vm498_vm0, %v2243_v9, %v2245_v53  ;;  %vm6366_vm1 = vmmov %vm6361_vm3 }
 0x54a   :  { %v2269_v41 = vsel %vm6360_vm6, %v2253_v36, 0  ;;  %2310 = vmatpush.bf16.msra.mxu0 %v2266_v46  ;;  %v5320_v43 = vpop.permute.xlu2 %2724  ;;  %vm6368_vm6 = vmmov %vm6363_vm2 }
 0x54b   :  { %2323 = vmatpush.bf16.msra.mxu1 %v2269_v41 }
 0x54e   :  { %2409 = vmatpush.bf16.msrb.mxu0 %v2385_v11  ;;  %3835 = vmatmul.msk.bf16.vlgmr.msra.gmra.mxu1 %vm6361_vm3, %v1965_v51  ;;  %vm6369_vm3 = vmmov %vm6363_vm2 }
 0x54f   :  { %3834 = vmatmul.msk.bf16.vlgmr.msra.gmra.mxu0 %vm6362_vm7, %v1965_v51  ;;  %v2247_v1 = vpop.permute.xlu0 %2246  ;;  %vm6370_vm7 = vmmov %vm6363_vm2 }
 0x550   :  { %v2254_v21 = vsel %vm498_vm0, %v2245_v53, %v2247_v1  ;;  %v2255_v61 = vsel %vm498_vm0, %v2247_v1, %v2249_v42  ;;  %v2713_v49 = vpop.permute.xlu1 %2712 }
 0x551   :  { %v2272_v60 = vsel %vm6363_vm2, %v2254_v21, 0  ;;  %v2275_v54 = vsel %vm6364_vm11, %v2255_v61, 0  ;;  %v2726_v9 = vsel %vm6367_vm5, %v2713_v49, %v5306_v40  ;;  %vm6371_vm2 = vmmov %vm6366_vm1 }
 0x552   :  { %2336 = vmatpush.bf16.msra.mxu2 %v2272_v60  ;;  %2349 = vmatpush.bf16.msra.mxu3 %v2275_v54  ;;  %v5328_v31 = vpop.permute.xlu2 %2720  ;;  %vm6372_vm11 = vmmov %vm6366_vm1 }
 0x556   :  { %3836 = vmatmul.msk.bf16.vlgmr.msra.gmra.mxu2 %vm6365_vm4, %v1965_v51  ;;  %vm6373_vm4 = vmmov %vm6369_vm3 }
 0x557   :  { %v2009_v15 = vpop.permute.xlu0 %2008  ;;  %3837 = vmatmul.msk.bf16.vlgmr.msra.gmra.mxu3 %vm6366_vm1, %v1965_v51  ;;  %v2736_v51 = vsel %vm6370_vm7, %v2726_v9, 0  ;;  %vm6374_vm1 = vmmov %vm6369_vm3  ;;  %v5359_v9 = vld [vmem:[#allocation3] sm:$0xff] }
 0x558   :  { %v5336_v42 = vsel %vm6238_vm10, %v5251_v56, %v2009_v15  ;;  %2028 = vst.msk [vmem:[#allocation3 + $0x30] sm:$0xff] %vm6238_vm10, %v2009_v15  ;;  %v2366_v19 = vpop.permute.xlu1 %2365  ;;  %v3831_v56 = vld [vmem:[%s6157_s6 + $0x4] sm:$0xf]  ;;  %vm6375_vm5 = vmmov %vm6374_vm1 }
 0x559   :  { %v2376_v53 = vsel %vm378_vm15, %v2364_v10, %v2366_v19  ;;  %v2377_v46 = vsel %vm378_vm15, %v2366_v19, %v2368_v57  ;;  %vm6378_vm7 = vmmov %vm6371_vm2 }
 0x55a   :  { %v2388_v36 = vsel %vm6368_vm6, %v2376_v53, 0  ;;  %v2391_v11 = vsel %vm6369_vm3, %v2377_v46, 0  ;;  %v5349_v41 = vpop.permute.xlu2 %3275  ;;  %vm6376_vm6 = vmmov %vm6371_vm2 }
 0x55b   :  { %2422 = vmatpush.bf16.msrb.mxu1 %v2388_v36  ;;  %2435 = vmatpush.bf16.msrb.mxu2 %v2391_v11  ;;  %vm6377_vm3 = vmmov %vm6371_vm2 }
 0x55e   :  { %3839 = vmatmul.msk.bf16.vlgmr.msrb.gmra.mxu1 %vm6371_vm2, %v3831_v56 }
 0x55f   :  { %2760 = vmatpush.bf16.msra.mxu2 %v2736_v51  ;;  %3838 = vmatmul.msk.bf16.vlgmr.msrb.gmra.mxu0 %vm6372_vm11, %v3831_v56  ;;  %v2370_v10 = vpop.permute.xlu0 %2369  ;;  %vm6379_vm11 = vcmask 900096  }
 0x560   :  { %v2378_v1 = vsel %vm378_vm15, %v2368_v57, %v2370_v10  ;;  %v2372_v21 = vpop.permute.xlu1 %2371 }
 0x561   :  { %v2394_v61 = vsel %vm6373_vm4, %v2378_v1, 0  ;;  %v2379_v49 = vsel %vm378_vm15, %v2370_v10, %v2372_v21  ;;  %v2380_v60 = vsel %vm378_vm15, %v2372_v21, %v5285_v28  ;;  %vm6380_vm4 = vmmov %vm6374_vm1  ;;  %v3973_v21 = vld [vmem:[%s6156_s5] sm:$0xff] }
 0x562   :  { %v2397_v54 = vsel %vm6374_vm1, %v2379_v49, 0  ;;  %v2400_v15 = vsel %vm6375_vm5, %v2380_v60, 0  ;;  %2448 = vmatpush.bf16.msrb.mxu3 %v2394_v61  ;;  %v5363_v46 = vpop.permute.xlu2 %2884  ;;  %vm6381_vm1 = vmmov %vm6371_vm2 }
 0x563   :  { %2461 = vmatpush.bf16.msra.mxu0 %v2397_v54  ;;  %2474 = vmatpush.bf16.msra.mxu1 %v2400_v15  ;;  %vm6382_vm5 = vmmov %vm6381_vm1 }
 0x564   :  { %vm6388_vm10 = vmmov %vm6380_vm4 }
 0x566   :  { %3840 = vmatmul.msk.bf16.vlgmr.msrb.gmra.mxu2 %vm6376_vm6, %v3831_v56  ;;  %vm6383_vm6 = vmmov %vm6379_vm11 }
 0x567   :  { %v2037_v57 = vpop.permute.xlu0 %2036  ;;  %3841 = vmatmul.msk.bf16.vlgmr.msrb.gmra.mxu3 %vm6377_vm3, %v3831_v56  ;;  %vm6384_vm3 = vmmov %vm6383_vm6 }
 0x568   :  { %v2060_v19 = vsub.f32 %v5359_v9, %v2037_v57  ;;  %v2883_v53 = vpop.permute.xlu1 %2882 }
 0x56a   :  { %2074 = vrot.lane.b32.xlu2 %v2060_v19, %s4049_s24 }
 0x56e   :  { %3843 = vmatmul.msk.bf16.vlgmr.msra.gmra.mxu1 %vm6378_vm7, %v3831_v56  ;;  %vm6385_vm7 = vmmov %vm6384_vm3 }
 0x56f   :  { %3842 = vmatmul.msk.bf16.vlgmr.msra.gmra.mxu0 %vm6371_vm2, %v3831_v56  ;;  %v2717_v28 = vpop.permute.xlu0 %2716  ;;  %v5378_v56 = vpop.permute.xlu2 %3402  ;;  %vm6386_vm2 = vmmov %vm6384_vm3 }
 0x570   :  { %v2727_v36 = vsel %vm6379_vm11, %v5306_v40, %v2717_v28  ;;  %v2039_v11 = vpop.permute.xlu1 %2038  ;;  %vm6387_vm11 = vmmov %vm6380_vm4 }
 0x571   :  { %v2739_v51 = vsel %vm6380_vm4, %v2727_v36, 0  ;;  %v2048_v10 = vsel %vm879_vm13, %v2037_v57, %v2039_v11 }
 0x572   :  { %v2061_v1 = vsub.f32 %v5247_v52, %v2048_v10  ;;  %3408 = vrot.lane.b32.xlu2 %v5162_v20, %s4048_s23  ;;  %2774 = vmatpush.bf16.msra.mxu3 %v2739_v51  ;;  %v2895_v20 = vsel %vm6384_vm3, %v2883_v53, %v5363_v46  ;;  %vm6391_vm3 = vmmov %vm6386_vm2 }
 0x574   :  { %2076 = vrot.lane.b32.xlu0 %v2061_v1, %s4049_s24 }
 0x576   :  { %3876 = vmatmul.msk.bf16.vlgmr.msra.gmra.mxu2 %vm6381_vm1, %v3973_v21  ;;  %vm6389_vm1 = vmmov %vm6380_vm4 }
 0x577   :  { %v2881_v40 = vpop.permute.xlu0 %2880  ;;  %3877 = vmatmul.msk.bf16.vlgmr.msra.gmra.mxu3 %vm6382_vm5, %v3973_v21  ;;  %v2907_v36 = vsel %vm6389_vm1, %v2895_v20, 0 }
 0x578   :  { %v2894_v61 = vsel %vm6383_vm6, %v2881_v40, %v2883_v53  ;;  %v2719_v49 = vpop.permute.xlu1 %2718  ;;  %v2891_v53 = vpop.permute.xlu2 %2890  ;;  %vm6390_vm6 = vmmov %vm6382_vm5 }
 0x579   :  { %v2728_v60 = vsel %vm6385_vm7, %v2717_v28, %v2719_v49  ;;  %v2729_v54 = vsel %vm6386_vm2, %v2719_v49, %v5328_v31  ;;  %v2904_v19 = vsel %vm6388_vm10, %v2894_v61, 0  ;;  %vm6392_vm7 = vmmov %vm6389_vm1 }
 0x57a   :  { %v2742_v15 = vsel %vm6387_vm11, %v2728_v60, 0  ;;  %v2745_v57 = vsel %vm6380_vm4, %v2729_v54, 0  ;;  %vm6393_vm10 = vmmov %vm6386_vm2 }
 0x57b   :  { %2788 = vmatpush.bf16.msrb.mxu0 %v2742_v15  ;;  %2802 = vmatpush.bf16.msrb.mxu1 %v2745_v57  ;;  %vm6394_vm11 = vmmov %vm6389_vm1 }
 0x57c   :  { %3404 = vrot.lane.b32.xlu0 %v5170_v22, %s4048_s23  ;;  %vm6395_vm4 = vmmov %vm6389_vm1 }
 0x57d   :  { %vm6396_vm1 = vmmov %vm6382_vm5 }
 0x57e   :  { %3879 = vmatmul.msk.bf16.vlgmr.msrb.gmra.mxu1 %vm6382_vm5, %v3973_v21  ;;  %vm6397_vm5 = vmmov %vm6396_vm1 }
 0x57f   :  { %2928 = vmatpush.bf16.msra.mxu0 %v2904_v19  ;;  %2942 = vmatpush.bf16.msra.mxu1 %v2907_v36  ;;  %v2893_v28 = vpop.permute.xlu0 %2892  ;;  %v3974_v19 = vld [vmem:[%s6156_s5 + $0x8] sm:$0xff] }
 0x580   :  { %3878 = vmatmul.msk.bf16.vlgmr.msrb.gmra.mxu0 %vm6390_vm6, %v3973_v21  ;;  %v2899_v51 = vsel %vm6391_vm3, %v2891_v53, %v2893_v28  ;;  %v2723_v10 = vpop.permute.xlu1 %2722  ;;  %v2043_v60 = vpop.permute.xlu2 %2042  ;;  %vm6398_vm6 = vmmov %vm6396_vm1 }
 0x581   :  { %v2919_v1 = vsel %vm6392_vm7, %v2899_v51, 0  ;;  %v2730_v40 = vsel %vm6393_vm10, %v5328_v31, %v2723_v10  ;;  %v2731_v61 = vsel %vm6386_vm2, %v2723_v10, %v5320_v43  ;;  %vm6399_vm3 = vmmov %vm6396_vm1 }
 0x582   :  { %v2748_v22 = vsel %vm6394_vm11, %v2730_v40, 0  ;;  %v2751_v49 = vsel %vm6395_vm4, %v2731_v61, 0  ;;  %vm6400_vm7 = vmmov %vm6386_vm2 }
 0x583   :  { %2998 = vmatpush.bf16.msrb.mxu1 %v2919_v1  ;;  %2816 = vmatpush.bf16.msrb.mxu2 %v2748_v22  ;;  %vm6401_vm10 = vmmov %vm6395_vm4 }
 0x584   :  { %2830 = vmatpush.bf16.msrb.mxu3 %v2751_v49  ;;  %vm6402_vm11 = vmmov %vm6386_vm2 }
 0x586   :  { %3880 = vmatmul.msk.bf16.vlgmr.msrb.gmra.mxu2 %vm6396_vm1, %v3973_v21  ;;  %vm6403_vm1 = vmmov %vm6395_vm4 }
 0x587   :  { %v3278_v20 = vpop.permute.xlu0 %3277  ;;  %3881 = vmatmul.msk.bf16.vlgmr.msrb.gmra.mxu3 %vm6397_vm5, %v3973_v21  ;;  %vm6404_vm5 = vmmov %vm6403_vm1 }
 0x588   :  { %v2041_v54 = vpop.permute.xlu1 %2040 }
 0x589   :  { %v2049_v15 = vsel %vm879_vm13, %v2039_v11, %v2041_v54  ;;  %v2050_v31 = vsel %vm879_vm13, %v2041_v54, %v2043_v60  ;;  %v3289_v11 = vsel %vm498_vm0, %v5349_v41, %v3278_v20  ;;  %v3282_v41 = vpop.permute.xlu2 %3281 }
 0x58a   :  { %v2062_v43 = vsub.f32 %v5265_v47, %v2049_v15  ;;  %v2063_v57 = vsub.f32 %v5268_v17, %v2050_v31  ;;  %v3299_v22 = vsel %vm6404_vm5, %v3289_v11, 0  ;;  %vm6411_vm5 = vmmov %vm6403_vm1 }
 0x58c   :  { %2080 = vrot.lane.b32.xlu2 %v2063_v57, %s4049_s24  ;;  %2078 = vrot.lane.b32.xlu1 %v2062_v43, %s4049_s24 }
 0x58e   :  { %3917 = vmatmul.msk.bf16.vlgmr.msra.gmra.mxu1 %vm6399_vm3, %v3974_v19 }
 0x58f   :  { %v2887_v21 = vpop.permute.xlu0 %2886 }
 0x590   :  { %3916 = vmatmul.msk.bf16.vlgmr.msra.gmra.mxu0 %vm6398_vm6, %v3974_v19  ;;  %v2896_v36 = vsel %vm6400_vm7, %v5363_v46, %v2887_v21  ;;  %v2889_v28 = vpop.permute.xlu1 %2888  ;;  %vm6405_vm6 = vmmov %vm6399_vm3 }
 0x591   :  { %v2910_v51 = vsel %vm6401_vm10, %v2896_v36, 0  ;;  %v2897_v10 = vsel %vm6386_vm2, %v2887_v21, %v2889_v28  ;;  %v2898_v1 = vsel %vm6402_vm11, %v2889_v28, %v2891_v53  ;;  %vm6406_vm7 = vmmov %vm6399_vm3  ;;  %v3286_v49 = vpop.permute.xlu2 %3285 }
 0x592   :  { %v2913_v40 = vsel %vm6395_vm4, %v2897_v10, 0  ;;  %v2916_v61 = vsel %vm6403_vm1, %v2898_v1, 0  ;;  %2956 = vmatpush.bf16.msra.mxu2 %v2910_v51  ;;  %vm6407_vm10 = vmmov %vm6399_vm3 }
 0x593   :  { %2970 = vmatpush.bf16.msra.mxu3 %v2913_v40  ;;  %2984 = vmatpush.bf16.msrb.mxu0 %v2916_v61  ;;  %vm6408_vm2 = vmmov %vm6403_vm1 }
 0x594   :  { %3406 = vrot.lane.b32.xlu1 %v5190_v33, %s4048_s23  ;;  %vm6409_vm11 = vmmov %vm6403_vm1 }
 0x595   :  { %vm6410_vm4 = vmmov %vm6403_vm1 }
 0x596   :  { %3323 = vmatpush.bf16.msrb.mxu2 %v3299_v22  ;;  %v5454_v22 = vld [vmem:[#allocation3 + $0x30] sm:$0xff] }
 0x597   :  { %3918 = vmatmul.msk.bf16.vlgmr.msra.gmra.mxu2 %vm6405_vm6, %v3974_v19  ;;  %v3288_v46 = vpop.permute.xlu0 %3287  ;;  %3919 = vmatmul.msk.bf16.vlgmr.msra.gmra.mxu3 %vm6399_vm3, %v3974_v19  ;;  %vm6412_vm6 = vmmov %vm6403_vm1 }
 0x598   :  { %v3401_v53 = vpop.permute.xlu1 %3400  ;;  %v3294_v15 = vsel %vm498_vm0, %v3286_v49, %v3288_v46 }
 0x599   :  { %v3414_v33 = vsel %vm378_vm15, %v3401_v53, %v5378_v56  ;;  %v3314_v28 = vsel %vm6410_vm4, %v3294_v15, 0 }
 0x59a   :  { %v5475_v15 = vpop.f32.mrf.mxu1 }
 0x59e   :  { %3921 = vmatmul.msk.bf16.vlgmr.msrb.gmra.mxu1 %vm6407_vm10, %v3974_v19  ;;  %vm6415_vm10 = vmmov %vm6399_vm3 }
 0x59f   :  { %v2045_v54 = vpop.permute.xlu0 %2044 }
 0x5a0   :  { %3920 = vmatmul.msk.bf16.vlgmr.msrb.gmra.mxu0 %vm6406_vm7, %v3974_v19  ;;  %v2051_v31 = vsel %vm879_vm13, %v2043_v60, %v2045_v54  ;;  %v3280_v43 = vpop.permute.xlu1 %3279  ;;  %v3424_v60 = vsel %vm6403_vm1, %v3414_v33, 0  ;;  %vm6414_vm7 = vmmov %vm6399_vm3 }
 0x5a1   :  { %v2064_v57 = vsub.f32 %v5255_v0, %v2051_v31  ;;  %v3290_v21 = vsel %vm498_vm0, %v3278_v20, %v3280_v43  ;;  %v3291_v11 = vsel %vm498_vm0, %v3280_v43, %v3282_v41 }
 0x5a2   :  { %v3302_v36 = vsel %vm6408_vm2, %v3290_v21, 0  ;;  %v3305_v19 = vsel %vm6409_vm11, %v3291_v11, 0  ;;  %vm6416_vm2 = vmmov %vm6399_vm3  ;;  %v5493_v33 = vpop.f32.mrf.mxu1 }
 0x5a3   :  { %2082 = vrot.lane.b32.xlu0 %v2064_v57, %s4049_s24  ;;  %3336 = vmatpush.bf16.msrb.mxu3 %v3302_v36  ;;  %vm6417_vm11 = vmmov %vm6403_vm1 }
 0x5a4   :  { %3349 = vmatpush.bf16.msra.mxu0 %v3305_v19  ;;  %vm6418_vm4 = vmmov %vm6416_vm2 }
 0x5a5   :  { %vm6419_vm1 = vmmov %vm6416_vm2 }
 0x5a7   :  { %3388 = vmatpush.bf16.msra.mxu3 %v3314_v28  ;;  %v3284_v51 = vpop.permute.xlu0 %3283 }
 0x5a8   :  { %3448 = vmatpush.bf16.msrb.mxu0 %v3424_v60  ;;  %v3292_v10 = vsel %vm498_vm0, %v3282_v41, %v3284_v51  ;;  %v3293_v20 = vsel %vm498_vm0, %v3284_v51, %v3286_v49  ;;  %v5448_v1 = vpop.permute.xlu1 %3412 }
 0x5a9   :  { %v3308_v40 = vsel %vm6411_vm5, %v3292_v10, 0  ;;  %v3311_v61 = vsel %vm6412_vm6, %v3293_v20, 0  ;;  %vm6422_vm5 = vmmov %vm6419_vm1 }
 0x5aa   :  { %3362 = vmatpush.bf16.msra.mxu1 %v3308_v40  ;;  %3375 = vmatpush.bf16.msra.mxu2 %v3311_v61  ;;  %v1904_v60 = vpop.f32.mrf.mxu1  ;;  %vm6423_vm6 = vmmov %vm6419_vm1 }
 0x5ab   :  { %3410 = vrot.lane.b32.xlu0 %v5209_v37, %s4048_s23  ;;  %v1742_v37 = vpop.f32.mrf.mxu3 }
 0x5b0   :  { %v2047_v46 = vpop.permute.xlu1 %2046 }
 0x5b1   :  { %v2052_v53 = vsel %vm879_vm13, %v2045_v54, %v2047_v46  ;;  %v2066_v41 = vsub.f32 %v5454_v22, %v2047_v46  ;;  %v5473_v54 = vpop.f32.mrf.mxu0 }
 0x5b2   :  { %v2065_v49 = vsub.f32 %v5336_v42, %v2052_v53 }
 0x5b3   :  { %2136 = vrot.lane.b32.xlu0 %v5037_v25, %s4051_s1  ;;  %2086 = vrot.lane.b32.xlu2 %v2066_v41, %s4049_s24  ;;  %v1728_v25 = vpop.f32.mrf.mxu2 }
 0x5b4   :  { %2084 = vrot.lane.b32.xlu1 %v2065_v49, %s4049_s24  ;;  %v3922_v49 = vld [vmem:[%s6157_s6 + $0x4] sm:$0xf] }
 0x5bb   :  { %2142 = vrot.lane.b32.xlu0 %v5077_v2, %s4051_s1  ;;  %2140 = vrot.lane.b32.xlu2 %v5070_v4, %s4051_s1  ;;  %v5487_v4 = vpop.f32.mrf.mxu2 }
 0x5bc   :  { %2138 = vrot.lane.b32.xlu1 %v5044_v16, %s4051_s1  ;;  %v3005_v16 = vld [vmem:[%s6157_s6] sm:$0xf] }
 0x5bd   :  { %3923 = vmatmul.msk.bf16.vlgmr.msrb.gmra.mxu2 %vm6399_vm3, %v3005_v16  ;;  %3924 = vmatmul.msk.bf16.vlgmr.msrb.gmra.mxu3 %vm6414_vm7, %v3005_v16  ;;  %vm6424_vm3 = vmmov %vm6417_vm11 }
 0x5be   :  { %3925 = vmatmul.msk.bf16.vlgmr.msra.gmra.mxu0 %vm6415_vm10, %v3005_v16  ;;  %3926 = vmatmul.msk.bf16.vlgmr.msra.gmra.mxu1 %vm6416_vm2, %v3005_v16  ;;  %vm6425_vm7 = vmmov %vm6424_vm3 }
 0x5bf   :  { %vm6426_vm10 = vmmov %vm6419_vm1 }
 0x5c0   :  { %vm6427_vm2 = vmmov %vm6419_vm1 }
 0x5c3   :  { %2146 = vrot.lane.b32.xlu2 %v5134_v23, %s4051_s1  ;;  %v5491_v23 = vpop.f32.mrf.mxu0  ;;  %v5498_v36 = vpop.f32.mrf.mxu2 }
 0x5c4   :  { %2144 = vrot.lane.b32.xlu1 %v5097_v55, %s4051_s1  ;;  %v2075_v31 = vpop.permute.xlu2 %2074  ;;  %v5489_v55 = vpop.f32.mrf.mxu3 }
 0x5cb   :  { %v1890_v28 = vpop.f32.mrf.mxu0  ;;  %v5504_v10 = vpop.f32.mrf.mxu2 }
 0x5cc   :  { %v5500_v19 = vpop.f32.mrf.mxu3  ;;  %v3409_v51 = vpop.permute.xlu2 %3408 }
 0x5cd   :  { %3927 = vmatmul.msk.bf16.vlgmr.msra.gmra.mxu2 %vm6418_vm4, %v3005_v16  ;;  %3928 = vmatmul.msk.bf16.vlgmr.msra.gmra.mxu3 %vm6419_vm1, %v3005_v16  ;;  %vm6430_vm4 = vmmov %vm6424_vm3 }
 0x5ce   :  { %3929 = vmatmul.msk.bf16.vlgmr.msrb.gmra.mxu0 %vm6422_vm5, %v3922_v49  ;;  %vm6431_vm5 = vmmov %vm6419_vm1 }
 0x5d3   :  { %v5508_v40 = vpop.f32.mrf.mxu0 }
 0x5d4   :  { %v5506_v20 = vpop.f32.mrf.mxu3 }
 0x5dc   :  { %v1932_v16 = vpop.f32.mrf.mxu3 }
 0x5e4   :  { %v5529_v24 = vpop.f32.mrf.mxu3 }
 0x5e6   :  { %v2077_v2 = vpop.permute.xlu0 %2076  ;;  %v2081_v61 = vpop.permute.xlu2 %2080 }
 0x5e7   :  { %v5478_v43 = vsel %vm498_vm0, %v2075_v31, %v2077_v2  ;;  %v1918_v31 = vpop.f32.mrf.mxu2 }
 0x5e8   :  { %6413 = vst [vmem:[#allocation45_spill] sm:$0xff] %v5478_v43 }
 0x5ee   :  { %v3405_v57 = vpop.permute.xlu0 %3404 }
 0x5ef   :  { %v3415_v21 = vsel %vm378_vm15, %v5378_v56, %v3405_v57  ;;  %v5510_v56 = vpop.f32.mrf.mxu1 }
 0x5f0   :  { %v3427_v11 = vsel %vm6417_vm11, %v3415_v21, 0  ;;  %v1946_v21 = vpop.f32.mrf.mxu0  ;;  %vm6429_vm11 = vmmov %vm6424_vm3 }
 0x5f1   :  { %3461 = vmatpush.bf16.msrb.mxu1 %v3427_v11 }
 0x5f4   :  { %3930 = vmatmul.msk.bf16.vlgmr.msrb.gmra.mxu1 %vm6423_vm6, %v3922_v49 }
 0x5f7   :  { %v1960_v11 = vpop.f32.mrf.mxu1 }
 0x5f8   :  { %v5533_v14 = vpop.f32.mrf.mxu0 }
 0x5fe   :  { %v2079_v46 = vpop.permute.xlu1 %2078 }
 0x5ff   :  { %v5513_v53 = vsel %vm498_vm0, %v2077_v2, %v2079_v46  ;;  %v5516_v41 = vsel %vm498_vm0, %v2079_v46, %v2081_v61  ;;  %v5535_v8 = vpop.f32.mrf.mxu1 }
 0x600   :  { %6420 = vst [vmem:[#allocation46_spill] sm:$0xff] %v5513_v53  ;;  %v5527_v53 = vpop.f32.mrf.mxu2 }
 0x601   :  { %6421 = vst [vmem:[#allocation47_spill] sm:$0xff] %v5516_v41 }
 0x602   :  { %6428 = vst [vmem:[#allocation48_spill] sm:$0xff] %v5535_v8 }
 0x606   :  { %v3407_v48 = vpop.permute.xlu1 %3406 }
 0x607   :  { %v3416_v43 = vsel %vm378_vm15, %v3405_v57, %v3407_v48  ;;  %v3417_v2 = vsel %vm378_vm15, %v3407_v48, %v3409_v51  ;;  %v2299_v48 = vpop.f32.mrf.mxu3 }
 0x608   :  { %v3430_v46 = vsel %vm6424_vm3, %v3416_v43, 0  ;;  %v3433_v41 = vsel %vm6425_vm7, %v3417_v2, 0  ;;  %v2286_v57 = vpop.f32.mrf.mxu2  ;;  %v2300_v6 = vadd.f32 %v2299_v48, %v1742_v37 }
 0x609   :  { %3474 = vmatpush.bf16.msrb.mxu2 %v3430_v46  ;;  %3487 = vmatpush.bf16.msrb.mxu3 %v3433_v41  ;;  %v2287_v43 = vadd.f32 %v2286_v57, %v1728_v25  ;;  %v2312_v41 = vpop.f32.mrf.mxu0  ;;  %v2325_v46 = vpop.f32.mrf.mxu1 }
 0x60a   :  { %v5542_v7 = vadd.f32 %v2300_v6, %v1904_v60  ;;  %v2313_v63 = vadd.f32 %v2312_v41, %v5473_v54  ;;  %v2326_v45 = vadd.f32 %v2325_v46, %v5475_v15 }
 0x60b   :  { %v5540_v13 = vadd.f32 %v2287_v43, %v1890_v28 }
 0x60c   :  { %3931 = vmatmul.msk.bf16.vlgmr.msrb.gmra.mxu2 %vm6426_vm10, %v3922_v49  ;;  %3932 = vmatmul.msk.bf16.vlgmr.msrb.gmra.mxu3 %vm6427_vm2, %v3922_v49  ;;  %v5546_v26 = vadd.f32 %v2313_v63, %v1918_v31  ;;  %v5548_v34 = vadd.f32 %v2326_v45, %v1932_v16 }
 0x60d   :  { %v2087_v6 = vpop.permute.xlu2 %2086 }
 0x60f   :  { %v2301_v25 = vpop.f32.mrf.mxu3 }
 0x610   :  { %v2288_v8 = vpop.f32.mrf.mxu2 }
 0x611   :  { %v2314_v28 = vpop.f32.mrf.mxu0  ;;  %v2327_v48 = vpop.f32.mrf.mxu1 }
 0x615   :  { %v2083_v12 = vpop.permute.xlu0 %2082 }
 0x616   :  { %v5538_v2 = vsel %vm498_vm0, %v2081_v61, %v2083_v12 }
 0x617   :  { %v2351_v45 = vpop.f32.mrf.mxu3 }
 0x618   :  { %v2338_v8 = vpop.f32.mrf.mxu2 }
 0x619   :  { %v2339_v15 = vadd.f32 %v2338_v8, %v5498_v36  ;;  %v2411_v16 = vpop.f32.mrf.mxu0  ;;  %v2424_v25 = vpop.f32.mrf.mxu1 }
 0x61a   :  { %v2412_v36 = vadd.f32 %v2411_v16, %v5487_v4  ;;  %v1579_v4 = vsel %vm798_vm8, %v5164_v38, %v4983_v44 }
 0x61b   :  { %v5566_v46 = vadd.f32 %v2339_v15, %v1946_v21  ;;  %v1578_v21 = vsel %vm798_vm8, %v5108_v59, %v5164_v38 }
 0x61d   :  { %v3411_v37 = vpop.permute.xlu0 %3410 }
 0x61e   :  { %v3418_v61 = vsel %vm378_vm15, %v3409_v51, %v3411_v37  ;;  %v3419_v57 = vsel %vm378_vm15, %v3411_v37, %v5448_v1  ;;  %v2352_v1 = vadd.f32 %v2351_v45, %v5500_v19  ;;  %v2425_v19 = vadd.f32 %v2424_v25, %v5489_v55 }
 0x61f   :  { %v3436_v60 = vsel %vm6429_vm11, %v3418_v61, 0  ;;  %v3439_v54 = vsel %vm6430_vm4, %v3419_v57, 0  ;;  %v5574_v37 = vadd.f32 %v2412_v36, %v5508_v40  ;;  %v2353_v61 = vpop.f32.mrf.mxu3  ;;  %v6432_v55 = vperm.slane %v6295_v39, 1 }
 0x620   :  { %3500 = vmatpush.bf16.msra.mxu0 %v3436_v60  ;;  %3513 = vmatpush.bf16.msra.mxu1 %v3439_v54  ;;  %v6433_v45 = vperm.slane %v6297_v62, 1 }
 0x621   :  { %v1590_v28 = vmul.f32 %v1578_v21, %v6432_v55  ;;  %v2413_v40 = vpop.f32.mrf.mxu0  ;;  %v2426_v54 = vpop.f32.mrf.mxu1 }
 0x622   :  { %v1591_v15 = vmul.f32 %v1579_v4, %v6433_v45  ;;  %v6441_v45 = vld [vmem:[#allocation26_spill] sm:$0xff] }
 0x623   :  { %3933 = vmatmul.msk.bf16.vlgmr.msra.gmra.mxu0 %vm6419_vm1, %v3922_v49  ;;  %3934 = vmatmul.msk.bf16.vlgmr.msra.gmra.mxu1 %vm6431_vm5, %v3922_v49  ;;  %v5568_v49 = vadd.f32 %v2352_v1, %v1960_v11  ;;  %v2340_v11 = vpop.f32.mrf.mxu2  ;;  %v1602_v39 = vrot.slane %v1590_v28, 4 }
 0x625   :  { %v2137_v63 = vpop.permute.xlu0 %2136  ;;  %v5606_v25 = vadd.f32 %v1602_v39, %v6299_v5 }
 0x626   :  { %v2160_v51 = vsub.f32 %v5359_v9, %v2137_v63  ;;  %v2085_v31 = vpop.permute.xlu1 %2084  ;;  %v2141_v9 = vpop.permute.xlu2 %2140 }
 0x627   :  { %v5561_v43 = vsel %vm498_vm0, %v2083_v12, %v2085_v31  ;;  %v5564_v41 = vsel %vm498_vm0, %v2085_v31, %v2087_v6  ;;  %v5577_v12 = vadd.f32 %v2425_v19, %v5510_v56 }
 0x628   :  { %2174 = vrot.lane.b32.xlu0 %v2160_v51, %s4048_s23  ;;  %v2450_v51 = vpop.f32.mrf.mxu3 }
 0x629   :  { %v2451_v31 = vadd.f32 %v2450_v51, %v5493_v33  ;;  %v2476_v5 = vpop.f32.mrf.mxu1 }
 0x62d   :  { %v2143_v57 = vpop.permute.xlu0 %2142 }
 0x62e   :  { %v2139_v48 = vpop.permute.xlu1 %2138  ;;  %v2150_v6 = vsel %vm963_vm14, %v2141_v9, %v2143_v57  ;;  %v2147_v1 = vpop.permute.xlu2 %2146 }
 0x62f   :  { %v2148_v56 = vsel %vm963_vm14, %v2137_v63, %v2139_v48  ;;  %v2149_v60 = vsel %vm963_vm14, %v2139_v48, %v2141_v9  ;;  %v2163_v59 = vsub.f32 %v5268_v17, %v2150_v6  ;;  %v1580_v63 = vsel %vm798_vm8, %v4983_v44, %v5116_v35  ;;  %v2437_v17 = vpop.f32.mrf.mxu2  ;;  %v2463_v9 = vpop.f32.mrf.mxu0  ;;  %v99_v6 = vld [vmem:[%s6158_s7] sm:$0xff] }
 0x630   :  { %v2161_v8 = vsub.f32 %v5247_v52, %v2148_v56  ;;  %v2162_v38 = vsub.f32 %v5265_v47, %v2149_v60  ;;  %v1603_v52 = vrot.slane %v1591_v15, 4  ;;  %v2438_v62 = vadd.f32 %v2437_v17, %v5491_v23  ;;  %v6438_v60 = vld [vmem:[#allocation15_spill] sm:$0xff]  ;;  %v6446_v17 = vld [vmem:[#allocation21_spill] sm:$0xff] }
 0x631   :  { %2180 = vrot.lane.b32.xlu0 %v2163_v59, %s4048_s23  ;;  %v6434_v47 = vperm.slane %v4416_v32, 1  ;;  %v1581_v44 = vsel %vm798_vm8, %v5116_v35, %v5176_v29  ;;  %v2166_v36 = vsub.f32 %v5454_v22, %v2147_v1  ;;  %v5618_v32 = vadd.f32 %v2451_v31, %v5529_v24  ;;  %v2478_v56 = vpop.f32.mrf.mxu1  ;;  %v6439_v59 = vld [vmem:[#allocation19_spill] sm:$0xff] }
 0x632   :  { %2176 = vrot.lane.b32.xlu1 %v2161_v8, %s4048_s23  ;;  %2178 = vrot.lane.b32.xlu2 %v2162_v38, %s4048_s23  ;;  %v5615_v33 = vadd.f32 %v2438_v62, %v5527_v53  ;;  %v2464_v29 = vadd.f32 %v2463_v9, %v5504_v10  ;;  %v2477_v35 = vadd.f32 %v2476_v5, %v5506_v20  ;;  %v6435_v24 = vperm.slane %v4447_v30, 1  ;;  %v6437_v10 = vld [vmem:[#allocation48_spill] sm:$0xff]  ;;  %v2452_v30 = vpop.f32.mrf.mxu3 }
 0x633   :  { %v1592_v16 = vmul.f32 %v1580_v63, %v6434_v47  ;;  %v5625_v22 = vadd.f32 %v1603_v52, %v6303_v18  ;;  %v5631_v53 = vadd.f32 %v1603_v52, %v6305_v3  ;;  %v3019_v48 = vrot.slane %v5606_v25, 4  ;;  %v6443_v38 = vld [vmem:[#allocation44_spill] sm:$0xff]  ;;  %v6444_v63 = vld [vmem:[#allocation17_spill] sm:$0xff] }
 0x634   :  { %v1594_v4 = vmul.f32 %v5180_v50, %v6435_v24  ;;  %v5641_v18 = vadd.f32 %v2464_v29, %v5533_v14  ;;  %v6442_v15 = vperm.slane %v6441_v45, 1  ;;  %v6448_v62 = vld [vmem:[#allocation16_spill] sm:$0xff] }
 0x635   :  { %v1604_v3 = vrot.slane %v1592_v16, 4  ;;  %v3022_v50 = vrot.slane %v5625_v22, 4  ;;  %v6449_v47 = vld [vmem:[#allocation20_spill] sm:$0xff] }
 0x636   :  { %v2145_v19 = vpop.permute.xlu1 %2144  ;;  %v1606_v55 = vrot.slane %v1594_v4, 4  ;;  %v6450_v4 = vld [vmem:[#allocation18_spill] sm:$0xff] }
 0x637   :  { %v2151_v21 = vsel %vm963_vm14, %v2143_v57, %v2145_v19  ;;  %v2152_v23 = vsel %vm963_vm14, %v2145_v19, %v2147_v1  ;;  %v5628_v57 = vadd.f32 %v1602_v39, %v6301_v58  ;;  %v5644_v58 = vadd.f32 %v2477_v35, %v6437_v10  ;;  %v2439_v20 = vpop.f32.mrf.mxu2  ;;  %v2465_v14 = vpop.f32.mrf.mxu0 }
 0x638   :  { %v2164_v11 = vsub.f32 %v5255_v0, %v2151_v21  ;;  %v2165_v61 = vsub.f32 %v5336_v42, %v2152_v23  ;;  %v6436_v0 = vperm.slane %v4413_v27, 1  ;;  %v3023_v27 = vrot.slane %v5631_v53, 4 }
 0x639   :  { %2186 = vrot.lane.b32.xlu0 %v2166_v36, %s4048_s23  ;;  %v3020_v40 = vrot.slane %v5628_v57, 4  ;;  %v5655_v54 = vadd.f32 %v1604_v3, %v6438_v60  ;;  %v5658_v8 = vadd.f32 %v1604_v3, %v6439_v59  ;;  %v1595_v39 = vmul.f32 %v6443_v38, %v6442_v15  ;;  %v2804_v24 = vpop.f32.mrf.mxu1 }
 0x63a   :  { %v1593_v42 = vmul.f32 %v1581_v44, %v6436_v0  ;;  %2182 = vrot.lane.b32.xlu1 %v2164_v11, %s4048_s23  ;;  %2184 = vrot.lane.b32.xlu2 %v2165_v61, %s4048_s23  ;;  %v5664_v1 = vadd.f32 %v1606_v55, %v6444_v63  ;;  %v5667_v51 = vadd.f32 %v1606_v55, %v6446_v17  ;;  %v2776_v9 = vpop.f32.mrf.mxu3 }
 0x63b   :  { %6440 = vst [vmem:[#allocation48_spill] sm:$0xff] %v5658_v8  ;;  %v3024_v52 = vsel %vm123_vm9, %v3022_v50, %v3023_v27  ;;  %v3021_v44 = vsel %vm123_vm9, %v3019_v48, %v3020_v40  ;;  %v3025_v36 = vrot.slane %v5655_v54, 4  ;;  %v1607_v21 = vrot.slane %v1595_v39, 4 }
 0x63c   :  { %v1605_v28 = vrot.slane %v1593_v42, 4  ;;  %6445 = vst [vmem:[#allocation15_spill] sm:$0xff] %v5664_v1  ;;  %v3031_v23 = vrot.slane %v5664_v1, 4  ;;  %v3032_v5 = vrot.slane %v5667_v51, 4  ;;  %v3026_v11 = vrot.slane %v5658_v8, 4  ;;  %v6452_v42 = vld [vmem:[#allocation22_spill] sm:$0xff] }
 0x63d   :  { %6447 = vst [vmem:[#allocation19_spill] sm:$0xff] %v5667_v51  ;;  %v5686_v0 = vadd.f32 %v1607_v21, %v6450_v4  ;;  %v5689_v10 = vadd.f32 %v1607_v21, %v6452_v42 }
 0x63e   :  { %v5671_v31 = vadd.f32 %v1605_v28, %v6448_v62  ;;  %v5674_v16 = vadd.f32 %v1605_v28, %v6449_v47  ;;  %v3033_v3 = vsel %vm123_vm9, %v3031_v23, %v3032_v5  ;;  %v3027_v20 = vsel %vm123_vm9, %v3025_v36, %v3026_v11 }
 0x63f   :  { %v2762_v19 = vpop.f32.mrf.mxu2  ;;  %v2790_v35 = vpop.f32.mrf.mxu0  ;;  %6451 = vst [vmem:[#allocation26_spill] sm:$0xff] %v5686_v0  ;;  %v3034_v27 = vrot.slane %v5686_v0, 4  ;;  %v3035_v28 = vrot.slane %v5689_v10, 4 }
 0x640   :  { %v3028_v61 = vrot.slane %v5671_v31, 4  ;;  %v3029_v29 = vrot.slane %v5674_v16, 4  ;;  %6453 = vst [vmem:[#allocation44_spill] sm:$0xff] %v5689_v10 }
 0x641   :  { %3039 = vrot.lane.b32.xlu0 %v3024_v52, %s4046_s0  ;;  %v5701_v40 = vpop.f32.mrf.mxu1  ;;  %v3036_v14 = vsel %vm123_vm9, %v3034_v27, %v3035_v28 }
 0x642   :  { %2488 = vperm.xlu1 %3990, %v99_v6   ;;  %3037 = vrot.lane.b32.xlu2 %v3021_v44, %s4046_s0  ;;  %v3030_v30 = vsel %vm123_vm9, %v3028_v61, %v3029_v29  ;;  %v2778_v50 = vpop.f32.mrf.mxu3 }
 0x647   :  { %v2764_v55 = vpop.f32.mrf.mxu2  ;;  %v5699_v48 = vpop.f32.mrf.mxu0 }
 0x649   :  { %3045 = vrot.lane.b32.xlu0 %v3033_v3, %s4046_s0  ;;  %v2944_v59 = vpop.f32.mrf.mxu1 }
 0x64a   :  { %3041 = vrot.lane.b32.xlu1 %v3027_v20, %s4046_s0  ;;  %3043 = vrot.lane.b32.xlu2 %v3030_v30, %s4046_s0  ;;  %v2832_v56 = vpop.f32.mrf.mxu3 }
 0x64f   :  { %v2818_v6 = vpop.f32.mrf.mxu2  ;;  %v2930_v60 = vpop.f32.mrf.mxu0 }
 0x651   :  { %3077 = vrot.lane.b32.xlu0 %v3024_v52, %s4053_s15  ;;  %v2946_v39 = vpop.f32.mrf.mxu1 }
 0x652   :  { %3047 = vrot.lane.b32.xlu1 %v3036_v14, %s4046_s0  ;;  %3075 = vrot.lane.b32.xlu2 %v3021_v44, %s4053_s15  ;;  %v5712_v15 = vpop.f32.mrf.mxu3 }
 0x657   :  { %v5710_v45 = vpop.f32.mrf.mxu2  ;;  %v2932_v38 = vpop.f32.mrf.mxu0 }
 0x659   :  { %3083 = vrot.lane.b32.xlu0 %v3033_v3, %s4053_s15  ;;  %v3000_v47 = vpop.f32.mrf.mxu1 }
 0x65a   :  { %3079 = vrot.lane.b32.xlu1 %v3027_v20, %s4053_s15  ;;  %3081 = vrot.lane.b32.xlu2 %v3030_v30, %s4053_s15  ;;  %v2972_v17 = vpop.f32.mrf.mxu3 }
 0x65f   :  { %v2958_v63 = vpop.f32.mrf.mxu2  ;;  %v2986_v62 = vpop.f32.mrf.mxu0 }
 0x661   :  { %3177 = vrot.lane.b32.xlu0 %v3024_v52, %s4051_s1  ;;  %v3002_v5 = vpop.f32.mrf.mxu1 }
 0x662   :  { %3085 = vrot.lane.b32.xlu1 %v3036_v14, %s4053_s15  ;;  %3175 = vrot.lane.b32.xlu2 %v3021_v44, %s4051_s1  ;;  %v2974_v21 = vpop.f32.mrf.mxu3 }
 0x667   :  { %v2960_v36 = vpop.f32.mrf.mxu2  ;;  %v2988_v23 = vpop.f32.mrf.mxu0 }
 0x669   :  { %3183 = vrot.lane.b32.xlu0 %v3033_v3, %s4051_s1  ;;  %v3364_v27 = vpop.f32.mrf.mxu1 }
 0x66a   :  { %3179 = vrot.lane.b32.xlu1 %v3027_v20, %s4051_s1  ;;  %3181 = vrot.lane.b32.xlu2 %v3030_v30, %s4051_s1  ;;  %v3338_v11 = vpop.f32.mrf.mxu3  ;;  %v3365_v20 = vadd.f32 %v3364_v27, %v2804_v24 }
 0x66b   :  { %v3339_v44 = vadd.f32 %v3338_v11, %v2776_v9 }
 0x66c   :  { %v5727_v30 = vadd.f32 %v3365_v20, %v2972_v17 }
 0x66d   :  { %v5723_v42 = vadd.f32 %v3339_v44, %v2944_v59 }
 0x66f   :  { %v3325_v52 = vpop.f32.mrf.mxu2  ;;  %v3351_v29 = vpop.f32.mrf.mxu0 }
 0x670   :  { %v3326_v61 = vadd.f32 %v3325_v52, %v2762_v19  ;;  %v3352_v3 = vadd.f32 %v3351_v29, %v2790_v35 }
 0x672   :  { %3185 = vrot.lane.b32.xlu1 %v3036_v14, %s4051_s1  ;;  %v5721_v4 = vadd.f32 %v3326_v61, %v2930_v60  ;;  %v5725_v28 = vadd.f32 %v3352_v3, %v2958_v63  ;;  %v3340_v0 = vpop.f32.mrf.mxu3  ;;  %v3366_v14 = vpop.f32.mrf.mxu1 }
 0x677   :  { %v3327_v10 = vpop.f32.mrf.mxu2  ;;  %v3353_v51 = vpop.f32.mrf.mxu0 }
 0x67a   :  { %v3390_v8 = vpop.f32.mrf.mxu3  ;;  %v3463_v11 = vpop.f32.mrf.mxu1 }
 0x67b   :  { %v3391_v9 = vadd.f32 %v3390_v8, %v2832_v56  ;;  %v3464_v24 = vadd.f32 %v3463_v11, %v2778_v50 }
 0x67d   :  { %v5731_v59 = vadd.f32 %v3391_v9, %v3000_v47  ;;  %v5735_v17 = vadd.f32 %v3464_v24, %v2946_v39 }
 0x67f   :  { %v3377_v1 = vpop.f32.mrf.mxu2  ;;  %v3450_v52 = vpop.f32.mrf.mxu0 }
 0x680   :  { %v3378_v19 = vadd.f32 %v3377_v1, %v2818_v6  ;;  %v3451_v35 = vadd.f32 %v3450_v52, %v2764_v55 }
 0x682   :  { %v5729_v60 = vadd.f32 %v3378_v19, %v2986_v62  ;;  %v5733_v63 = vadd.f32 %v3451_v35, %v2932_v38  ;;  %v3392_v0 = vpop.f32.mrf.mxu3  ;;  %v3465_v44 = vpop.f32.mrf.mxu1 }
 0x687   :  { %v3379_v10 = vpop.f32.mrf.mxu2  ;;  %v3452_v61 = vpop.f32.mrf.mxu0 }
 0x68c   :  { %v2179_v51 = vpop.permute.xlu2 %2178 }
 0x68f   :  { %v3476_v29 = vpop.f32.mrf.mxu2  ;;  %v3489_v1 = vpop.f32.mrf.mxu3 }
 0x690   :  { %v3477_v6 = vadd.f32 %v3476_v29, %v5699_v48  ;;  %v3490_v56 = vadd.f32 %v3489_v1, %v5701_v40 }
 0x692   :  { %v3521_v62 = vadd.f32 %v3477_v6, %v2960_v36  ;;  %v3522_v55 = vadd.f32 %v3490_v56, %v2974_v21 }
 0x694   :  { %v2185_v8 = vpop.permute.xlu2 %2184 }
 0x697   :  { %v3478_v50 = vpop.f32.mrf.mxu2  ;;  %v3491_v38 = vpop.f32.mrf.mxu3 }
 0x69a   :  { %v2175_v47 = vpop.permute.xlu0 %2174 }
 0x69c   :  { %v3038_v3 = vpop.permute.xlu2 %3037 }
 0x69d   :  { %3061 = vst.msk [vmem:[#allocation3] sm:$0xff] %vm1463_vm12, %v3038_v3  ;;  %vm6454_vm12 = vcmask 146432  }
 0x69e   :  { %vm6478_vm8 = vmmov %vm6454_vm12 }
 0x69f   :  { %vm6479_vm6 = vmmov %vm6478_vm8 }
 0x6a0   :  { %v3502_v39 = vpop.f32.mrf.mxu0  ;;  %v3515_v27 = vpop.f32.mrf.mxu1  ;;  %vm6480_vm3 = vmmov %vm6479_vm6 }
 0x6a1   :  { %v3503_v20 = vadd.f32 %v3502_v39, %v5710_v45  ;;  %v3516_v14 = vadd.f32 %v3515_v27, %v5712_v15  ;;  %vm6481_vm7 = vmmov %vm6480_vm3 }
 0x6a2   :  { %vm6482_vm10 = vmmov %vm6480_vm3 }
 0x6a3   :  { %v3523_v19 = vadd.f32 %v3503_v20, %v2988_v23  ;;  %v3524_v9 = vadd.f32 %v3516_v14, %v3002_v5  ;;  %v2181_v52 = vpop.permute.xlu0 %2180 }
 0x6a4   :  { %v2177_v48 = vpop.permute.xlu1 %2176  ;;  %v5743_v40 = vsel %vm378_vm15, %v2179_v51, %v2181_v52  ;;  %v3044_v36 = vpop.permute.xlu2 %3043  ;;  %v3068_v23 = vld [vmem:[#allocation3] sm:$0xff] }
 0x6a5   :  { %v5746_v21 = vsel %vm378_vm15, %v2175_v47, %v2177_v48  ;;  %v5749_v35 = vsel %vm378_vm15, %v2177_v48, %v2179_v51 }
 0x6a8   :  { %v3504_v11 = vpop.f32.mrf.mxu0  ;;  %v3517_v24 = vpop.f32.mrf.mxu1 }
 0x6ab   :  { %v2187_v10 = vpop.permute.xlu0 %2186 }
 0x6ac   :  { %v2183_v45 = vpop.permute.xlu1 %2182  ;;  %v5752_v15 = vsel %vm378_vm15, %v2185_v8, %v2187_v10  ;;  %v3076_v5 = vpop.permute.xlu2 %3075 }
 0x6ad   :  { %v5755_v0 = vsel %vm378_vm15, %v2181_v52, %v2183_v45  ;;  %v3099_v61 = vsub.f32 %v3068_v23, %v3076_v5  ;;  %v5758_v44 = vsel %vm378_vm15, %v2183_v45, %v2185_v8 }
 0x6af   :  { %3113 = vrot.lane.b32.xlu2 %v3099_v61, %s4049_s24 }
 0x6b3   :  { %v3040_v51 = vpop.permute.xlu0 %3039 }
 0x6b4   :  { %v2489_v29 = vpop.permute.xlu1 %2488  ;;  %v3049_v1 = vsel %vm6454_vm12, %v3038_v3, %v3040_v51 }
 0x6b5   :  { %v5763_v6 = vmul.f32 %v2489_v29, %v5540_v13  ;;  %v5766_v56 = vmul.f32 %v2489_v29, %v5542_v7  ;;  %3062 = vst [vmem:[#allocation3 + $0x8] sm:$0xff] %v3049_v1  ;;  %v5769_v47 = vmul.f32 %v2489_v29, %v5546_v26  ;;  %v5772_v50 = vmul.f32 %v2489_v29, %v5548_v34 }
 0x6b6   :  { %v5775_v8 = vmul.f32 %v2489_v29, %v5566_v46  ;;  %v5778_v38 = vmul.f32 %v2489_v29, %v5568_v49  ;;  %v5781_v3 = vmul.f32 %v2489_v29, %v5574_v37  ;;  %v5784_v13 = vmul.f32 %v2489_v29, %v5577_v12 }
 0x6b7   :  { %6455 = vst [vmem:[#allocation17_spill] sm:$0xff] %v5766_v56  ;;  %v5787_v7 = vmul.f32 %v2489_v29, %v5615_v33  ;;  %v5790_v26 = vmul.f32 %v2489_v29, %v5618_v32  ;;  %v5793_v34 = vmul.f32 %v2489_v29, %v5641_v18  ;;  %v5796_v46 = vmul.f32 %v2489_v29, %v5644_v58 }
 0x6b8   :  { %6456 = vst [vmem:[#allocation21_spill] sm:$0xff] %v5769_v47  ;;  %v5799_v49 = vmul.f32 %v5721_v4, %v2489_v29  ;;  %v5802_v37 = vmul.f32 %v5723_v42, %v2489_v29  ;;  %v5805_v12 = vmul.f32 %v5725_v28, %v2489_v29  ;;  %v5808_v33 = vmul.f32 %v5727_v30, %v2489_v29 }
 0x6b9   :  { %6457 = vst [vmem:[#allocation16_spill] sm:$0xff] %v5772_v50  ;;  %v5811_v32 = vmul.f32 %v5729_v60, %v2489_v29  ;;  %v5814_v18 = vmul.f32 %v5731_v59, %v2489_v29  ;;  %v5817_v58 = vmul.f32 %v5733_v63, %v2489_v29  ;;  %v5820_v4 = vmul.f32 %v5735_v17, %v2489_v29  ;;  %v3082_v17 = vpop.permute.xlu2 %3081  ;;  %v6504_v50 = vld [vmem:[#allocation41_spill] sm:$0xff] }
 0x6ba   :  { %6458 = vst [vmem:[#allocation20_spill] sm:$0xff] %v5775_v8  ;;  %v5822_v27 = vmul.f32 %v3521_v62, %v2489_v29  ;;  %v5824_v28 = vmul.f32 %v3522_v55, %v2489_v29  ;;  %v5826_v30 = vmul.f32 %v3523_v19, %v2489_v29  ;;  %v5828_v20 = vmul.f32 %v3524_v9, %v2489_v29  ;;  %v6503_v8 = vld [vmem:[#allocation40_spill] sm:$0xff] }
 0x6bb   :  { %6459 = vst [vmem:[#allocation18_spill] sm:$0xff] %v5778_v38  ;;  %v3046_v42 = vpop.permute.xlu0 %3045 }
 0x6bc   :  { %6460 = vst [vmem:[#allocation22_spill] sm:$0xff] %v5781_v3  ;;  %v3042_v39 = vpop.permute.xlu1 %3041  ;;  %v3052_v60 = vsel %vm6478_vm8, %v3044_v36, %v3046_v42 }
 0x6bd   :  { %6461 = vst [vmem:[#allocation49_spill] sm:$0xff] %v5784_v13  ;;  %v3050_v59 = vsel %vm6479_vm6, %v3040_v51, %v3042_v39  ;;  %v3051_v63 = vsel %vm6480_vm3, %v3042_v39, %v3044_v36 }
 0x6be   :  { %6462 = vst [vmem:[#allocation50_spill] sm:$0xff] %v5787_v7 }
 0x6bf   :  { %6463 = vst [vmem:[#allocation51_spill] sm:$0xff] %v5790_v26 }
 0x6c0   :  { %6464 = vst [vmem:[#allocation52_spill] sm:$0xff] %v5793_v34 }
 0x6c1   :  { %6465 = vst [vmem:[#allocation53_spill] sm:$0xff] %v5796_v46  ;;  %v3176_v9 = vpop.permute.xlu2 %3175 }
 0x6c2   :  { %6466 = vst [vmem:[#allocation54_spill] sm:$0xff] %v5799_v49  ;;  %v3199_v36 = vsub.f32 %v3068_v23, %v3176_v9 }
 0x6c3   :  { %6467 = vst [vmem:[#allocation55_spill] sm:$0xff] %v5802_v37  ;;  %v3078_v14 = vpop.permute.xlu0 %3077 }
 0x6c4   :  { %6468 = vst [vmem:[#allocation56_spill] sm:$0xff] %v5805_v12  ;;  %v3048_v52 = vpop.permute.xlu1 %3047  ;;  %v3087_v62 = vsel %vm879_vm13, %v3076_v5, %v3078_v14 }
 0x6c5   :  { %6469 = vst [vmem:[#allocation57_spill] sm:$0xff] %v5808_v33  ;;  %v3053_v55 = vsel %vm6481_vm7, %v3046_v42, %v3048_v52  ;;  %v3100_v19 = vsub.f32 %v3049_v1, %v3087_v62 }
 0x6c6   :  { %6470 = vst [vmem:[#allocation58_spill] sm:$0xff] %v5811_v32  ;;  %v6501_v32 = vld [vmem:[#allocation27_spill] sm:$0xff] }
 0x6c7   :  { %6471 = vst [vmem:[#allocation59_spill] sm:$0xff] %v5814_v18  ;;  %3115 = vrot.lane.b32.xlu0 %v3100_v19, %s4049_s24 }
 0x6c8   :  { %6472 = vst [vmem:[#allocation60_spill] sm:$0xff] %v5817_v58 }
 0x6c9   :  { %6473 = vst [vmem:[#allocation61_spill] sm:$0xff] %v5820_v4  ;;  %v3182_v39 = vpop.permute.xlu2 %3181  ;;  %v6499_v4 = vld [vmem:[#allocation39_spill] sm:$0xff] }
 0x6ca   :  { %6474 = vst [vmem:[#allocation62_spill] sm:$0xff] %v5822_v27 }
 0x6cb   :  { %6475 = vst [vmem:[#allocation63_spill] sm:$0xff] %v5824_v28  ;;  %v3084_v48 = vpop.permute.xlu0 %3083  ;;  %v6496_v28 = vld [vmem:[#allocation11_spill] sm:$0xff] }
 0x6cc   :  { %6476 = vst [vmem:[#allocation64_spill] sm:$0xff] %v5826_v30  ;;  %v3080_v11 = vpop.permute.xlu1 %3079  ;;  %v3090_v24 = vsel %vm879_vm13, %v3082_v17, %v3084_v48  ;;  %v6495_v30 = vld [vmem:[#allocation13_spill] sm:$0xff] }
 0x6cd   :  { %6477 = vst [vmem:[#allocation65_spill] sm:$0xff] %v5828_v20  ;;  %v3103_v29 = vsub.f32 %v3052_v60, %v3090_v24  ;;  %v3088_v23 = vsel %vm879_vm13, %v3078_v14, %v3080_v11  ;;  %v3089_v24 = vsel %vm879_vm13, %v3080_v11, %v3082_v17  ;;  %v6484_v11 = vld [vmem:[#allocation45_spill] sm:$0xff] }
 0x6ce   :  { %3065 = vst [vmem:[#allocation3 + $0x20] sm:$0xff] %v3052_v60 }
 0x6cf   :  { %3063 = vst [vmem:[#allocation3 + $0x10] sm:$0xff] %v3050_v59  ;;  %3213 = vrot.lane.b32.xlu0 %v3199_v36, %s4048_s23  ;;  %v3101_v36 = vsub.f32 %v3050_v59, %v3088_v23 }
 0x6d0   :  { %3064 = vst [vmem:[#allocation3 + $0x18] sm:$0xff] %v3051_v63 }
 0x6d1   :  { %3067 = vst.msk [vmem:[#allocation3 + $0x30] sm:$0xff] %vm6482_vm10, %v3048_v52 }
 0x6d2   :  { %3066 = vst [vmem:[#allocation3 + $0x28] sm:$0xff] %v3053_v55 }
 0x6d3   :  { %v3178_v10 = vpop.permute.xlu0 %3177 }
 0x6d4   :  { %v3086_v61 = vpop.permute.xlu1 %3085  ;;  %v3187_v5 = vsel %vm963_vm14, %v3176_v9, %v3178_v10 }
 0x6d5   :  { %v3200_v42 = vsub.f32 %v3049_v1, %v3187_v5  ;;  %v3091_v1 = vsel %vm879_vm13, %v3084_v48, %v3086_v61  ;;  %v6483_v48 = vld [vmem:[#allocation28_spill] sm:$0xff] }
 0x6d7   :  { %3121 = vrot.lane.b32.xlu0 %v3103_v29, %s4049_s24  ;;  %3215 = vrot.lane.b32.xlu1 %v3200_v42, %s4048_s23  ;;  %v3102_v29 = vsub.f32 %v3051_v63, %v3089_v24 }
 0x6d8   :  { %v3074_v45 = vld [vmem:[#allocation3 + $0x30] sm:$0xff] }
 0x6d9   :  { %v3105_v51 = vsub.f32 %v3074_v45, %v3086_v61 }
 0x6db   :  { %3125 = vrot.lane.b32.xlu2 %v3105_v51, %s4049_s24  ;;  %v3104_v51 = vsub.f32 %v3053_v55, %v3091_v1 }
 0x6dc   :  { %v3180_v52 = vpop.permute.xlu1 %3179 }
 0x6dd   :  { %v3188_v62 = vsel %vm963_vm14, %v3178_v10, %v3180_v52  ;;  %v3189_v19 = vsel %vm963_vm14, %v3180_v52, %v3182_v39  ;;  %v3184_v10 = vpop.permute.xlu0 %3183  ;;  %v6486_v52 = vld [vmem:[#allocation46_spill] sm:$0xff] }
 0x6de   :  { %v3201_v20 = vsub.f32 %v3050_v59, %v3188_v62  ;;  %v3202_v9 = vsub.f32 %v3051_v63, %v3189_v19  ;;  %v3190_v59 = vsel %vm963_vm14, %v3182_v39, %v3184_v10  ;;  %v100_v63 = vld [vmem:[%s6159_s8] sm:$0xff]  ;;  %v6485_v39 = vld [vmem:[#allocation30_spill] sm:$0xff]  ;;  %s4054_s8 = smov [#allocation8]  }
 0x6df   :  { %3117 = vrot.lane.b32.xlu1 %v3101_v36, %s4049_s24  ;;  %v2101_v62 = vmul.f32 %v6486_v52, %v6485_v39  ;;  %v6489_v36 = vld [vmem:[#allocation29_spill] sm:$0xff] }
 0x6e0   :  { %3219 = vrot.lane.b32.xlu0 %v3202_v9, %s4048_s23  ;;  %v2103_v9 = vmul.f32 %v5538_v2, %v6489_v36  ;;  %v6494_v52 = vld [vmem:[#allocation25_spill] sm:$0xff] }
 0x6e3   :  { %3217 = vrot.lane.b32.xlu2 %v3201_v20, %s4048_s23  ;;  %v3203_v20 = vsub.f32 %v3052_v60, %v3190_v59  ;;  %v6487_v60 = vld [vmem:[#allocation31_spill] sm:$0xff] }
 0x6e4   :  { %v3186_v14 = vpop.permute.xlu1 %3185  ;;  %v6491_v59 = vld [vmem:[#allocation23_spill] sm:$0xff] }
 0x6e5   :  { %v3205_v5 = vsub.f32 %v3074_v45, %v3186_v14  ;;  %v3191_v42 = vsel %vm963_vm14, %v3184_v10, %v3186_v14  ;;  %v2100_v45 = vmul.f32 %v6484_v11, %v6483_v48  ;;  %v2113_v14 = vrot.slane %v2101_v62, 4 }
 0x6e6   :  { %v3204_v23 = vsub.f32 %v3053_v55, %v3191_v42  ;;  %v6488_v55 = vld [vmem:[#allocation47_spill] sm:$0xff] }
 0x6e7   :  { %3123 = vrot.lane.b32.xlu1 %v3104_v51, %s4049_s24  ;;  %v2102_v19 = vmul.f32 %v6488_v55, %v6487_v60  ;;  %v2112_v24 = vrot.slane %v2100_v45, 4  ;;  %v2115_v51 = vrot.slane %v2103_v9, 4  ;;  %v2125_v55 = vadd.f32 %v2113_v14, %v6494_v52  ;;  %v6497_v45 = vld [vmem:[#allocation12_spill] sm:$0xff] }
 0x6e8   :  { %3225 = vrot.lane.b32.xlu0 %v3205_v5, %s4048_s23  ;;  %v2131_v27 = vadd.f32 %v2113_v14, %v6496_v28  ;;  %v6502_v14 = vld [vmem:[#allocation32_spill] sm:$0xff] }
 0x6e9   :  { %v2114_v5 = vrot.slane %v2102_v19, 4  ;;  %v2124_v42 = vadd.f32 %v2112_v24, %v6491_v59  ;;  %v6498_v19 = vld [vmem:[#allocation14_spill] sm:$0xff]  ;;  %v2133_v58 = vadd.f32 %v2115_v51, %v6499_v4  ;;  %v2523_v34 = vrot.slane %v2125_v55, 4 }
 0x6ea   :  { %v2127_v9 = vadd.f32 %v2115_v51, %v6498_v19  ;;  %v2524_v26 = vrot.slane %v2131_v27, 4 }
 0x6eb   :  { %3119 = vrot.lane.b32.xlu2 %v3102_v29, %s4049_s24  ;;  %v6490_v29 = vld [vmem:[#allocation35_spill] sm:$0xff]  ;;  %v2126_v2 = vadd.f32 %v2114_v5, %v6495_v30  ;;  %v2132_v62 = vadd.f32 %v2114_v5, %v6497_v45  ;;  %v2520_v37 = vrot.slane %v2124_v42, 4  ;;  %v2201_v5 = vmul.f32 %v5749_v35, %v6502_v14 }
 0x6ec   :  { %v2104_v10 = vmul.f32 %v5561_v43, %v6490_v29  ;;  %v6500_v43 = vld [vmem:[#allocation33_spill] sm:$0xff]  ;;  %v2529_v13 = vrot.slane %v2127_v9, 4  ;;  %v2530_v3 = vrot.slane %v2133_v58, 4  ;;  %v6508_v58 = vld [vmem:[#allocation34_spill] sm:$0xff] }
 0x6ed   :  { %v2202_v18 = vmul.f32 %v5743_v40, %v6500_v43  ;;  %v2526_v7 = vrot.slane %v2126_v2, 4  ;;  %v2527_v51 = vrot.slane %v2132_v62, 4  ;;  %v2203_v2 = vmul.f32 %v5755_v0, %v6508_v58 }
 0x6ee   :  { %v2116_v12 = vrot.slane %v2104_v10, 4  ;;  %v6505_v10 = vld [vmem:[#allocation38_spill] sm:$0xff] }
 0x6ef   :  { %3221 = vrot.lane.b32.xlu1 %v3203_v20, %s4048_s23  ;;  %v6492_v20 = vld [vmem:[#allocation24_spill] sm:$0xff]  ;;  %v2214_v40 = vrot.slane %v2202_v18, 4  ;;  %v2205_v42 = vmul.f32 %v5752_v15, %v6505_v10  ;;  %v2213_v18 = vrot.slane %v2201_v5, 4  ;;  %v5918_v15 = vsel %vm123_vm9, %v2526_v7, %v2527_v51 }
 0x6f0   :  { %v5897_v47 = vadd.f32 %v2116_v12, %v6504_v50 }
 0x6f3   :  { %3223 = vrot.lane.b32.xlu2 %v3204_v23, %s4048_s23  ;;  %v2130_v23 = vadd.f32 %v2112_v24, %v6492_v20  ;;  %v2200_v24 = vmul.f32 %v5746_v21, %v6501_v32  ;;  %v5894_v21 = vadd.f32 %v2116_v12, %v6503_v8  ;;  %v5915_v12 = vsel %vm123_vm9, %v2523_v34, %v2524_v26  ;;  %s6145_s23 = sshll.u32 %s4054_s8, 4  ;;  %s3688_s23 = int_to_ptr.vmem [resolvable:$true] %s6145_s23 }
 0x6f4   :  { %v5929_v26 = vsel %vm123_vm9, %v2529_v13, %v2530_v3  ;;  %v2533_v34 = vrot.slane %v5897_v47, 4 }
 0x6f5   :  { %v2521_v49 = vrot.slane %v2130_v23, 4  ;;  %v2212_v38 = vrot.slane %v2200_v24, 4  ;;  %v6506_v23 = vld [vmem:[#allocation42_spill] sm:$0xff]  ;;  %v2226_v24 = vadd.f32 %v2214_v40, %v6495_v30  ;;  %v2532_v7 = vrot.slane %v5894_v21, 4 }
 0x6f7   :  { %2499 = vperm.xlu1 %3990, %v100_v63   ;;  %v6493_v63 = vld [vmem:[#allocation36_spill] sm:$0xff]  ;;  %v5912_v62 = vsel %vm123_vm9, %v2520_v37, %v2521_v49  ;;  %v2224_v5 = vadd.f32 %v2212_v38, %v6491_v59  ;;  %v2217_v37 = vrot.slane %v2205_v42, 4  ;;  %v2215_v59 = vrot.slane %v2203_v2, 4 }
 0x6f8   :  { %v2105_v11 = vmul.f32 %v5564_v41, %v6493_v63  ;;  %v2604_v13 = vrot.slane %v2226_v24, 4 }
 0x6f9   :  { %v2598_v47 = vrot.slane %v2224_v5, 4 }
 0x6fa   :  { %v2117_v46 = vrot.slane %v2105_v11, 4  ;;  %v6507_v11 = vld [vmem:[#allocation43_spill] sm:$0xff] }
 0x6fc   :  { %v5904_v27 = vadd.f32 %v2117_v46, %v6506_v23  ;;  %v5907_v55 = vadd.f32 %v2117_v46, %v6507_v11  ;;  %v2232_v46 = vadd.f32 %v2214_v40, %v6497_v45  ;;  %v2225_v45 = vadd.f32 %v2213_v18, %v6494_v52 }
 0x6fd   :  { %v2231_v40 = vadd.f32 %v2213_v18, %v6496_v28  ;;  %v2227_v28 = vadd.f32 %v2215_v59, %v6498_v19 }
 0x6fe   :  { %v2536_v30 = vrot.slane %v5907_v55, 4  ;;  %v2605_v21 = vrot.slane %v2232_v46, 4  ;;  %v2235_v55 = vadd.f32 %v2217_v37, %v6507_v11 }
 0x6ff   :  { %v2602_v24 = vrot.slane %v2231_v40, 4 }
 0x709   :  { %v3114_v17 = vpop.permute.xlu2 %3113 }
 0x735   :  { %v5863_v61 = vpop.permute.xlu2 %3125 }
 0x739   :  { %v5871_v1 = vpop.permute.xlu0 %3115 }
 0x73a   :  { %v3127_v35 = vsel %vm498_vm0, %v3114_v17, %v5871_v1  ;;  %v6509_v17 = vld [vmem:[#allocation37_spill] sm:$0xff] }
 0x73b   :  { %v2204_v9 = vmul.f32 %v5758_v44, %v6509_v17  ;;  %v3139_v0 = vmul.f32 %v3127_v35, %v6483_v48  ;;  %v2535_v44 = vrot.slane %v5904_v27, 4  ;;  %v2230_v48 = vadd.f32 %v2212_v38, %v6492_v20 }
 0x73c   :  { %v2229_v27 = vadd.f32 %v2217_v37, %v6506_v23  ;;  %v2601_v38 = vrot.slane %v2225_v45, 4  ;;  %v2233_v20 = vadd.f32 %v2215_v59, %v6499_v4  ;;  %v2614_v37 = vrot.slane %v2235_v55, 4 }
 0x73d   :  { %v5889_v33 = vpop.permute.xlu2 %3217  ;;  %v2216_v35 = vrot.slane %v2204_v9, 4  ;;  %v3151_v42 = vrot.slane %v3139_v0, 4  ;;  %v2599_v9 = vrot.slane %v2230_v48, 4  ;;  %v2607_v45 = vrot.slane %v2227_v28, 4 }
 0x73e   :  { %v2613_v4 = vrot.slane %v2229_v27, 4 }
 0x73f   :  { %v2228_v46 = vadd.f32 %v2216_v35, %v6503_v8  ;;  %v2234_v23 = vadd.f32 %v2216_v35, %v6504_v50  ;;  %v3163_v11 = vadd.f32 %v3151_v42, %v5606_v25  ;;  %v2608_v50 = vrot.slane %v2233_v20, 4 }
 0x741   :  { %v3214_v41 = vpop.permute.xlu0 %3213  ;;  %v2611_v40 = vrot.slane %v2234_v23, 4 }
 0x745   :  { %v3120_v51 = vpop.permute.xlu2 %3119 }
 0x749   :  { %v5926_v56 = vpop.permute.xlu0 %3121  ;;  %v3216_v49 = vpop.permute.xlu1 %3215 }
 0x74a   :  { %v3130_v3 = vsel %vm498_vm0, %v3120_v51, %v5926_v56  ;;  %v3227_v52 = vsel %vm378_vm15, %v3214_v41, %v3216_v49  ;;  %v3228_v2 = vsel %vm378_vm15, %v3216_v49, %v5889_v33  ;;  %v3169_v41 = vadd.f32 %v3151_v42, %v5628_v57 }
 0x74b   :  { %v3142_v18 = vmul.f32 %v3130_v3, %v6489_v36  ;;  %v3239_v5 = vmul.f32 %v3227_v52, %v6501_v32  ;;  %v3240_v0 = vmul.f32 %v3228_v2, %v6502_v14  ;;  %v2610_v32 = vrot.slane %v2228_v46, 4 }
 0x74c   :  { %v3549_v3 = vrot.slane %v3163_v11, 4  ;;  %v3550_v42 = vrot.slane %v3169_v41, 4  ;;  %v5971_v52 = vsel %vm123_vm9, %v2604_v13, %v2605_v21  ;;  %v5975_v2 = vsel %vm123_vm9, %v2598_v47, %v2599_v9 }
 0x74d   :  { %v3154_v59 = vrot.slane %v3142_v18, 4  ;;  %v3251_v27 = vrot.slane %v3239_v5, 4  ;;  %v3252_v55 = vrot.slane %v3240_v0, 4  ;;  %v3224_v41 = vpop.permute.xlu2 %3223 }
 0x74f   :  { %v3172_v21 = vadd.f32 %v3154_v59, %v5674_v16  ;;  %v3263_v47 = vadd.f32 %v3251_v27, %v5606_v25  ;;  %v3269_v18 = vadd.f32 %v3251_v27, %v5628_v57  ;;  %v3270_v11 = vadd.f32 %v3252_v55, %v5631_v53 }
 0x751   :  { %v3118_v49 = vpop.permute.xlu1 %3117 }
 0x752   :  { %v5954_v19 = vpop.permute.xlu0 %3219  ;;  %v3128_v36 = vsel %vm498_vm0, %v5871_v1, %v3118_v49  ;;  %v3129_v8 = vsel %vm498_vm0, %v3118_v49, %v3120_v51  ;;  %v5965_v1 = vsel %vm123_vm9, %v2532_v7, %v2533_v34  ;;  %v5968_v51 = vsel %vm123_vm9, %v2535_v44, %v2536_v30 }
 0x753   :  { %v3229_v48 = vsel %vm378_vm15, %v5889_v33, %v5954_v19  ;;  %v3140_v14 = vmul.f32 %v3128_v36, %v6485_v39  ;;  %v3141_v35 = vmul.f32 %v3129_v8, %v6487_v60  ;;  %v5978_v39 = vsel %vm123_vm9, %v2601_v38, %v2602_v24 }
 0x754   :  { %v3241_v33 = vmul.f32 %v3229_v48, %v6500_v43  ;;  %v5981_v60 = vsel %vm123_vm9, %v2613_v4, %v2614_v37  ;;  %v3166_v7 = vadd.f32 %v3154_v59, %v5671_v31  ;;  %v5985_v34 = vsel %vm123_vm9, %v2607_v45, %v2608_v50  ;;  %v6511_v48 = vld [vmem:[#allocation15_spill] sm:$0xff] }
 0x755   :  { %v5988_v44 = vsel %vm123_vm9, %v2610_v32, %v2611_v40  ;;  %v3152_v30 = vrot.slane %v3140_v14, 4  ;;  %v3153_v13 = vrot.slane %v3141_v35, 4  ;;  %v5991_v43 = vsel %vm123_vm9, %v3549_v3, %v3550_v42  ;;  %v6512_v40 = vld [vmem:[#allocation19_spill] sm:$0xff]  ;;  %v6513_v35 = vld [vmem:[#allocation26_spill] sm:$0xff]  ;;  %v6514_v42 = vld [vmem:[#allocation44_spill] sm:$0xff] }
 0x756   :  { %v3264_v38 = vadd.f32 %v3252_v55, %v5625_v22  ;;  %v3253_v9 = vrot.slane %v3241_v33, 4  ;;  %v3558_v23 = vrot.slane %v3166_v7, 4  ;;  %v3559_v45 = vrot.slane %v3172_v21, 4 }
 0x757   :  { %v3164_v0 = vadd.f32 %v3152_v30, %v5625_v22  ;;  %v3165_v49 = vadd.f32 %v3153_v13, %v5655_v54  ;;  %v3170_v57 = vadd.f32 %v3152_v30, %v5631_v53  ;;  %v3628_v50 = vrot.slane %v3263_v47, 4 }
 0x758   :  { %v3629_v59 = vrot.slane %v3269_v18, 4  ;;  %v3631_v22 = vrot.slane %v3264_v38, 4  ;;  %v3632_v14 = vrot.slane %v3270_v11, 4 }
 0x759   :  { %v3124_v28 = vpop.permute.xlu1 %3123  ;;  %v3552_v33 = vrot.slane %v3164_v0, 4  ;;  %v3555_v7 = vrot.slane %v3165_v49, 4 }
 0x75a   :  { %v3226_v20 = vpop.permute.xlu0 %3225  ;;  %v3131_v24 = vsel %vm498_vm0, %v5926_v56, %v3124_v28  ;;  %v3132_v46 = vsel %vm498_vm0, %v3124_v28, %v5863_v61  ;;  %v6510_v56 = vld [vmem:[#allocation48_spill] sm:$0xff] }
 0x75b   :  { %v3143_v5 = vmul.f32 %v3131_v24, %v6490_v29  ;;  %v3144_v25 = vmul.f32 %v3132_v46, %v6493_v63  ;;  %v3232_v4 = vsel %vm378_vm15, %v3224_v41, %v3226_v20  ;;  %v3171_v37 = vadd.f32 %v3153_v13, %v6510_v56 }
 0x75c   :  { %v3244_v8 = vmul.f32 %v3232_v4, %v6505_v10  ;;  %v3265_v29 = vadd.f32 %v3253_v9, %v5655_v54  ;;  %v3271_v63 = vadd.f32 %v3253_v9, %v6510_v56  ;;  %v3553_v10 = vrot.slane %v3170_v57, 4 }
 0x75d   :  { %v3155_v36 = vrot.slane %v3143_v5, 4  ;;  %v3156_v61 = vrot.slane %v3144_v25, 4  ;;  %v3556_v30 = vrot.slane %v3171_v37, 4  ;;  %v6028_v25 = vsel %vm123_vm9, %v3558_v23, %v3559_v45 }
 0x75e   :  { %v3256_v55 = vrot.slane %v3244_v8, 4  ;;  %v3634_v54 = vrot.slane %v3265_v29, 4  ;;  %v3635_v21 = vrot.slane %v3271_v63, 4 }
 0x75f   :  { %v3167_v32 = vadd.f32 %v3155_v36, %v6511_v48  ;;  %v3173_v53 = vadd.f32 %v3155_v36, %v6512_v40  ;;  %v3168_v3 = vadd.f32 %v3156_v61, %v6513_v35  ;;  %v3174_v27 = vadd.f32 %v3156_v61, %v6514_v42 }
 0x760   :  { %v6022_v11 = vadd.f32 %v3256_v55, %v6513_v35  ;;  %v6025_v5 = vadd.f32 %v3256_v55, %v6514_v42  ;;  %v6040_v49 = vsel %vm123_vm9, %v3555_v7, %v3556_v30  ;;  %v6043_v57 = vsel %vm123_vm9, %v3634_v54, %v3635_v21  ;;  %v6518_v42 = vld [vmem:[#allocation20_spill] sm:$0xff]  ;;  %v6519_v55 = vld [vmem:[#allocation18_spill] sm:$0xff] }
 0x761   :  { %v3222_v13 = vpop.permute.xlu1 %3221  ;;  %v3561_v28 = vrot.slane %v3167_v32, 4  ;;  %v3562_v20 = vrot.slane %v3173_v53, 4  ;;  %v3564_v24 = vrot.slane %v3168_v3, 4  ;;  %v3565_v46 = vrot.slane %v3174_v27, 4  ;;  %v6516_v32 = vld [vmem:[#allocation21_spill] sm:$0xff]  ;;  %v6517_v53 = vld [vmem:[#allocation16_spill] sm:$0xff] }
 0x762   :  { %v3230_v47 = vsel %vm378_vm15, %v5954_v19, %v3222_v13  ;;  %v3231_v38 = vsel %vm378_vm15, %v3222_v13, %v3224_v41  ;;  %v6031_v19 = vsel %vm123_vm9, %v3628_v50, %v3629_v59  ;;  %v3643_v8 = vrot.slane %v6022_v11, 4  ;;  %v6520_v21 = vld [vmem:[#allocation22_spill] sm:$0xff] }
 0x763   :  { %v3242_v18 = vmul.f32 %v3230_v47, %v6508_v58  ;;  %v3243_v9 = vmul.f32 %v3231_v38, %v6509_v17  ;;  %v6034_v58 = vsel %vm123_vm9, %v3631_v22, %v3632_v14  ;;  %v6037_v17 = vsel %vm123_vm9, %v3552_v33, %v3553_v10  ;;  %v6515_v22 = vld [vmem:[#allocation17_spill] sm:$0xff] }
 0x764   :  { %v6050_v36 = vsel %vm123_vm9, %v3561_v28, %v3562_v20  ;;  %v6053_v61 = vsel %vm123_vm9, %v3564_v24, %v3565_v46  ;;  %v3644_v45 = vrot.slane %v6025_v5, 4  ;;  %v6521_v38 = vld [vmem:[#allocation49_spill] sm:$0xff]  ;;  %v6523_v46 = vld [vmem:[#allocation51_spill] sm:$0xff] }
 0x765   :  { %v3254_v41 = vrot.slane %v3242_v18, 4  ;;  %v3255_v0 = vrot.slane %v3243_v9, 4 }
 0x767   :  { %v3266_v23 = vadd.f32 %v3254_v41, %v5671_v31  ;;  %v3267_v4 = vadd.f32 %v3255_v0, %v6511_v48  ;;  %v3272_v56 = vadd.f32 %v3254_v41, %v5674_v16  ;;  %v3273_v37 = vadd.f32 %v3255_v0, %v6512_v40 }
 0x769   :  { %v3637_v50 = vrot.slane %v3266_v23, 4  ;;  %v3638_v29 = vrot.slane %v3272_v56, 4  ;;  %v3640_v63 = vrot.slane %v3267_v4, 4  ;;  %v3641_v31 = vrot.slane %v3273_v37, 4  ;;  %v6057_v59 = vpop.permute.xlu1 %2499  ;;  %v6524_v56 = vld [vmem:[#allocation52_spill] sm:$0xff] }
 0x76a   :  { %v2502_v16 = vadd.f32 %v6057_v59, %v5763_v6  ;;  %v2503_v48 = vadd.f32 %v6057_v59, %v6515_v22  ;;  %v2504_v40 = vadd.f32 %v6057_v59, %v6516_v32  ;;  %v2505_v14 = vadd.f32 %v6057_v59, %v6517_v53 }
 0x76b   :  { %v6068_v35 = vsel %vm123_vm9, %v3637_v50, %v3638_v29  ;;  %v6071_v3 = vsel %vm123_vm9, %v3640_v63, %v3641_v31  ;;  %v2506_v27 = vadd.f32 %v6057_v59, %v6518_v42  ;;  %v2507_v6 = vadd.f32 %v6057_v59, %v6519_v55  ;;  %v6525_v29 = vld [vmem:[#allocation53_spill] sm:$0xff] }
 0x76c   :  { %v2544_v33 = vadd.f32 %v5912_v62, %v2502_v16  ;;  %v2545_v10 = vadd.f32 %v5915_v12, %v2503_v48  ;;  %v2546_v7 = vadd.f32 %v5918_v15, %v2504_v40  ;;  %v2547_v30 = vadd.f32 %v5929_v26, %v2505_v14  ;;  %v6526_v40 = vld [vmem:[#allocation54_spill] sm:$0xff] }
 0x76d   :  { %v2548_v13 = vadd.f32 %v5965_v1, %v2506_v27  ;;  %v2549_v54 = vadd.f32 %v5968_v51, %v2507_v6  ;;  %v2580_v47 = vadd.f32 %v6520_v21, %v6057_v59  ;;  %v2581_v28 = vadd.f32 %v6521_v38, %v6057_v59  ;;  %v6522_v1 = vld [vmem:[#allocation50_spill] sm:$0xff]  ;;  %v6527_v6 = vld [vmem:[#allocation55_spill] sm:$0xff] }
 0x76e   :  { %vm2550_vm13 = vcmp.ge.f32.partialorder %v2544_v33, 0.0  ;;  %vm2551_vm14 = vcmp.ge.f32.partialorder %v2545_v10, 0.0  ;;  %vm2552_vm15 = vcmp.ge.f32.partialorder %v2546_v7, 0.0  ;;  %vm2553_vm0 = vcmp.ge.f32.partialorder %v2547_v30, 0.0  ;;  %v6530_v38 = vld [vmem:[#allocation58_spill] sm:$0xff] }
 0x76f   :  { %vm2554_vm2 = vcmp.ge.f32.partialorder %v2548_v13, 0.0  ;;  %vm2555_vm11 = vcmp.ge.f32.partialorder %v2549_v54, 0.0  ;;  %v2556_v62 = vmul.f32 0.01, %v2544_v33  ;;  %v2557_v12 = vmul.f32 0.01, %v2545_v10 }
 0x770   :  { %v2558_v15 = vmul.f32 0.01, %v2546_v7  ;;  %v2559_v26 = vmul.f32 0.01, %v2547_v30  ;;  %v2560_v20 = vmul.f32 0.01, %v2548_v13  ;;  %v2582_v51 = vadd.f32 %v6522_v1, %v6057_v59 }
 0x771   :  { %v2561_v18 = vmul.f32 0.01, %v2549_v54  ;;  %v2562_v9 = vsel %vm2550_vm13, %v2544_v33, %v2556_v62  ;;  %v2563_v24 = vsel %vm2551_vm14, %v2545_v10, %v2557_v12  ;;  %v2583_v41 = vadd.f32 %v6523_v46, %v6057_v59  ;;  %v6531_v62 = vld [vmem:[#allocation59_spill] sm:$0xff]  ;;  %v6533_v46 = vld [vmem:[#allocation61_spill] sm:$0xff] }
 0x772   :  { %v2564_v0 = vsel %vm2552_vm15, %v2546_v7, %v2558_v15  ;;  %v2565_v23 = vsel %vm2553_vm0, %v2547_v30, %v2559_v26  ;;  %v2566_v4 = vsel %vm2554_vm2, %v2548_v13, %v2560_v20  ;;  %2568 = vst [vmem:[#allocation8] sm:$0xff] %v2562_v9  ;;  %v2584_v37 = vadd.f32 %v6524_v56, %v6057_v59  ;;  %v6528_v7 = vld [vmem:[#allocation56_spill] sm:$0xff]  ;;  %v6529_v13 = vld [vmem:[#allocation57_spill] sm:$0xff] }
 0x773   :  { %v2567_v50 = vsel %vm2555_vm11, %v2549_v54, %v2561_v18  ;;  %2569 = vst [vmem:[#allocation8 + $0x8] sm:$0xff] %v2563_v24  ;;  %v2585_v63 = vadd.f32 %v6525_v29, %v6057_v59  ;;  %v2622_v31 = vadd.f32 %v5975_v2, %v2580_v47  ;;  %v2623_v16 = vadd.f32 %v5978_v39, %v2581_v28  ;;  %v6532_v9 = vld [vmem:[#allocation60_spill] sm:$0xff] }
 0x774   :  { %2570 = vst [vmem:[#allocation8 + $0x10] sm:$0xff] %v2564_v0  ;;  %v2624_v22 = vadd.f32 %v5971_v52, %v2582_v51  ;;  %v2625_v48 = vadd.f32 %v5985_v34, %v2583_v41  ;;  %v2626_v32 = vadd.f32 %v5988_v44, %v2584_v37  ;;  %v3531_v53 = vadd.f32 %v6526_v40, %v6057_v59  ;;  %v6535_v37 = vld [vmem:[#allocation63_spill] sm:$0xff] }
 0x775   :  { %2571 = vst [vmem:[#allocation8 + $0x18] sm:$0xff] %v2565_v23  ;;  %v2627_v14 = vadd.f32 %v5981_v60, %v2585_v63  ;;  %vm2628_vm4 = vcmp.ge.f32.partialorder %v2622_v31, 0.0  ;;  %vm2629_vm1 = vcmp.ge.f32.partialorder %v2623_v16, 0.0  ;;  %v2634_v42 = vmul.f32 0.01, %v2622_v31 }
 0x776   :  { %2572 = vst [vmem:[#allocation8 + $0x20] sm:$0xff] %v2566_v4  ;;  %vm2630_vm5 = vcmp.ge.f32.partialorder %v2624_v22, 0.0  ;;  %vm2631_vm12 = vcmp.ge.f32.partialorder %v2625_v48, 0.0  ;;  %vm2632_vm8 = vcmp.ge.f32.partialorder %v2626_v32, 0.0  ;;  %v2635_v2 = vmul.f32 0.01, %v2623_v16 }
 0x777   :  { %2573 = vst [vmem:[#allocation8 + $0x28] sm:$0xff] %v2567_v50  ;;  %vm2633_vm6 = vcmp.ge.f32.partialorder %v2627_v14, 0.0  ;;  %v2636_v52 = vmul.f32 0.01, %v2624_v22  ;;  %v2637_v39 = vmul.f32 0.01, %v2625_v48  ;;  %v2640_v34 = vsel %vm2628_vm4, %v2622_v31, %v2634_v42 }
 0x778   :  { %v2638_v44 = vmul.f32 0.01, %v2626_v32  ;;  %v2639_v27 = vmul.f32 0.01, %v2627_v14  ;;  %v2641_v55 = vsel %vm2629_vm1, %v2623_v16, %v2635_v2  ;;  %2647 = vst [vmem:[#allocation8 + $0x30] sm:$0xff] %v2640_v34  ;;  %v3532_v60 = vadd.f32 %v6527_v6, %v6057_v59  ;;  %v6536_v16 = vld [vmem:[#allocation64_spill] sm:$0xff] }
 0x779   :  { %v2642_v33 = vsel %vm2630_vm5, %v2624_v22, %v2636_v52  ;;  %v2643_v10 = vsel %vm2631_vm12, %v2625_v48, %v2637_v39  ;;  %2648 = vst [vmem:[#allocation8 + $0x38] sm:$0xff] %v2641_v55  ;;  %v3533_v30 = vadd.f32 %v6528_v7, %v6057_v59  ;;  %v3534_v54 = vadd.f32 %v6529_v13, %v6057_v59 }
 0x77a   :  { %v2644_v21 = vsel %vm2632_vm8, %v2626_v32, %v2638_v44  ;;  %v2645_v47 = vsel %vm2633_vm6, %v2627_v14, %v2639_v27  ;;  %2649 = vst [vmem:[#allocation8 + $0x40] sm:$0xff] %v2642_v33  ;;  %v3535_v28 = vadd.f32 %v6530_v38, %v6057_v59  ;;  %v3536_v12 = vadd.f32 %v6531_v62, %v6057_v59  ;;  %v6537_v32 = vld [vmem:[#allocation65_spill] sm:$0xff] }
 0x77b   :  { %2650 = vst [vmem:[#allocation8 + $0x48] sm:$0xff] %v2643_v10  ;;  %v3573_v15 = vadd.f32 %v5991_v43, %v3531_v53  ;;  %v3574_v26 = vadd.f32 %v6037_v17, %v3532_v60  ;;  %v3575_v20 = vadd.f32 %v6040_v49, %v3533_v30  ;;  %v3576_v1 = vadd.f32 %v6028_v25, %v3534_v54 }
 0x77c   :  { %2651 = vst [vmem:[#allocation8 + $0x50] sm:$0xff] %v2644_v21  ;;  %v3577_v51 = vadd.f32 %v6050_v36, %v3535_v28  ;;  %v3578_v18 = vadd.f32 %v6053_v61, %v3536_v12  ;;  %v3610_v24 = vadd.f32 %v6532_v9, %v6057_v59  ;;  %v3611_v41 = vadd.f32 %v6533_v46, %v6057_v59  ;;  %v6534_v61 = vld [vmem:[#allocation62_spill] sm:$0xff] }
 0x77d   :  { %2652 = vst [vmem:[#allocation8 + $0x58] sm:$0xff] %v2645_v47  ;;  %vm3579_vm3 = vcmp.ge.f32.partialorder %v3573_v15, 0.0  ;;  %vm3580_vm7 = vcmp.ge.f32.partialorder %v3574_v26, 0.0  ;;  %vm3581_vm10 = vcmp.ge.f32.partialorder %v3575_v20, 0.0  ;;  %vm3582_vm13 = vcmp.ge.f32.partialorder %v3576_v1, 0.0 }
 0x77e   :  { %vm3583_vm14 = vcmp.ge.f32.partialorder %v3577_v51, 0.0  ;;  %vm3584_vm15 = vcmp.ge.f32.partialorder %v3578_v18, 0.0  ;;  %v3585_v43 = vmul.f32 0.01, %v3573_v15  ;;  %v3586_v25 = vmul.f32 0.01, %v3574_v26 }
 0x77f   :  { %v3587_v17 = vmul.f32 0.01, %v3575_v20  ;;  %v3588_v49 = vmul.f32 0.01, %v3576_v1  ;;  %v3589_v36 = vmul.f32 0.01, %v3577_v51  ;;  %v3612_v0 = vadd.f32 %v6534_v61, %v6057_v59 }
 0x780   :  { %v3590_v23 = vmul.f32 0.01, %v3578_v18  ;;  %v3591_v4 = vsel %vm3579_vm3, %v3573_v15, %v3585_v43  ;;  %v3592_v56 = vsel %vm3580_vm7, %v3574_v26, %v3586_v25  ;;  %v3613_v50 = vadd.f32 %v6535_v37, %v6057_v59 }
 0x781   :  { %v3645_v29 = vsel %vm123_vm9, %v3643_v8, %v3644_v45  ;;  %v3593_v63 = vsel %vm3581_vm10, %v3575_v20, %v3587_v17  ;;  %v3594_v31 = vsel %vm3582_vm13, %v3576_v1, %v3588_v49  ;;  %3598 = vst [vmem:[#allocation8 + $0x60] sm:$0xff] %v3591_v4  ;;  %v3614_v22 = vadd.f32 %v6536_v16, %v6057_v59 }
 0x782   :  { %v3595_v48 = vsel %vm3583_vm14, %v3577_v51, %v3589_v36  ;;  %3599 = vst [vmem:[#allocation8 + $0x68] sm:$0xff] %v3592_v56  ;;  %v3615_v40 = vadd.f32 %v6537_v32, %v6057_v59  ;;  %v3652_v53 = vadd.f32 %v6031_v19, %v3610_v24  ;;  %v3653_v5 = vadd.f32 %v6034_v58, %v3611_v41 }
 0x783   :  { %v3596_v11 = vsel %vm3584_vm15, %v3578_v18, %v3590_v23  ;;  %3600 = vst [vmem:[#allocation8 + $0x70] sm:$0xff] %v3593_v63  ;;  %v3654_v8 = vadd.f32 %v6043_v57, %v3612_v0  ;;  %v3655_v45 = vadd.f32 %v6068_v35, %v3613_v50  ;;  %v3656_v14 = vadd.f32 %v6071_v3, %v3614_v22 }
 0x784   :  { %3601 = vst [vmem:[#allocation8 + $0x78] sm:$0xff] %v3594_v31  ;;  %v3657_v42 = vadd.f32 %v3645_v29, %v3615_v40  ;;  %vm3658_vm9 = vcmp.ge.f32.partialorder %v3652_v53, 0.0  ;;  %vm3659_vm0 = vcmp.ge.f32.partialorder %v3653_v5, 0.0  ;;  %v3664_v59 = vmul.f32 0.01, %v3652_v53 }
 0x785   :  { %3602 = vst [vmem:[#allocation8 + $0x80] sm:$0xff] %v3595_v48  ;;  %vm3660_vm2 = vcmp.ge.f32.partialorder %v3654_v8, 0.0  ;;  %vm3661_vm11 = vcmp.ge.f32.partialorder %v3655_v45, 0.0  ;;  %vm3662_vm4 = vcmp.ge.f32.partialorder %v3656_v14, 0.0  ;;  %v3665_v19 = vmul.f32 0.01, %v3653_v5 }
 0x786   :  { %3603 = vst [vmem:[#allocation8 + $0x88] sm:$0xff] %v3596_v11  ;;  %vm3663_vm1 = vcmp.ge.f32.partialorder %v3657_v42, 0.0  ;;  %v3666_v58 = vmul.f32 0.01, %v3654_v8  ;;  %v3667_v57 = vmul.f32 0.01, %v3655_v45  ;;  %v3670_v35 = vsel %vm3658_vm9, %v3652_v53, %v3664_v59 }
 0x787   :  { %v3668_v3 = vmul.f32 0.01, %v3656_v14  ;;  %v3669_v2 = vmul.f32 0.01, %v3657_v42  ;;  %v3671_v52 = vsel %vm3659_vm0, %v3653_v5, %v3665_v19  ;;  %3677 = vst [vmem:[#allocation8 + $0x90] sm:$0xff] %v3670_v35 }
 0x788   :  { %v3672_v39 = vsel %vm3660_vm2, %v3654_v8, %v3666_v58  ;;  %v3673_v34 = vsel %vm3661_vm11, %v3655_v45, %v3667_v57  ;;  %3678 = vst [vmem:[#allocation8 + $0x98] sm:$0xff] %v3671_v52 }
 0x789   :  { %v3674_v44 = vsel %vm3662_vm4, %v3656_v14, %v3668_v3  ;;  %v3675_v27 = vsel %vm3663_vm1, %v3657_v42, %v3669_v2  ;;  %3679 = vst [vmem:[#allocation8 + $0xa0] sm:$0xff] %v3672_v39 }
 0x78a   :  { %3680 = vst [vmem:[#allocation8 + $0xa8] sm:$0xff] %v3673_v34 }
 0x78b   :  { %3681 = vst [vmem:[#allocation8 + $0xb0] sm:$0xff] %v3674_v44 }
 0x78c   :  { %3682 = vst [vmem:[#allocation8 + $0xb8] sm:$0xff] %v3675_v27 }
 0x78d   :  { %3695 = dma.vmem_to_hbm [thread:$0]  %s3688_s23, 3072, %s3690_s13, [#allocation7], %s4055_s10, %s4055_s10, %s4056_s3  }
 0x78e   :  { %4041 = dma.done.wait [#allocation7], 3072  }
 0x78f   :  { %4042 = vsyncadd [#allocation7], 4294964224 }
 0x790   :  { %3700 = vsyncpa [#allocation6], 1 }
 0x791   :  { %3701 = vsyncpa [#allocation7], 1 }

</bundles_post_ra>
